<compile_context>
chip_gen: v7x
topology: tpu7x:2x2x1
jax: 0.10.0
libtpu: 0.0.40
codegen_flags: <defaults>
</compile_context>

<pallas_src>
import jax
import jax.numpy as jnp
from jax.experimental import pallas as pl
from jax.experimental.pallas import tpu as pltpu

# ----------------------------- small config --------------------------------
BATCH = 2
SEQ = 8
HIDDEN = 32
NUM_HEADS = 4
HEAD_DIM = HIDDEN // NUM_HEADS
NUM_LAYERS = 2
INTERMEDIATE = 64
PRE_SEQ_LEN = 4
NUM_CLASS = 3
CLS_PAD = 128          # lane-dense classifier output; cols >= NUM_CLASS are padding
VOCAB_SIZE = 50
TYPE_VOCAB = 2
MAX_POS = 64
LN_EPS = 1e-12
MASK_NEG = -10000.0    # HF-BERT additive mask value for padded sequence keys
PAD_NEG = -1e9         # cross-batch block mask / padded classifier bias -> prob ~ 0


# ------------------------------ fused kernel --------------------------------
def _make_kernel(batch):
    """Kernel closure over the (static) batch size."""

    def kernel(
        emb_ref,        # (B*S, H)      summed word+pos+type embeddings, batch-flattened
        mask_ref,       # (B*S, B*S)    additive mask: seq-key mask + cross-batch block
        pk_t_ref,       # (L, NH, D, P) prefix keys, pre-transposed (batch-invariant)
        pv_ref,         # (L, NH, P, D) prefix values (batch-invariant)
        eg_ref, eb_ref,             # (1, H) embedding LayerNorm gamma/beta
        qkvw_ref, qkvb_ref,         # (L, H, 3H), (L, 1, 3H) fused Q|K|V (Q pre-scaled)
        wo_ref, bo_ref,             # (L, H, H),  (L, 1, H)
        ln1g_ref, ln1b_ref,         # (L, 1, H)
        w1_ref, b1_ref,             # (L, H, I),  (L, 1, I)
        w2_ref, b2_ref,             # (L, I, H),  (L, 1, H)
        ln2g_ref, ln2b_ref,         # (L, 1, H)
        cw_ref, cb_ref,             # (H, CLS_PAD), (1, CLS_PAD)  padded classifier
        logits_ref,                 # out: (B, CLS_PAD)
        probs_ref,                  # out: (B, CLS_PAD)
    ):
        def layer_norm(x, g, b):
            mean = jnp.mean(x, axis=-1, keepdims=True)
            cent = x - mean
            var = jnp.mean(cent * cent, axis=-1, keepdims=True)
            return cent * jax.lax.rsqrt(var + LN_EPS) * g + b

        mask = mask_ref[...]                                        # (BS, BS)
        hidden = layer_norm(emb_ref[...], eg_ref[...], eb_ref[...]) # (BS, H)

        for li in range(NUM_LAYERS):                 # unrolled (NUM_LAYERS == 2)
            # ---- fused QKV projection for the whole batch: one MXU pass ----
            qkv = (jnp.dot(hidden, qkvw_ref[li],
                           preferred_element_type=jnp.float32) + qkvb_ref[li])

            heads = []
            for h in range(NUM_HEADS):                # unrolled (NUM_HEADS == 4)
                off = h * HEAD_DIM
                qh = qkv[:, off:off + HEAD_DIM]                          # (BS, D), pre-scaled
                kh = qkv[:, HIDDEN + off:HIDDEN + off + HEAD_DIM]        # (BS, D)
                vh = qkv[:, 2 * HIDDEN + off:2 * HIDDEN + off + HEAD_DIM]

                # two-part softmax over [prefix ; sequence] keys; the prefix
                # mask contribution is identically zero, the sequence part
                # carries both the padding mask and the cross-batch block mask
                sp = jnp.dot(qh, pk_t_ref[li, h],
                             preferred_element_type=jnp.float32)        # (BS, P)
                ss = jnp.dot(qh, kh.T,
                             preferred_element_type=jnp.float32) + mask # (BS, BS)
                m = jnp.maximum(jnp.max(sp, axis=-1, keepdims=True),
                                jnp.max(ss, axis=-1, keepdims=True))
                ep = jnp.exp(sp - m)
                es = jnp.exp(ss - m)
                inv = pl.reciprocal(jnp.sum(ep, axis=-1, keepdims=True)
                                    + jnp.sum(es, axis=-1, keepdims=True),
                                    approx=True)
                heads.append(
                    (jnp.dot(ep, pv_ref[li, h], preferred_element_type=jnp.float32)
                     + jnp.dot(es, vh, preferred_element_type=jnp.float32)) * inv)
            ctx = jnp.concatenate(heads, axis=-1)                        # (BS, H)

            # ---- output projection + residual + LayerNorm (fused) ----
            attn_out = (jnp.dot(ctx, wo_ref[li],
                                preferred_element_type=jnp.float32) + bo_ref[li])
            hidden = layer_norm(attn_out + hidden, ln1g_ref[li], ln1b_ref[li])

            # ---- GELU FFN + residual + LayerNorm (fused) ----
            inter = (jnp.dot(hidden, w1_ref[li],
                             preferred_element_type=jnp.float32) + b1_ref[li])
            # TODO(synk): HF BERT 'gelu' is exact erf-GELU; tanh approximation
            # used here for Mosaic-safe lowering (EUP tanh).
            inter = jax.nn.gelu(inter, approximate=True)
            ff = (jnp.dot(inter, w2_ref[li],
                          preferred_element_type=jnp.float32) + b2_ref[li])
            hidden = layer_norm(ff + hidden, ln2g_ref[li], ln2b_ref[li])

        # ---- [CLS] tokens -> classifier -> softmax (lane-padded to CLS_PAD) ----
        cls_rows = jnp.concatenate(
            [hidden[b * SEQ:b * SEQ + 1, :] for b in range(batch)], axis=0)   # (B, H)
        logits = (jnp.dot(cls_rows, cw_ref[...],
                          preferred_element_type=jnp.float32) + cb_ref[...])
        logits_ref[...] = logits
        lmax = jnp.max(logits, axis=-1, keepdims=True)
        e = jnp.exp(logits - lmax)
        probs_ref[...] = e / jnp.sum(e, axis=-1, keepdims=True)               # exact norm

    return kernel


# --------------------------- pallas_call builder -----------------------------
def _const_spec(shape):
    zeros = (0,) * len(shape)
    return pl.BlockSpec(shape, lambda i, _z=zeros: _z)


def _build_fused_call(batch):
    bs = batch * SEQ
    flops = (NUM_LAYERS * (
        2 * bs * HIDDEN * 3 * HIDDEN                              # fused QKV
        + NUM_HEADS * 4 * bs * HEAD_DIM * (PRE_SEQ_LEN + bs)      # attention
        + 2 * bs * HIDDEN * HIDDEN                                # output proj
        + 4 * bs * HIDDEN * INTERMEDIATE)                         # FFN
        + 2 * batch * HIDDEN * CLS_PAD)                           # classifier
    transcendentals = (NUM_LAYERS * (NUM_HEADS * bs * (PRE_SEQ_LEN + bs)
                                     + bs * INTERMEDIATE)
                       + batch * CLS_PAD)
    bytes_accessed = 4 * (
        bs * HIDDEN + bs * bs
        + 2 * NUM_LAYERS * NUM_HEADS * PRE_SEQ_LEN * HEAD_DIM
        + NUM_LAYERS * (HIDDEN * 3 * HIDDEN + 3 * HIDDEN + HIDDEN * HIDDEN
                        + 2 * HIDDEN * INTERMEDIATE + INTERMEDIATE + 8 * HIDDEN)
        + 2 * HIDDEN + HIDDEN * CLS_PAD + CLS_PAD + 2 * batch * CLS_PAD)

    in_specs = [
        _const_spec((bs, HIDDEN)),                                     # emb (flattened)
        _const_spec((bs, bs)),                                         # combined mask
        _const_spec((NUM_LAYERS, NUM_HEADS, HEAD_DIM, PRE_SEQ_LEN)),   # prefix K^T
        _const_spec((NUM_LAYERS, NUM_HEADS, PRE_SEQ_LEN, HEAD_DIM)),   # prefix V
        _const_spec((1, HIDDEN)), _const_spec((1, HIDDEN)),            # emb LN
        _const_spec((NUM_LAYERS, HIDDEN, 3 * HIDDEN)),                 # qkv_w (Q scaled)
        _const_spec((NUM_LAYERS, 1, 3 * HIDDEN)),                      # qkv_b (Q scaled)
        _const_spec((NUM_LAYERS, HIDDEN, HIDDEN)),                     # wo
        _const_spec((NUM_LAYERS, 1, HIDDEN)),                          # bo
        _const_spec((NUM_LAYERS, 1, HIDDEN)),                          # ln1_g
        _const_spec((NUM_LAYERS, 1, HIDDEN)),                          # ln1_b
        _const_spec((NUM_LAYERS, HIDDEN, INTERMEDIATE)),               # w1
        _const_spec((NUM_LAYERS, 1, INTERMEDIATE)),                    # b1
        _const_spec((NUM_LAYERS, INTERMEDIATE, HIDDEN)),               # w2
        _const_spec((NUM_LAYERS, 1, HIDDEN)),                          # b2
        _const_spec((NUM_LAYERS, 1, HIDDEN)),                          # ln2_g
        _const_spec((NUM_LAYERS, 1, HIDDEN)),                          # ln2_b
        _const_spec((HIDDEN, CLS_PAD)),                                # cls_w (padded)
        _const_spec((1, CLS_PAD)),                                     # cls_b (padded)
    ]
    out_specs = (_const_spec((batch, CLS_PAD)), _const_spec((batch, CLS_PAD)))
    out_shape = (jax.ShapeDtypeStruct((batch, CLS_PAD), jnp.float32),
                 jax.ShapeDtypeStruct((batch, CLS_PAD), jnp.float32))

    return pl.pallas_call(
        _make_kernel(batch),
        grid=(1,),
        in_specs=in_specs,
        out_specs=out_specs,
        out_shape=out_shape,
        compiler_params=pltpu.CompilerParams(
            dimension_semantics=("arbitrary",)),
        cost_estimate=pl.CostEstimate(flops=flops,
                                      transcendentals=transcendentals,
                                      bytes_accessed=bytes_accessed),
    )


# ------------------------------ parameters ----------------------------------
def init_params(key):
    def nrm(k, shape, scale=0.02):
        return jax.random.normal(k, shape, dtype=jnp.float32) * scale

    kw, kp, kt, kpre, kqkv, kwo, kw1, kw2, kcls = jax.random.split(key, 9)
    return {
        "word_emb": nrm(kw, (VOCAB_SIZE, HIDDEN)),
        "pos_emb": nrm(kp, (MAX_POS, HIDDEN)),
        "type_emb": nrm(kt, (TYPE_VOCAB, HIDDEN)),
        "emb_ln_g": jnp.ones((1, HIDDEN), jnp.float32),
        "emb_ln_b": jnp.zeros((1, HIDDEN), jnp.float32),
        # PrefixEncoder (no projection): Embedding(pre_seq_len, L*2*hidden)
        "prefix_emb": nrm(kpre, (PRE_SEQ_LEN, NUM_LAYERS * 2 * HIDDEN)),
        # per-layer weights, stacked over layers; Q|K|V fused along output dim
        "qkv_w": nrm(kqkv, (NUM_LAYERS, HIDDEN, 3 * HIDDEN)),
        "qkv_b": jnp.zeros((NUM_LAYERS, 1, 3 * HIDDEN), jnp.float32),
        "wo": nrm(kwo, (NUM_LAYERS, HIDDEN, HIDDEN)),
        "bo": jnp.zeros((NUM_LAYERS, 1, HIDDEN), jnp.float32),
        "ln1_g": jnp.ones((NUM_LAYERS, 1, HIDDEN), jnp.float32),
        "ln1_b": jnp.zeros((NUM_LAYERS, 1, HIDDEN), jnp.float32),
        "w1": nrm(kw1, (NUM_LAYERS, HIDDEN, INTERMEDIATE)),
        "b1": jnp.zeros((NUM_LAYERS, 1, INTERMEDIATE), jnp.float32),
        "w2": nrm(kw2, (NUM_LAYERS, INTERMEDIATE, HIDDEN)),
        "b2": jnp.zeros((NUM_LAYERS, 1, HIDDEN), jnp.float32),
        "ln2_g": jnp.ones((NUM_LAYERS, 1, HIDDEN), jnp.float32),
        "ln2_b": jnp.zeros((NUM_LAYERS, 1, HIDDEN), jnp.float32),
        "cls_w": nrm(kcls, (HIDDEN, NUM_CLASS)),
        "cls_b": jnp.zeros((NUM_CLASS,), jnp.float32),
    }


def prepare_constants(params):
    """One-time per-parameter-set preprocessing.

    Mirrors ACDModelWithPrefix.get_prompt (dropout = identity in eval) but
    without the batch broadcast (prefix K/V are batch-invariant), folds the
    attention scale 1/sqrt(D) into the Q slice of the fused Q|K|V weights,
    and builds lane-padded classifier weights (pad bias -1e9 -> ~0 prob)."""
    pkv = params["prefix_emb"].reshape(PRE_SEQ_LEN, NUM_LAYERS * 2,
                                       NUM_HEADS, HEAD_DIM)
    pkv = jnp.transpose(pkv, (1, 2, 0, 3))               # (L*2, NH, P, D)
    prefix_k = pkv[0::2]                                 # (L, NH, P, D)
    prefix_v = pkv[1::2]
    prefix_k_t = jnp.transpose(prefix_k, (0, 1, 3, 2))   # (L, NH, D, P)

    scale = 1.0 / float(HEAD_DIM) ** 0.5
    qkv_w_scaled = params["qkv_w"].at[:, :, :HIDDEN].multiply(scale)
    qkv_b_scaled = params["qkv_b"].at[:, :, :HIDDEN].multiply(scale)

    cls_w_pad = jnp.zeros((HIDDEN, CLS_PAD), jnp.float32)
    cls_w_pad = cls_w_pad.at[:, :NUM_CLASS].set(params["cls_w"])
    cls_b_pad = jnp.full((1, CLS_PAD), PAD_NEG, jnp.float32)
    cls_b_pad = cls_b_pad.at[0, :NUM_CLASS].set(params["cls_b"])
    return {"prefix_k_t": prefix_k_t, "prefix_v": prefix_v,
            "qkv_w_scaled": qkv_w_scaled, "qkv_b_scaled": qkv_b_scaled,
            "cls_w_pad": cls_w_pad, "cls_b_pad": cls_b_pad}


# ------------------------------- forward -------------------------------------
@jax.jit
def _forward_core(params, consts, input_ids, attention_mask, token_type_ids):
    b, s = input_ids.shape
    # BERT embeddings (cheap XLA gathers); position ids offset by
    # past_key_values_length = pre_seq_len
    positions = jnp.arange(s, dtype=jnp.int32) + PRE_SEQ_LEN
    emb = (jnp.take(params["word_emb"], input_ids, axis=0)
           + jnp.take(params["pos_emb"], positions, axis=0)[None]
           + jnp.take(params["type_emb"], token_type_ids, axis=0)
           ).astype(jnp.float32)
    emb_flat = emb.reshape(b * s, HIDDEN)

    # combined additive mask over sequence keys, batch-flattened:
    #  - within-batch blocks: (1 - attention_mask) * -10000 (HF extended mask);
    #    the prefix part of cat([ones(B,P), attention_mask]) maps to exactly 0
    #  - cross-batch blocks: -1e9 (forbid attention across flattened batch)
    key_add = ((1.0 - attention_mask.astype(jnp.float32)) * MASK_NEG).reshape(b * s)
    bidx = jnp.repeat(jnp.arange(b), s)
    same_batch = bidx[:, None] == bidx[None, :]
    mask2d = jnp.where(same_batch, key_add[None, :], PAD_NEG).astype(jnp.float32)

    logits_pad, probs_pad = _build_fused_call(b)(
        emb_flat, mask2d, consts["prefix_k_t"], consts["prefix_v"],
        params["emb_ln_g"], params["emb_ln_b"],
        consts["qkv_w_scaled"], consts["qkv_b_scaled"],
        params["wo"], params["bo"],
        params["ln1_g"], params["ln1_b"],
        params["w1"], params["b1"], params["w2"], params["b2"],
        params["ln2_g"], params["ln2_b"],
        consts["cls_w_pad"], consts["cls_b_pad"])

    return logits_pad[:, :NUM_CLASS], probs_pad[:, :NUM_CLASS]


def forward(params, consts, input_ids, attention_mask, token_type_ids,
            labels=None):
    """return_dict=False path: (loss, softmax(logits)) or softmax(logits)."""
    logits, probs = _forward_core(params, consts, input_ids, attention_mask,
                                  token_type_ids)
    if labels is None:
        return probs
    log_z = jax.nn.logsumexp(logits, axis=-1)
    picked = jnp.take_along_axis(logits, labels[:, None], axis=-1)[:, 0]
    loss = jnp.mean(log_z - picked)                       # CrossEntropy (mean)
    return loss, probs


# --------------------------------- main --------------------------------------
if __name__ == "__main__":
    key = jax.random.PRNGKey(0)
    pkey, ikey = jax.random.split(key)

    params = init_params(pkey)
    consts = prepare_constants(params)   # prefix K/V, scaled QKV, padded classifier

    input_ids = jax.random.randint(ikey, (BATCH, SEQ), 0, VOCAB_SIZE,
                                   dtype=jnp.int32)
    attention_mask = jnp.ones((BATCH, SEQ), jnp.float32)
    token_type_ids = jnp.zeros((BATCH, SEQ), jnp.int32)

    probs = forward(params, consts, input_ids, attention_mask, token_type_ids)
    probs = jax.block_until_ready(probs)

    assert probs.shape == (BATCH, NUM_CLASS)
    assert bool(jnp.all(jnp.isfinite(probs)))
    # softmax rows sum to 1
    assert bool(jnp.allclose(jnp.sum(probs, axis=-1), 1.0, atol=1e-5))

    # loss path (CrossEntropy over logits) also exercises the kernel
    labels = jnp.array([0, 2], dtype=jnp.int32)
    loss, probs2 = forward(params, consts, input_ids, attention_mask,
                           token_type_ids, labels)
    loss = jax.block_until_ready(loss)
    assert bool(jnp.isfinite(loss))

    print("KERNEL_OK")
</pallas_src>

<mosaic_0001>
module attributes {stable_mosaic.version = 11 : i64} {
  func.func @kernel(%arg0: i32, %arg1: memref<16x32xf32, #tpu.memory_space<vmem>>, %arg2: memref<16x16xf32, #tpu.memory_space<vmem>>, %arg3: memref<2x4x8x4xf32, #tpu.memory_space<vmem>>, %arg4: memref<2x4x4x8xf32, #tpu.memory_space<vmem>>, %arg5: memref<1x32xf32, #tpu.memory_space<vmem>>, %arg6: memref<1x32xf32, #tpu.memory_space<vmem>>, %arg7: memref<2x32x96xf32, #tpu.memory_space<vmem>>, %arg8: memref<2x1x96xf32, #tpu.memory_space<vmem>>, %arg9: memref<2x32x32xf32, #tpu.memory_space<vmem>>, %arg10: memref<2x1x32xf32, #tpu.memory_space<vmem>>, %arg11: memref<2x1x32xf32, #tpu.memory_space<vmem>>, %arg12: memref<2x1x32xf32, #tpu.memory_space<vmem>>, %arg13: memref<2x32x64xf32, #tpu.memory_space<vmem>>, %arg14: memref<2x1x64xf32, #tpu.memory_space<vmem>>, %arg15: memref<2x64x32xf32, #tpu.memory_space<vmem>>, %arg16: memref<2x1x32xf32, #tpu.memory_space<vmem>>, %arg17: memref<2x1x32xf32, #tpu.memory_space<vmem>>, %arg18: memref<2x1x32xf32, #tpu.memory_space<vmem>>, %arg19: memref<32x128xf32, #tpu.memory_space<vmem>>, %arg20: memref<1x128xf32, #tpu.memory_space<vmem>>, %arg21: memref<2x128xf32, #tpu.memory_space<vmem>>, %arg22: memref<2x128xf32, #tpu.memory_space<vmem>>) attributes {dimension_semantics = [#tpu.dimension_semantics<arbitrary>], iteration_bounds = array<i64: 1>, scalar_prefetch = 0 : i64, scratch_operands = 0 : i64, tpu.core_type = #tpu.core_type<tc>, window_params = [{pipeline_mode = #tpu.pipeline_mode<synchronous>, transform_indices = @transform_0, window_bounds = array<i64: 16, 32>}, {pipeline_mode = #tpu.pipeline_mode<synchronous>, transform_indices = @transform_1, window_bounds = array<i64: 16, 16>}, {pipeline_mode = #tpu.pipeline_mode<synchronous>, transform_indices = @transform_2, window_bounds = array<i64: 2, 4, 8, 4>}, {pipeline_mode = #tpu.pipeline_mode<synchronous>, transform_indices = @transform_3, window_bounds = array<i64: 2, 4, 4, 8>}, {pipeline_mode = #tpu.pipeline_mode<synchronous>, transform_indices = @transform_4, window_bounds = array<i64: 1, 32>}, {pipeline_mode = #tpu.pipeline_mode<synchronous>, transform_indices = @transform_5, window_bounds = array<i64: 1, 32>}, {pipeline_mode = #tpu.pipeline_mode<synchronous>, transform_indices = @transform_6, window_bounds = array<i64: 2, 32, 96>}, {pipeline_mode = #tpu.pipeline_mode<synchronous>, transform_indices = @transform_7, window_bounds = array<i64: 2, 1, 96>}, {pipeline_mode = #tpu.pipeline_mode<synchronous>, transform_indices = @transform_8, window_bounds = array<i64: 2, 32, 32>}, {pipeline_mode = #tpu.pipeline_mode<synchronous>, transform_indices = @transform_9, window_bounds = array<i64: 2, 1, 32>}, {pipeline_mode = #tpu.pipeline_mode<synchronous>, transform_indices = @transform_10, window_bounds = array<i64: 2, 1, 32>}, {pipeline_mode = #tpu.pipeline_mode<synchronous>, transform_indices = @transform_11, window_bounds = array<i64: 2, 1, 32>}, {pipeline_mode = #tpu.pipeline_mode<synchronous>, transform_indices = @transform_12, window_bounds = array<i64: 2, 32, 64>}, {pipeline_mode = #tpu.pipeline_mode<synchronous>, transform_indices = @transform_13, window_bounds = array<i64: 2, 1, 64>}, {pipeline_mode = #tpu.pipeline_mode<synchronous>, transform_indices = @transform_14, window_bounds = array<i64: 2, 64, 32>}, {pipeline_mode = #tpu.pipeline_mode<synchronous>, transform_indices = @transform_15, window_bounds = array<i64: 2, 1, 32>}, {pipeline_mode = #tpu.pipeline_mode<synchronous>, transform_indices = @transform_16, window_bounds = array<i64: 2, 1, 32>}, {pipeline_mode = #tpu.pipeline_mode<synchronous>, transform_indices = @transform_17, window_bounds = array<i64: 2, 1, 32>}, {pipeline_mode = #tpu.pipeline_mode<synchronous>, transform_indices = @transform_18, window_bounds = array<i64: 32, 128>}, {pipeline_mode = #tpu.pipeline_mode<synchronous>, transform_indices = @transform_19, window_bounds = array<i64: 1, 128>}, {pipeline_mode = #tpu.pipeline_mode<synchronous>, transform_indices = @transform_20, window_bounds = array<i64: 2, 128>}, {pipeline_mode = #tpu.pipeline_mode<synchronous>, transform_indices = @transform_21, window_bounds = array<i64: 2, 128>}]} {
    %c0 = arith.constant 0 : index
    %c0_0 = arith.constant 0 : index
    %0 = vector.load %arg2[%c0, %c0_0] : memref<16x16xf32, #tpu.memory_space<vmem>>, vector<16x16xf32>
    %c0_1 = arith.constant 0 : index
    %c0_2 = arith.constant 0 : index
    %1 = vector.load %arg1[%c0_1, %c0_2] : memref<16x32xf32, #tpu.memory_space<vmem>>, vector<16x32xf32>
    %c0_3 = arith.constant 0 : index
    %c0_4 = arith.constant 0 : index
    %2 = vector.load %arg5[%c0_3, %c0_4] : memref<1x32xf32, #tpu.memory_space<vmem>>, vector<1x32xf32>
    %c0_5 = arith.constant 0 : index
    %c0_6 = arith.constant 0 : index
    %3 = vector.load %arg6[%c0_5, %c0_6] : memref<1x32xf32, #tpu.memory_space<vmem>>, vector<1x32xf32>
    %cst = arith.constant dense<0.000000e+00> : vector<16xf32>
    %4 = vector.multi_reduction <add>, %1, %cst [1] : vector<16x32xf32> to vector<16xf32>
    %5 = vector.shape_cast %4 : vector<16xf32> to vector<16x1xf32>
    %cst_7 = arith.constant 3.200000e+01 : f32
    %6 = vector.broadcast %cst_7 : f32 to vector<16x1xf32>
    %7 = arith.divf %5, %6 : vector<16x1xf32>
    %8 = vector.broadcast %7 : vector<16x1xf32> to vector<16x32xf32>
    %9 = arith.subf %1, %8 : vector<16x32xf32>
    %10 = arith.mulf %9, %9 : vector<16x32xf32>
    %cst_8 = arith.constant dense<0.000000e+00> : vector<16xf32>
    %11 = vector.multi_reduction <add>, %10, %cst_8 [1] : vector<16x32xf32> to vector<16xf32>
    %12 = vector.shape_cast %11 : vector<16xf32> to vector<16x1xf32>
    %cst_9 = arith.constant 3.200000e+01 : f32
    %13 = vector.broadcast %cst_9 : f32 to vector<16x1xf32>
    %14 = arith.divf %12, %13 : vector<16x1xf32>
    %cst_10 = arith.constant 9.99999996E-13 : f32
    %15 = vector.broadcast %cst_10 : f32 to vector<16x1xf32>
    %16 = arith.addf %14, %15 : vector<16x1xf32>
    %17 = math.rsqrt %16 : vector<16x1xf32>
    %18 = vector.broadcast %17 : vector<16x1xf32> to vector<16x32xf32>
    %19 = arith.mulf %9, %18 : vector<16x32xf32>
    %20 = vector.broadcast %2 : vector<1x32xf32> to vector<16x32xf32>
    %21 = arith.mulf %19, %20 : vector<16x32xf32>
    %22 = vector.broadcast %3 : vector<1x32xf32> to vector<16x32xf32>
    %23 = arith.addf %21, %22 : vector<16x32xf32>
    %c0_11 = arith.constant 0 : index
    %c0_12 = arith.constant 0 : index
    %c0_13 = arith.constant 0 : index
    %24 = vector.load %arg7[%c0_11, %c0_12, %c0_13] : memref<2x32x96xf32, #tpu.memory_space<vmem>>, vector<1x32x96xf32>
    %25 = vector.shape_cast %24 : vector<1x32x96xf32> to vector<32x96xf32>
    %cst_14 = arith.constant dense<0.000000e+00> : vector<16x96xf32>
    %26 = tpu.matmul %23, %25, %cst_14 {dimension_numbers = #tpu.dot_dimension_numbers<[1], [0], [0], [1], [0, 0, 1, 1], [], []>} : vector<16x32xf32>, vector<32x96xf32>, vector<16x96xf32> -> vector<16x96xf32>
    %c0_15 = arith.constant 0 : index
    %c0_16 = arith.constant 0 : index
    %c0_17 = arith.constant 0 : index
    %27 = vector.load %arg8[%c0_15, %c0_16, %c0_17] : memref<2x1x96xf32, #tpu.memory_space<vmem>>, vector<1x1x96xf32>
    %28 = vector.shape_cast %27 : vector<1x1x96xf32> to vector<1x96xf32>
    %29 = vector.broadcast %28 : vector<1x96xf32> to vector<16x96xf32>
    %30 = arith.addf %26, %29 : vector<16x96xf32>
    %31 = vector.extract_strided_slice %30 {offsets = [0, 0], sizes = [16, 8], strides = [1, 1]} : vector<16x96xf32> to vector<16x8xf32>
    %32 = vector.extract_strided_slice %30 {offsets = [0, 32], sizes = [16, 8], strides = [1, 1]} : vector<16x96xf32> to vector<16x8xf32>
    %33 = vector.extract_strided_slice %30 {offsets = [0, 64], sizes = [16, 8], strides = [1, 1]} : vector<16x96xf32> to vector<16x8xf32>
    %c0_18 = arith.constant 0 : index
    %c0_19 = arith.constant 0 : index
    %c0_20 = arith.constant 0 : index
    %c0_21 = arith.constant 0 : index
    %34 = vector.load %arg3[%c0_18, %c0_19, %c0_20, %c0_21] : memref<2x4x8x4xf32, #tpu.memory_space<vmem>>, vector<1x1x8x4xf32>
    %35 = vector.shape_cast %34 : vector<1x1x8x4xf32> to vector<8x4xf32>
    %cst_22 = arith.constant dense<0.000000e+00> : vector<16x4xf32>
    %36 = tpu.matmul %31, %35, %cst_22 {dimension_numbers = #tpu.dot_dimension_numbers<[1], [0], [0], [1], [0, 0, 1, 1], [], []>} : vector<16x8xf32>, vector<8x4xf32>, vector<16x4xf32> -> vector<16x4xf32>
    %37 = tpu.transpose %32, [1, 0] : vector<16x8xf32> -> vector<8x16xf32>
    %cst_23 = arith.constant dense<0.000000e+00> : vector<16x16xf32>
    %38 = tpu.matmul %31, %37, %cst_23 {dimension_numbers = #tpu.dot_dimension_numbers<[1], [0], [0], [1], [0, 0, 1, 1], [], []>} : vector<16x8xf32>, vector<8x16xf32>, vector<16x16xf32> -> vector<16x16xf32>
    %39 = arith.addf %38, %0 : vector<16x16xf32>
    %cst_24 = arith.constant dense<0xFF800000> : vector<16xf32>
    %40 = vector.multi_reduction <maximumf>, %36, %cst_24 [1] : vector<16x4xf32> to vector<16xf32>
    %41 = vector.shape_cast %40 : vector<16xf32> to vector<16x1xf32>
    %cst_25 = arith.constant dense<0xFF800000> : vector<16xf32>
    %42 = vector.multi_reduction <maximumf>, %39, %cst_25 [1] : vector<16x16xf32> to vector<16xf32>
    %43 = vector.shape_cast %42 : vector<16xf32> to vector<16x1xf32>
    %44 = arith.maximumf %41, %43 : vector<16x1xf32>
    %45 = vector.broadcast %44 : vector<16x1xf32> to vector<16x4xf32>
    %46 = arith.subf %36, %45 : vector<16x4xf32>
    %47 = math.exp %46 : vector<16x4xf32>
    %48 = vector.broadcast %44 : vector<16x1xf32> to vector<16x16xf32>
    %49 = arith.subf %39, %48 : vector<16x16xf32>
    %50 = math.exp %49 : vector<16x16xf32>
    %cst_26 = arith.constant dense<0.000000e+00> : vector<16xf32>
    %51 = vector.multi_reduction <add>, %47, %cst_26 [1] : vector<16x4xf32> to vector<16xf32>
    %52 = vector.shape_cast %51 : vector<16xf32> to vector<16x1xf32>
    %cst_27 = arith.constant dense<0.000000e+00> : vector<16xf32>
    %53 = vector.multi_reduction <add>, %50, %cst_27 [1] : vector<16x16xf32> to vector<16xf32>
    %54 = vector.shape_cast %53 : vector<16xf32> to vector<16x1xf32>
    %55 = arith.addf %52, %54 : vector<16x1xf32>
    %56 = tpu.reciprocal %55 {approx = true} : vector<16x1xf32> -> vector<16x1xf32>
    %c0_28 = arith.constant 0 : index
    %c0_29 = arith.constant 0 : index
    %c0_30 = arith.constant 0 : index
    %c0_31 = arith.constant 0 : index
    %57 = vector.load %arg4[%c0_28, %c0_29, %c0_30, %c0_31] : memref<2x4x4x8xf32, #tpu.memory_space<vmem>>, vector<1x1x4x8xf32>
    %58 = vector.shape_cast %57 : vector<1x1x4x8xf32> to vector<4x8xf32>
    %cst_32 = arith.constant dense<0.000000e+00> : vector<16x8xf32>
    %59 = tpu.matmul %47, %58, %cst_32 {dimension_numbers = #tpu.dot_dimension_numbers<[1], [0], [0], [1], [0, 0, 1, 1], [], []>} : vector<16x4xf32>, vector<4x8xf32>, vector<16x8xf32> -> vector<16x8xf32>
    %cst_33 = arith.constant dense<0.000000e+00> : vector<16x8xf32>
    %60 = tpu.matmul %50, %33, %cst_33 {dimension_numbers = #tpu.dot_dimension_numbers<[1], [0], [0], [1], [0, 0, 1, 1], [], []>} : vector<16x16xf32>, vector<16x8xf32>, vector<16x8xf32> -> vector<16x8xf32>
    %61 = arith.addf %59, %60 : vector<16x8xf32>
    %62 = vector.broadcast %56 : vector<16x1xf32> to vector<16x8xf32>
    %63 = arith.mulf %61, %62 : vector<16x8xf32>
    %64 = vector.extract_strided_slice %30 {offsets = [0, 8], sizes = [16, 8], strides = [1, 1]} : vector<16x96xf32> to vector<16x8xf32>
    %65 = vector.extract_strided_slice %30 {offsets = [0, 40], sizes = [16, 8], strides = [1, 1]} : vector<16x96xf32> to vector<16x8xf32>
    %66 = vector.extract_strided_slice %30 {offsets = [0, 72], sizes = [16, 8], strides = [1, 1]} : vector<16x96xf32> to vector<16x8xf32>
    %c0_34 = arith.constant 0 : index
    %c1 = arith.constant 1 : index
    %c0_35 = arith.constant 0 : index
    %c0_36 = arith.constant 0 : index
    %67 = vector.load %arg3[%c0_34, %c1, %c0_35, %c0_36] : memref<2x4x8x4xf32, #tpu.memory_space<vmem>>, vector<1x1x8x4xf32>
    %68 = vector.shape_cast %67 : vector<1x1x8x4xf32> to vector<8x4xf32>
    %cst_37 = arith.constant dense<0.000000e+00> : vector<16x4xf32>
    %69 = tpu.matmul %64, %68, %cst_37 {dimension_numbers = #tpu.dot_dimension_numbers<[1], [0], [0], [1], [0, 0, 1, 1], [], []>} : vector<16x8xf32>, vector<8x4xf32>, vector<16x4xf32> -> vector<16x4xf32>
    %70 = tpu.transpose %65, [1, 0] : vector<16x8xf32> -> vector<8x16xf32>
    %cst_38 = arith.constant dense<0.000000e+00> : vector<16x16xf32>
    %71 = tpu.matmul %64, %70, %cst_38 {dimension_numbers = #tpu.dot_dimension_numbers<[1], [0], [0], [1], [0, 0, 1, 1], [], []>} : vector<16x8xf32>, vector<8x16xf32>, vector<16x16xf32> -> vector<16x16xf32>
    %72 = arith.addf %71, %0 : vector<16x16xf32>
    %cst_39 = arith.constant dense<0xFF800000> : vector<16xf32>
    %73 = vector.multi_reduction <maximumf>, %69, %cst_39 [1] : vector<16x4xf32> to vector<16xf32>
    %74 = vector.shape_cast %73 : vector<16xf32> to vector<16x1xf32>
    %cst_40 = arith.constant dense<0xFF800000> : vector<16xf32>
    %75 = vector.multi_reduction <maximumf>, %72, %cst_40 [1] : vector<16x16xf32> to vector<16xf32>
    %76 = vector.shape_cast %75 : vector<16xf32> to vector<16x1xf32>
    %77 = arith.maximumf %74, %76 : vector<16x1xf32>
    %78 = vector.broadcast %77 : vector<16x1xf32> to vector<16x4xf32>
    %79 = arith.subf %69, %78 : vector<16x4xf32>
    %80 = math.exp %79 : vector<16x4xf32>
    %81 = vector.broadcast %77 : vector<16x1xf32> to vector<16x16xf32>
    %82 = arith.subf %72, %81 : vector<16x16xf32>
    %83 = math.exp %82 : vector<16x16xf32>
    %cst_41 = arith.constant dense<0.000000e+00> : vector<16xf32>
    %84 = vector.multi_reduction <add>, %80, %cst_41 [1] : vector<16x4xf32> to vector<16xf32>
    %85 = vector.shape_cast %84 : vector<16xf32> to vector<16x1xf32>
    %cst_42 = arith.constant dense<0.000000e+00> : vector<16xf32>
    %86 = vector.multi_reduction <add>, %83, %cst_42 [1] : vector<16x16xf32> to vector<16xf32>
    %87 = vector.shape_cast %86 : vector<16xf32> to vector<16x1xf32>
    %88 = arith.addf %85, %87 : vector<16x1xf32>
    %89 = tpu.reciprocal %88 {approx = true} : vector<16x1xf32> -> vector<16x1xf32>
    %c0_43 = arith.constant 0 : index
    %c1_44 = arith.constant 1 : index
    %c0_45 = arith.constant 0 : index
    %c0_46 = arith.constant 0 : index
    %90 = vector.load %arg4[%c0_43, %c1_44, %c0_45, %c0_46] : memref<2x4x4x8xf32, #tpu.memory_space<vmem>>, vector<1x1x4x8xf32>
    %91 = vector.shape_cast %90 : vector<1x1x4x8xf32> to vector<4x8xf32>
    %cst_47 = arith.constant dense<0.000000e+00> : vector<16x8xf32>
    %92 = tpu.matmul %80, %91, %cst_47 {dimension_numbers = #tpu.dot_dimension_numbers<[1], [0], [0], [1], [0, 0, 1, 1], [], []>} : vector<16x4xf32>, vector<4x8xf32>, vector<16x8xf32> -> vector<16x8xf32>
    %cst_48 = arith.constant dense<0.000000e+00> : vector<16x8xf32>
    %93 = tpu.matmul %83, %66, %cst_48 {dimension_numbers = #tpu.dot_dimension_numbers<[1], [0], [0], [1], [0, 0, 1, 1], [], []>} : vector<16x16xf32>, vector<16x8xf32>, vector<16x8xf32> -> vector<16x8xf32>
    %94 = arith.addf %92, %93 : vector<16x8xf32>
    %95 = vector.broadcast %89 : vector<16x1xf32> to vector<16x8xf32>
    %96 = arith.mulf %94, %95 : vector<16x8xf32>
    %97 = vector.extract_strided_slice %30 {offsets = [0, 16], sizes = [16, 8], strides = [1, 1]} : vector<16x96xf32> to vector<16x8xf32>
    %98 = vector.extract_strided_slice %30 {offsets = [0, 48], sizes = [16, 8], strides = [1, 1]} : vector<16x96xf32> to vector<16x8xf32>
    %99 = vector.extract_strided_slice %30 {offsets = [0, 80], sizes = [16, 8], strides = [1, 1]} : vector<16x96xf32> to vector<16x8xf32>
    %c0_49 = arith.constant 0 : index
    %c2 = arith.constant 2 : index
    %c0_50 = arith.constant 0 : index
    %c0_51 = arith.constant 0 : index
    %100 = vector.load %arg3[%c0_49, %c2, %c0_50, %c0_51] : memref<2x4x8x4xf32, #tpu.memory_space<vmem>>, vector<1x1x8x4xf32>
    %101 = vector.shape_cast %100 : vector<1x1x8x4xf32> to vector<8x4xf32>
    %cst_52 = arith.constant dense<0.000000e+00> : vector<16x4xf32>
    %102 = tpu.matmul %97, %101, %cst_52 {dimension_numbers = #tpu.dot_dimension_numbers<[1], [0], [0], [1], [0, 0, 1, 1], [], []>} : vector<16x8xf32>, vector<8x4xf32>, vector<16x4xf32> -> vector<16x4xf32>
    %103 = tpu.transpose %98, [1, 0] : vector<16x8xf32> -> vector<8x16xf32>
    %cst_53 = arith.constant dense<0.000000e+00> : vector<16x16xf32>
    %104 = tpu.matmul %97, %103, %cst_53 {dimension_numbers = #tpu.dot_dimension_numbers<[1], [0], [0], [1], [0, 0, 1, 1], [], []>} : vector<16x8xf32>, vector<8x16xf32>, vector<16x16xf32> -> vector<16x16xf32>
    %105 = arith.addf %104, %0 : vector<16x16xf32>
    %cst_54 = arith.constant dense<0xFF800000> : vector<16xf32>
    %106 = vector.multi_reduction <maximumf>, %102, %cst_54 [1] : vector<16x4xf32> to vector<16xf32>
    %107 = vector.shape_cast %106 : vector<16xf32> to vector<16x1xf32>
    %cst_55 = arith.constant dense<0xFF800000> : vector<16xf32>
    %108 = vector.multi_reduction <maximumf>, %105, %cst_55 [1] : vector<16x16xf32> to vector<16xf32>
    %109 = vector.shape_cast %108 : vector<16xf32> to vector<16x1xf32>
    %110 = arith.maximumf %107, %109 : vector<16x1xf32>
    %111 = vector.broadcast %110 : vector<16x1xf32> to vector<16x4xf32>
    %112 = arith.subf %102, %111 : vector<16x4xf32>
    %113 = math.exp %112 : vector<16x4xf32>
    %114 = vector.broadcast %110 : vector<16x1xf32> to vector<16x16xf32>
    %115 = arith.subf %105, %114 : vector<16x16xf32>
    %116 = math.exp %115 : vector<16x16xf32>
    %cst_56 = arith.constant dense<0.000000e+00> : vector<16xf32>
    %117 = vector.multi_reduction <add>, %113, %cst_56 [1] : vector<16x4xf32> to vector<16xf32>
    %118 = vector.shape_cast %117 : vector<16xf32> to vector<16x1xf32>
    %cst_57 = arith.constant dense<0.000000e+00> : vector<16xf32>
    %119 = vector.multi_reduction <add>, %116, %cst_57 [1] : vector<16x16xf32> to vector<16xf32>
    %120 = vector.shape_cast %119 : vector<16xf32> to vector<16x1xf32>
    %121 = arith.addf %118, %120 : vector<16x1xf32>
    %122 = tpu.reciprocal %121 {approx = true} : vector<16x1xf32> -> vector<16x1xf32>
    %c0_58 = arith.constant 0 : index
    %c2_59 = arith.constant 2 : index
    %c0_60 = arith.constant 0 : index
    %c0_61 = arith.constant 0 : index
    %123 = vector.load %arg4[%c0_58, %c2_59, %c0_60, %c0_61] : memref<2x4x4x8xf32, #tpu.memory_space<vmem>>, vector<1x1x4x8xf32>
    %124 = vector.shape_cast %123 : vector<1x1x4x8xf32> to vector<4x8xf32>
    %cst_62 = arith.constant dense<0.000000e+00> : vector<16x8xf32>
    %125 = tpu.matmul %113, %124, %cst_62 {dimension_numbers = #tpu.dot_dimension_numbers<[1], [0], [0], [1], [0, 0, 1, 1], [], []>} : vector<16x4xf32>, vector<4x8xf32>, vector<16x8xf32> -> vector<16x8xf32>
    %cst_63 = arith.constant dense<0.000000e+00> : vector<16x8xf32>
    %126 = tpu.matmul %116, %99, %cst_63 {dimension_numbers = #tpu.dot_dimension_numbers<[1], [0], [0], [1], [0, 0, 1, 1], [], []>} : vector<16x16xf32>, vector<16x8xf32>, vector<16x8xf32> -> vector<16x8xf32>
    %127 = arith.addf %125, %126 : vector<16x8xf32>
    %128 = vector.broadcast %122 : vector<16x1xf32> to vector<16x8xf32>
    %129 = arith.mulf %127, %128 : vector<16x8xf32>
    %130 = vector.extract_strided_slice %30 {offsets = [0, 24], sizes = [16, 8], strides = [1, 1]} : vector<16x96xf32> to vector<16x8xf32>
    %131 = vector.extract_strided_slice %30 {offsets = [0, 56], sizes = [16, 8], strides = [1, 1]} : vector<16x96xf32> to vector<16x8xf32>
    %132 = vector.extract_strided_slice %30 {offsets = [0, 88], sizes = [16, 8], strides = [1, 1]} : vector<16x96xf32> to vector<16x8xf32>
    %c0_64 = arith.constant 0 : index
    %c3 = arith.constant 3 : index
    %c0_65 = arith.constant 0 : index
    %c0_66 = arith.constant 0 : index
    %133 = vector.load %arg3[%c0_64, %c3, %c0_65, %c0_66] : memref<2x4x8x4xf32, #tpu.memory_space<vmem>>, vector<1x1x8x4xf32>
    %134 = vector.shape_cast %133 : vector<1x1x8x4xf32> to vector<8x4xf32>
    %cst_67 = arith.constant dense<0.000000e+00> : vector<16x4xf32>
    %135 = tpu.matmul %130, %134, %cst_67 {dimension_numbers = #tpu.dot_dimension_numbers<[1], [0], [0], [1], [0, 0, 1, 1], [], []>} : vector<16x8xf32>, vector<8x4xf32>, vector<16x4xf32> -> vector<16x4xf32>
    %136 = tpu.transpose %131, [1, 0] : vector<16x8xf32> -> vector<8x16xf32>
    %cst_68 = arith.constant dense<0.000000e+00> : vector<16x16xf32>
    %137 = tpu.matmul %130, %136, %cst_68 {dimension_numbers = #tpu.dot_dimension_numbers<[1], [0], [0], [1], [0, 0, 1, 1], [], []>} : vector<16x8xf32>, vector<8x16xf32>, vector<16x16xf32> -> vector<16x16xf32>
    %138 = arith.addf %137, %0 : vector<16x16xf32>
    %cst_69 = arith.constant dense<0xFF800000> : vector<16xf32>
    %139 = vector.multi_reduction <maximumf>, %135, %cst_69 [1] : vector<16x4xf32> to vector<16xf32>
    %140 = vector.shape_cast %139 : vector<16xf32> to vector<16x1xf32>
    %cst_70 = arith.constant dense<0xFF800000> : vector<16xf32>
    %141 = vector.multi_reduction <maximumf>, %138, %cst_70 [1] : vector<16x16xf32> to vector<16xf32>
    %142 = vector.shape_cast %141 : vector<16xf32> to vector<16x1xf32>
    %143 = arith.maximumf %140, %142 : vector<16x1xf32>
    %144 = vector.broadcast %143 : vector<16x1xf32> to vector<16x4xf32>
    %145 = arith.subf %135, %144 : vector<16x4xf32>
    %146 = math.exp %145 : vector<16x4xf32>
    %147 = vector.broadcast %143 : vector<16x1xf32> to vector<16x16xf32>
    %148 = arith.subf %138, %147 : vector<16x16xf32>
    %149 = math.exp %148 : vector<16x16xf32>
    %cst_71 = arith.constant dense<0.000000e+00> : vector<16xf32>
    %150 = vector.multi_reduction <add>, %146, %cst_71 [1] : vector<16x4xf32> to vector<16xf32>
    %151 = vector.shape_cast %150 : vector<16xf32> to vector<16x1xf32>
    %cst_72 = arith.constant dense<0.000000e+00> : vector<16xf32>
    %152 = vector.multi_reduction <add>, %149, %cst_72 [1] : vector<16x16xf32> to vector<16xf32>
    %153 = vector.shape_cast %152 : vector<16xf32> to vector<16x1xf32>
    %154 = arith.addf %151, %153 : vector<16x1xf32>
    %155 = tpu.reciprocal %154 {approx = true} : vector<16x1xf32> -> vector<16x1xf32>
    %c0_73 = arith.constant 0 : index
    %c3_74 = arith.constant 3 : index
    %c0_75 = arith.constant 0 : index
    %c0_76 = arith.constant 0 : index
    %156 = vector.load %arg4[%c0_73, %c3_74, %c0_75, %c0_76] : memref<2x4x4x8xf32, #tpu.memory_space<vmem>>, vector<1x1x4x8xf32>
    %157 = vector.shape_cast %156 : vector<1x1x4x8xf32> to vector<4x8xf32>
    %cst_77 = arith.constant dense<0.000000e+00> : vector<16x8xf32>
    %158 = tpu.matmul %146, %157, %cst_77 {dimension_numbers = #tpu.dot_dimension_numbers<[1], [0], [0], [1], [0, 0, 1, 1], [], []>} : vector<16x4xf32>, vector<4x8xf32>, vector<16x8xf32> -> vector<16x8xf32>
    %cst_78 = arith.constant dense<0.000000e+00> : vector<16x8xf32>
    %159 = tpu.matmul %149, %132, %cst_78 {dimension_numbers = #tpu.dot_dimension_numbers<[1], [0], [0], [1], [0, 0, 1, 1], [], []>} : vector<16x16xf32>, vector<16x8xf32>, vector<16x8xf32> -> vector<16x8xf32>
    %160 = arith.addf %158, %159 : vector<16x8xf32>
    %161 = vector.broadcast %155 : vector<16x1xf32> to vector<16x8xf32>
    %162 = arith.mulf %160, %161 : vector<16x8xf32>
    %163 = tpu.concatenate %63, %96, %129, %162 in 1 : vector<16x8xf32>, vector<16x8xf32>, vector<16x8xf32>, vector<16x8xf32> -> vector<16x32xf32>
    %c0_79 = arith.constant 0 : index
    %c0_80 = arith.constant 0 : index
    %c0_81 = arith.constant 0 : index
    %164 = vector.load %arg9[%c0_79, %c0_80, %c0_81] : memref<2x32x32xf32, #tpu.memory_space<vmem>>, vector<1x32x32xf32>
    %165 = vector.shape_cast %164 : vector<1x32x32xf32> to vector<32x32xf32>
    %cst_82 = arith.constant dense<0.000000e+00> : vector<16x32xf32>
    %166 = tpu.matmul %163, %165, %cst_82 {dimension_numbers = #tpu.dot_dimension_numbers<[1], [0], [0], [1], [0, 0, 1, 1], [], []>} : vector<16x32xf32>, vector<32x32xf32>, vector<16x32xf32> -> vector<16x32xf32>
    %c0_83 = arith.constant 0 : index
    %c0_84 = arith.constant 0 : index
    %c0_85 = arith.constant 0 : index
    %167 = vector.load %arg10[%c0_83, %c0_84, %c0_85] : memref<2x1x32xf32, #tpu.memory_space<vmem>>, vector<1x1x32xf32>
    %168 = vector.shape_cast %167 : vector<1x1x32xf32> to vector<1x32xf32>
    %169 = vector.broadcast %168 : vector<1x32xf32> to vector<16x32xf32>
    %170 = arith.addf %166, %169 : vector<16x32xf32>
    %171 = arith.addf %170, %23 : vector<16x32xf32>
    %c0_86 = arith.constant 0 : index
    %c0_87 = arith.constant 0 : index
    %c0_88 = arith.constant 0 : index
    %172 = vector.load %arg11[%c0_86, %c0_87, %c0_88] : memref<2x1x32xf32, #tpu.memory_space<vmem>>, vector<1x1x32xf32>
    %173 = vector.shape_cast %172 : vector<1x1x32xf32> to vector<1x32xf32>
    %c0_89 = arith.constant 0 : index
    %c0_90 = arith.constant 0 : index
    %c0_91 = arith.constant 0 : index
    %174 = vector.load %arg12[%c0_89, %c0_90, %c0_91] : memref<2x1x32xf32, #tpu.memory_space<vmem>>, vector<1x1x32xf32>
    %175 = vector.shape_cast %174 : vector<1x1x32xf32> to vector<1x32xf32>
    %cst_92 = arith.constant dense<0.000000e+00> : vector<16xf32>
    %176 = vector.multi_reduction <add>, %171, %cst_92 [1] : vector<16x32xf32> to vector<16xf32>
    %177 = vector.shape_cast %176 : vector<16xf32> to vector<16x1xf32>
    %cst_93 = arith.constant 3.200000e+01 : f32
    %178 = vector.broadcast %cst_93 : f32 to vector<16x1xf32>
    %179 = arith.divf %177, %178 : vector<16x1xf32>
    %180 = vector.broadcast %179 : vector<16x1xf32> to vector<16x32xf32>
    %181 = arith.subf %171, %180 : vector<16x32xf32>
    %182 = arith.mulf %181, %181 : vector<16x32xf32>
    %cst_94 = arith.constant dense<0.000000e+00> : vector<16xf32>
    %183 = vector.multi_reduction <add>, %182, %cst_94 [1] : vector<16x32xf32> to vector<16xf32>
    %184 = vector.shape_cast %183 : vector<16xf32> to vector<16x1xf32>
    %cst_95 = arith.constant 3.200000e+01 : f32
    %185 = vector.broadcast %cst_95 : f32 to vector<16x1xf32>
    %186 = arith.divf %184, %185 : vector<16x1xf32>
    %cst_96 = arith.constant 9.99999996E-13 : f32
    %187 = vector.broadcast %cst_96 : f32 to vector<16x1xf32>
    %188 = arith.addf %186, %187 : vector<16x1xf32>
    %189 = math.rsqrt %188 : vector<16x1xf32>
    %190 = vector.broadcast %189 : vector<16x1xf32> to vector<16x32xf32>
    %191 = arith.mulf %181, %190 : vector<16x32xf32>
    %192 = vector.broadcast %173 : vector<1x32xf32> to vector<16x32xf32>
    %193 = arith.mulf %191, %192 : vector<16x32xf32>
    %194 = vector.broadcast %175 : vector<1x32xf32> to vector<16x32xf32>
    %195 = arith.addf %193, %194 : vector<16x32xf32>
    %c0_97 = arith.constant 0 : index
    %c0_98 = arith.constant 0 : index
    %c0_99 = arith.constant 0 : index
    %196 = vector.load %arg13[%c0_97, %c0_98, %c0_99] : memref<2x32x64xf32, #tpu.memory_space<vmem>>, vector<1x32x64xf32>
    %197 = vector.shape_cast %196 : vector<1x32x64xf32> to vector<32x64xf32>
    %cst_100 = arith.constant dense<0.000000e+00> : vector<16x64xf32>
    %198 = tpu.matmul %195, %197, %cst_100 {dimension_numbers = #tpu.dot_dimension_numbers<[1], [0], [0], [1], [0, 0, 1, 1], [], []>} : vector<16x32xf32>, vector<32x64xf32>, vector<16x64xf32> -> vector<16x64xf32>
    %c0_101 = arith.constant 0 : index
    %c0_102 = arith.constant 0 : index
    %c0_103 = arith.constant 0 : index
    %199 = vector.load %arg14[%c0_101, %c0_102, %c0_103] : memref<2x1x64xf32, #tpu.memory_space<vmem>>, vector<1x1x64xf32>
    %200 = vector.shape_cast %199 : vector<1x1x64xf32> to vector<1x64xf32>
    %201 = vector.broadcast %200 : vector<1x64xf32> to vector<16x64xf32>
    %202 = arith.addf %198, %201 : vector<16x64xf32>
    %203 = arith.mulf %202, %202 : vector<16x64xf32>
    %204 = arith.mulf %202, %203 : vector<16x64xf32>
    %cst_104 = arith.constant 4.471500e-02 : f32
    %205 = vector.broadcast %cst_104 : f32 to vector<16x64xf32>
    %206 = arith.mulf %205, %204 : vector<16x64xf32>
    %207 = arith.addf %202, %206 : vector<16x64xf32>
    %cst_105 = arith.constant 0.797884583 : f32
    %208 = vector.broadcast %cst_105 : f32 to vector<16x64xf32>
    %209 = arith.mulf %208, %207 : vector<16x64xf32>
    %210 = math.tanh %209 : vector<16x64xf32>
    %cst_106 = arith.constant 1.000000e+00 : f32
    %211 = vector.broadcast %cst_106 : f32 to vector<16x64xf32>
    %212 = arith.addf %211, %210 : vector<16x64xf32>
    %cst_107 = arith.constant 5.000000e-01 : f32
    %213 = vector.broadcast %cst_107 : f32 to vector<16x64xf32>
    %214 = arith.mulf %213, %212 : vector<16x64xf32>
    %215 = arith.mulf %202, %214 : vector<16x64xf32>
    %c0_108 = arith.constant 0 : index
    %c0_109 = arith.constant 0 : index
    %c0_110 = arith.constant 0 : index
    %216 = vector.load %arg15[%c0_108, %c0_109, %c0_110] : memref<2x64x32xf32, #tpu.memory_space<vmem>>, vector<1x64x32xf32>
    %217 = vector.shape_cast %216 : vector<1x64x32xf32> to vector<64x32xf32>
    %cst_111 = arith.constant dense<0.000000e+00> : vector<16x32xf32>
    %218 = tpu.matmul %215, %217, %cst_111 {dimension_numbers = #tpu.dot_dimension_numbers<[1], [0], [0], [1], [0, 0, 1, 1], [], []>} : vector<16x64xf32>, vector<64x32xf32>, vector<16x32xf32> -> vector<16x32xf32>
    %c0_112 = arith.constant 0 : index
    %c0_113 = arith.constant 0 : index
    %c0_114 = arith.constant 0 : index
    %219 = vector.load %arg16[%c0_112, %c0_113, %c0_114] : memref<2x1x32xf32, #tpu.memory_space<vmem>>, vector<1x1x32xf32>
    %220 = vector.shape_cast %219 : vector<1x1x32xf32> to vector<1x32xf32>
    %221 = vector.broadcast %220 : vector<1x32xf32> to vector<16x32xf32>
    %222 = arith.addf %218, %221 : vector<16x32xf32>
    %223 = arith.addf %222, %195 : vector<16x32xf32>
    %c0_115 = arith.constant 0 : index
    %c0_116 = arith.constant 0 : index
    %c0_117 = arith.constant 0 : index
    %224 = vector.load %arg17[%c0_115, %c0_116, %c0_117] : memref<2x1x32xf32, #tpu.memory_space<vmem>>, vector<1x1x32xf32>
    %225 = vector.shape_cast %224 : vector<1x1x32xf32> to vector<1x32xf32>
    %c0_118 = arith.constant 0 : index
    %c0_119 = arith.constant 0 : index
    %c0_120 = arith.constant 0 : index
    %226 = vector.load %arg18[%c0_118, %c0_119, %c0_120] : memref<2x1x32xf32, #tpu.memory_space<vmem>>, vector<1x1x32xf32>
    %227 = vector.shape_cast %226 : vector<1x1x32xf32> to vector<1x32xf32>
    %cst_121 = arith.constant dense<0.000000e+00> : vector<16xf32>
    %228 = vector.multi_reduction <add>, %223, %cst_121 [1] : vector<16x32xf32> to vector<16xf32>
    %229 = vector.shape_cast %228 : vector<16xf32> to vector<16x1xf32>
    %cst_122 = arith.constant 3.200000e+01 : f32
    %230 = vector.broadcast %cst_122 : f32 to vector<16x1xf32>
    %231 = arith.divf %229, %230 : vector<16x1xf32>
    %232 = vector.broadcast %231 : vector<16x1xf32> to vector<16x32xf32>
    %233 = arith.subf %223, %232 : vector<16x32xf32>
    %234 = arith.mulf %233, %233 : vector<16x32xf32>
    %cst_123 = arith.constant dense<0.000000e+00> : vector<16xf32>
    %235 = vector.multi_reduction <add>, %234, %cst_123 [1] : vector<16x32xf32> to vector<16xf32>
    %236 = vector.shape_cast %235 : vector<16xf32> to vector<16x1xf32>
    %cst_124 = arith.constant 3.200000e+01 : f32
    %237 = vector.broadcast %cst_124 : f32 to vector<16x1xf32>
    %238 = arith.divf %236, %237 : vector<16x1xf32>
    %cst_125 = arith.constant 9.99999996E-13 : f32
    %239 = vector.broadcast %cst_125 : f32 to vector<16x1xf32>
    %240 = arith.addf %238, %239 : vector<16x1xf32>
    %241 = math.rsqrt %240 : vector<16x1xf32>
    %242 = vector.broadcast %241 : vector<16x1xf32> to vector<16x32xf32>
    %243 = arith.mulf %233, %242 : vector<16x32xf32>
    %244 = vector.broadcast %225 : vector<1x32xf32> to vector<16x32xf32>
    %245 = arith.mulf %243, %244 : vector<16x32xf32>
    %246 = vector.broadcast %227 : vector<1x32xf32> to vector<16x32xf32>
    %247 = arith.addf %245, %246 : vector<16x32xf32>
    %c1_126 = arith.constant 1 : index
    %c0_127 = arith.constant 0 : index
    %c0_128 = arith.constant 0 : index
    %248 = vector.load %arg7[%c1_126, %c0_127, %c0_128] : memref<2x32x96xf32, #tpu.memory_space<vmem>>, vector<1x32x96xf32>
    %249 = vector.shape_cast %248 : vector<1x32x96xf32> to vector<32x96xf32>
    %cst_129 = arith.constant dense<0.000000e+00> : vector<16x96xf32>
    %250 = tpu.matmul %247, %249, %cst_129 {dimension_numbers = #tpu.dot_dimension_numbers<[1], [0], [0], [1], [0, 0, 1, 1], [], []>} : vector<16x32xf32>, vector<32x96xf32>, vector<16x96xf32> -> vector<16x96xf32>
    %c1_130 = arith.constant 1 : index
    %c0_131 = arith.constant 0 : index
    %c0_132 = arith.constant 0 : index
    %251 = vector.load %arg8[%c1_130, %c0_131, %c0_132] : memref<2x1x96xf32, #tpu.memory_space<vmem>>, vector<1x1x96xf32>
    %252 = vector.shape_cast %251 : vector<1x1x96xf32> to vector<1x96xf32>
    %253 = vector.broadcast %252 : vector<1x96xf32> to vector<16x96xf32>
    %254 = arith.addf %250, %253 : vector<16x96xf32>
    %255 = vector.extract_strided_slice %254 {offsets = [0, 0], sizes = [16, 8], strides = [1, 1]} : vector<16x96xf32> to vector<16x8xf32>
    %256 = vector.extract_strided_slice %254 {offsets = [0, 32], sizes = [16, 8], strides = [1, 1]} : vector<16x96xf32> to vector<16x8xf32>
    %257 = vector.extract_strided_slice %254 {offsets = [0, 64], sizes = [16, 8], strides = [1, 1]} : vector<16x96xf32> to vector<16x8xf32>
    %c1_133 = arith.constant 1 : index
    %c0_134 = arith.constant 0 : index
    %c0_135 = arith.constant 0 : index
    %c0_136 = arith.constant 0 : index
    %258 = vector.load %arg3[%c1_133, %c0_134, %c0_135, %c0_136] : memref<2x4x8x4xf32, #tpu.memory_space<vmem>>, vector<1x1x8x4xf32>
    %259 = vector.shape_cast %258 : vector<1x1x8x4xf32> to vector<8x4xf32>
    %cst_137 = arith.constant dense<0.000000e+00> : vector<16x4xf32>
    %260 = tpu.matmul %255, %259, %cst_137 {dimension_numbers = #tpu.dot_dimension_numbers<[1], [0], [0], [1], [0, 0, 1, 1], [], []>} : vector<16x8xf32>, vector<8x4xf32>, vector<16x4xf32> -> vector<16x4xf32>
    %261 = tpu.transpose %256, [1, 0] : vector<16x8xf32> -> vector<8x16xf32>
    %cst_138 = arith.constant dense<0.000000e+00> : vector<16x16xf32>
    %262 = tpu.matmul %255, %261, %cst_138 {dimension_numbers = #tpu.dot_dimension_numbers<[1], [0], [0], [1], [0, 0, 1, 1], [], []>} : vector<16x8xf32>, vector<8x16xf32>, vector<16x16xf32> -> vector<16x16xf32>
    %263 = arith.addf %262, %0 : vector<16x16xf32>
    %cst_139 = arith.constant dense<0xFF800000> : vector<16xf32>
    %264 = vector.multi_reduction <maximumf>, %260, %cst_139 [1] : vector<16x4xf32> to vector<16xf32>
    %265 = vector.shape_cast %264 : vector<16xf32> to vector<16x1xf32>
    %cst_140 = arith.constant dense<0xFF800000> : vector<16xf32>
    %266 = vector.multi_reduction <maximumf>, %263, %cst_140 [1] : vector<16x16xf32> to vector<16xf32>
    %267 = vector.shape_cast %266 : vector<16xf32> to vector<16x1xf32>
    %268 = arith.maximumf %265, %267 : vector<16x1xf32>
    %269 = vector.broadcast %268 : vector<16x1xf32> to vector<16x4xf32>
    %270 = arith.subf %260, %269 : vector<16x4xf32>
    %271 = math.exp %270 : vector<16x4xf32>
    %272 = vector.broadcast %268 : vector<16x1xf32> to vector<16x16xf32>
    %273 = arith.subf %263, %272 : vector<16x16xf32>
    %274 = math.exp %273 : vector<16x16xf32>
    %cst_141 = arith.constant dense<0.000000e+00> : vector<16xf32>
    %275 = vector.multi_reduction <add>, %271, %cst_141 [1] : vector<16x4xf32> to vector<16xf32>
    %276 = vector.shape_cast %275 : vector<16xf32> to vector<16x1xf32>
    %cst_142 = arith.constant dense<0.000000e+00> : vector<16xf32>
    %277 = vector.multi_reduction <add>, %274, %cst_142 [1] : vector<16x16xf32> to vector<16xf32>
    %278 = vector.shape_cast %277 : vector<16xf32> to vector<16x1xf32>
    %279 = arith.addf %276, %278 : vector<16x1xf32>
    %280 = tpu.reciprocal %279 {approx = true} : vector<16x1xf32> -> vector<16x1xf32>
    %c1_143 = arith.constant 1 : index
    %c0_144 = arith.constant 0 : index
    %c0_145 = arith.constant 0 : index
    %c0_146 = arith.constant 0 : index
    %281 = vector.load %arg4[%c1_143, %c0_144, %c0_145, %c0_146] : memref<2x4x4x8xf32, #tpu.memory_space<vmem>>, vector<1x1x4x8xf32>
    %282 = vector.shape_cast %281 : vector<1x1x4x8xf32> to vector<4x8xf32>
    %cst_147 = arith.constant dense<0.000000e+00> : vector<16x8xf32>
    %283 = tpu.matmul %271, %282, %cst_147 {dimension_numbers = #tpu.dot_dimension_numbers<[1], [0], [0], [1], [0, 0, 1, 1], [], []>} : vector<16x4xf32>, vector<4x8xf32>, vector<16x8xf32> -> vector<16x8xf32>
    %cst_148 = arith.constant dense<0.000000e+00> : vector<16x8xf32>
    %284 = tpu.matmul %274, %257, %cst_148 {dimension_numbers = #tpu.dot_dimension_numbers<[1], [0], [0], [1], [0, 0, 1, 1], [], []>} : vector<16x16xf32>, vector<16x8xf32>, vector<16x8xf32> -> vector<16x8xf32>
    %285 = arith.addf %283, %284 : vector<16x8xf32>
    %286 = vector.broadcast %280 : vector<16x1xf32> to vector<16x8xf32>
    %287 = arith.mulf %285, %286 : vector<16x8xf32>
    %288 = vector.extract_strided_slice %254 {offsets = [0, 8], sizes = [16, 8], strides = [1, 1]} : vector<16x96xf32> to vector<16x8xf32>
    %289 = vector.extract_strided_slice %254 {offsets = [0, 40], sizes = [16, 8], strides = [1, 1]} : vector<16x96xf32> to vector<16x8xf32>
    %290 = vector.extract_strided_slice %254 {offsets = [0, 72], sizes = [16, 8], strides = [1, 1]} : vector<16x96xf32> to vector<16x8xf32>
    %c1_149 = arith.constant 1 : index
    %c1_150 = arith.constant 1 : index
    %c0_151 = arith.constant 0 : index
    %c0_152 = arith.constant 0 : index
    %291 = vector.load %arg3[%c1_149, %c1_150, %c0_151, %c0_152] : memref<2x4x8x4xf32, #tpu.memory_space<vmem>>, vector<1x1x8x4xf32>
    %292 = vector.shape_cast %291 : vector<1x1x8x4xf32> to vector<8x4xf32>
    %cst_153 = arith.constant dense<0.000000e+00> : vector<16x4xf32>
    %293 = tpu.matmul %288, %292, %cst_153 {dimension_numbers = #tpu.dot_dimension_numbers<[1], [0], [0], [1], [0, 0, 1, 1], [], []>} : vector<16x8xf32>, vector<8x4xf32>, vector<16x4xf32> -> vector<16x4xf32>
    %294 = tpu.transpose %289, [1, 0] : vector<16x8xf32> -> vector<8x16xf32>
    %cst_154 = arith.constant dense<0.000000e+00> : vector<16x16xf32>
    %295 = tpu.matmul %288, %294, %cst_154 {dimension_numbers = #tpu.dot_dimension_numbers<[1], [0], [0], [1], [0, 0, 1, 1], [], []>} : vector<16x8xf32>, vector<8x16xf32>, vector<16x16xf32> -> vector<16x16xf32>
    %296 = arith.addf %295, %0 : vector<16x16xf32>
    %cst_155 = arith.constant dense<0xFF800000> : vector<16xf32>
    %297 = vector.multi_reduction <maximumf>, %293, %cst_155 [1] : vector<16x4xf32> to vector<16xf32>
    %298 = vector.shape_cast %297 : vector<16xf32> to vector<16x1xf32>
    %cst_156 = arith.constant dense<0xFF800000> : vector<16xf32>
    %299 = vector.multi_reduction <maximumf>, %296, %cst_156 [1] : vector<16x16xf32> to vector<16xf32>
    %300 = vector.shape_cast %299 : vector<16xf32> to vector<16x1xf32>
    %301 = arith.maximumf %298, %300 : vector<16x1xf32>
    %302 = vector.broadcast %301 : vector<16x1xf32> to vector<16x4xf32>
    %303 = arith.subf %293, %302 : vector<16x4xf32>
    %304 = math.exp %303 : vector<16x4xf32>
    %305 = vector.broadcast %301 : vector<16x1xf32> to vector<16x16xf32>
    %306 = arith.subf %296, %305 : vector<16x16xf32>
    %307 = math.exp %306 : vector<16x16xf32>
    %cst_157 = arith.constant dense<0.000000e+00> : vector<16xf32>
    %308 = vector.multi_reduction <add>, %304, %cst_157 [1] : vector<16x4xf32> to vector<16xf32>
    %309 = vector.shape_cast %308 : vector<16xf32> to vector<16x1xf32>
    %cst_158 = arith.constant dense<0.000000e+00> : vector<16xf32>
    %310 = vector.multi_reduction <add>, %307, %cst_158 [1] : vector<16x16xf32> to vector<16xf32>
    %311 = vector.shape_cast %310 : vector<16xf32> to vector<16x1xf32>
    %312 = arith.addf %309, %311 : vector<16x1xf32>
    %313 = tpu.reciprocal %312 {approx = true} : vector<16x1xf32> -> vector<16x1xf32>
    %c1_159 = arith.constant 1 : index
    %c1_160 = arith.constant 1 : index
    %c0_161 = arith.constant 0 : index
    %c0_162 = arith.constant 0 : index
    %314 = vector.load %arg4[%c1_159, %c1_160, %c0_161, %c0_162] : memref<2x4x4x8xf32, #tpu.memory_space<vmem>>, vector<1x1x4x8xf32>
    %315 = vector.shape_cast %314 : vector<1x1x4x8xf32> to vector<4x8xf32>
    %cst_163 = arith.constant dense<0.000000e+00> : vector<16x8xf32>
    %316 = tpu.matmul %304, %315, %cst_163 {dimension_numbers = #tpu.dot_dimension_numbers<[1], [0], [0], [1], [0, 0, 1, 1], [], []>} : vector<16x4xf32>, vector<4x8xf32>, vector<16x8xf32> -> vector<16x8xf32>
    %cst_164 = arith.constant dense<0.000000e+00> : vector<16x8xf32>
    %317 = tpu.matmul %307, %290, %cst_164 {dimension_numbers = #tpu.dot_dimension_numbers<[1], [0], [0], [1], [0, 0, 1, 1], [], []>} : vector<16x16xf32>, vector<16x8xf32>, vector<16x8xf32> -> vector<16x8xf32>
    %318 = arith.addf %316, %317 : vector<16x8xf32>
    %319 = vector.broadcast %313 : vector<16x1xf32> to vector<16x8xf32>
    %320 = arith.mulf %318, %319 : vector<16x8xf32>
    %321 = vector.extract_strided_slice %254 {offsets = [0, 16], sizes = [16, 8], strides = [1, 1]} : vector<16x96xf32> to vector<16x8xf32>
    %322 = vector.extract_strided_slice %254 {offsets = [0, 48], sizes = [16, 8], strides = [1, 1]} : vector<16x96xf32> to vector<16x8xf32>
    %323 = vector.extract_strided_slice %254 {offsets = [0, 80], sizes = [16, 8], strides = [1, 1]} : vector<16x96xf32> to vector<16x8xf32>
    %c1_165 = arith.constant 1 : index
    %c2_166 = arith.constant 2 : index
    %c0_167 = arith.constant 0 : index
    %c0_168 = arith.constant 0 : index
    %324 = vector.load %arg3[%c1_165, %c2_166, %c0_167, %c0_168] : memref<2x4x8x4xf32, #tpu.memory_space<vmem>>, vector<1x1x8x4xf32>
    %325 = vector.shape_cast %324 : vector<1x1x8x4xf32> to vector<8x4xf32>
    %cst_169 = arith.constant dense<0.000000e+00> : vector<16x4xf32>
    %326 = tpu.matmul %321, %325, %cst_169 {dimension_numbers = #tpu.dot_dimension_numbers<[1], [0], [0], [1], [0, 0, 1, 1], [], []>} : vector<16x8xf32>, vector<8x4xf32>, vector<16x4xf32> -> vector<16x4xf32>
    %327 = tpu.transpose %322, [1, 0] : vector<16x8xf32> -> vector<8x16xf32>
    %cst_170 = arith.constant dense<0.000000e+00> : vector<16x16xf32>
    %328 = tpu.matmul %321, %327, %cst_170 {dimension_numbers = #tpu.dot_dimension_numbers<[1], [0], [0], [1], [0, 0, 1, 1], [], []>} : vector<16x8xf32>, vector<8x16xf32>, vector<16x16xf32> -> vector<16x16xf32>
    %329 = arith.addf %328, %0 : vector<16x16xf32>
    %cst_171 = arith.constant dense<0xFF800000> : vector<16xf32>
    %330 = vector.multi_reduction <maximumf>, %326, %cst_171 [1] : vector<16x4xf32> to vector<16xf32>
    %331 = vector.shape_cast %330 : vector<16xf32> to vector<16x1xf32>
    %cst_172 = arith.constant dense<0xFF800000> : vector<16xf32>
    %332 = vector.multi_reduction <maximumf>, %329, %cst_172 [1] : vector<16x16xf32> to vector<16xf32>
    %333 = vector.shape_cast %332 : vector<16xf32> to vector<16x1xf32>
    %334 = arith.maximumf %331, %333 : vector<16x1xf32>
    %335 = vector.broadcast %334 : vector<16x1xf32> to vector<16x4xf32>
    %336 = arith.subf %326, %335 : vector<16x4xf32>
    %337 = math.exp %336 : vector<16x4xf32>
    %338 = vector.broadcast %334 : vector<16x1xf32> to vector<16x16xf32>
    %339 = arith.subf %329, %338 : vector<16x16xf32>
    %340 = math.exp %339 : vector<16x16xf32>
    %cst_173 = arith.constant dense<0.000000e+00> : vector<16xf32>
    %341 = vector.multi_reduction <add>, %337, %cst_173 [1] : vector<16x4xf32> to vector<16xf32>
    %342 = vector.shape_cast %341 : vector<16xf32> to vector<16x1xf32>
    %cst_174 = arith.constant dense<0.000000e+00> : vector<16xf32>
    %343 = vector.multi_reduction <add>, %340, %cst_174 [1] : vector<16x16xf32> to vector<16xf32>
    %344 = vector.shape_cast %343 : vector<16xf32> to vector<16x1xf32>
    %345 = arith.addf %342, %344 : vector<16x1xf32>
    %346 = tpu.reciprocal %345 {approx = true} : vector<16x1xf32> -> vector<16x1xf32>
    %c1_175 = arith.constant 1 : index
    %c2_176 = arith.constant 2 : index
    %c0_177 = arith.constant 0 : index
    %c0_178 = arith.constant 0 : index
    %347 = vector.load %arg4[%c1_175, %c2_176, %c0_177, %c0_178] : memref<2x4x4x8xf32, #tpu.memory_space<vmem>>, vector<1x1x4x8xf32>
    %348 = vector.shape_cast %347 : vector<1x1x4x8xf32> to vector<4x8xf32>
    %cst_179 = arith.constant dense<0.000000e+00> : vector<16x8xf32>
    %349 = tpu.matmul %337, %348, %cst_179 {dimension_numbers = #tpu.dot_dimension_numbers<[1], [0], [0], [1], [0, 0, 1, 1], [], []>} : vector<16x4xf32>, vector<4x8xf32>, vector<16x8xf32> -> vector<16x8xf32>
    %cst_180 = arith.constant dense<0.000000e+00> : vector<16x8xf32>
    %350 = tpu.matmul %340, %323, %cst_180 {dimension_numbers = #tpu.dot_dimension_numbers<[1], [0], [0], [1], [0, 0, 1, 1], [], []>} : vector<16x16xf32>, vector<16x8xf32>, vector<16x8xf32> -> vector<16x8xf32>
    %351 = arith.addf %349, %350 : vector<16x8xf32>
    %352 = vector.broadcast %346 : vector<16x1xf32> to vector<16x8xf32>
    %353 = arith.mulf %351, %352 : vector<16x8xf32>
    %354 = vector.extract_strided_slice %254 {offsets = [0, 24], sizes = [16, 8], strides = [1, 1]} : vector<16x96xf32> to vector<16x8xf32>
    %355 = vector.extract_strided_slice %254 {offsets = [0, 56], sizes = [16, 8], strides = [1, 1]} : vector<16x96xf32> to vector<16x8xf32>
    %356 = vector.extract_strided_slice %254 {offsets = [0, 88], sizes = [16, 8], strides = [1, 1]} : vector<16x96xf32> to vector<16x8xf32>
    %c1_181 = arith.constant 1 : index
    %c3_182 = arith.constant 3 : index
    %c0_183 = arith.constant 0 : index
    %c0_184 = arith.constant 0 : index
    %357 = vector.load %arg3[%c1_181, %c3_182, %c0_183, %c0_184] : memref<2x4x8x4xf32, #tpu.memory_space<vmem>>, vector<1x1x8x4xf32>
    %358 = vector.shape_cast %357 : vector<1x1x8x4xf32> to vector<8x4xf32>
    %cst_185 = arith.constant dense<0.000000e+00> : vector<16x4xf32>
    %359 = tpu.matmul %354, %358, %cst_185 {dimension_numbers = #tpu.dot_dimension_numbers<[1], [0], [0], [1], [0, 0, 1, 1], [], []>} : vector<16x8xf32>, vector<8x4xf32>, vector<16x4xf32> -> vector<16x4xf32>
    %360 = tpu.transpose %355, [1, 0] : vector<16x8xf32> -> vector<8x16xf32>
    %cst_186 = arith.constant dense<0.000000e+00> : vector<16x16xf32>
    %361 = tpu.matmul %354, %360, %cst_186 {dimension_numbers = #tpu.dot_dimension_numbers<[1], [0], [0], [1], [0, 0, 1, 1], [], []>} : vector<16x8xf32>, vector<8x16xf32>, vector<16x16xf32> -> vector<16x16xf32>
    %362 = arith.addf %361, %0 : vector<16x16xf32>
    %cst_187 = arith.constant dense<0xFF800000> : vector<16xf32>
    %363 = vector.multi_reduction <maximumf>, %359, %cst_187 [1] : vector<16x4xf32> to vector<16xf32>
    %364 = vector.shape_cast %363 : vector<16xf32> to vector<16x1xf32>
    %cst_188 = arith.constant dense<0xFF800000> : vector<16xf32>
    %365 = vector.multi_reduction <maximumf>, %362, %cst_188 [1] : vector<16x16xf32> to vector<16xf32>
    %366 = vector.shape_cast %365 : vector<16xf32> to vector<16x1xf32>
    %367 = arith.maximumf %364, %366 : vector<16x1xf32>
    %368 = vector.broadcast %367 : vector<16x1xf32> to vector<16x4xf32>
    %369 = arith.subf %359, %368 : vector<16x4xf32>
    %370 = math.exp %369 : vector<16x4xf32>
    %371 = vector.broadcast %367 : vector<16x1xf32> to vector<16x16xf32>
    %372 = arith.subf %362, %371 : vector<16x16xf32>
    %373 = math.exp %372 : vector<16x16xf32>
    %cst_189 = arith.constant dense<0.000000e+00> : vector<16xf32>
    %374 = vector.multi_reduction <add>, %370, %cst_189 [1] : vector<16x4xf32> to vector<16xf32>
    %375 = vector.shape_cast %374 : vector<16xf32> to vector<16x1xf32>
    %cst_190 = arith.constant dense<0.000000e+00> : vector<16xf32>
    %376 = vector.multi_reduction <add>, %373, %cst_190 [1] : vector<16x16xf32> to vector<16xf32>
    %377 = vector.shape_cast %376 : vector<16xf32> to vector<16x1xf32>
    %378 = arith.addf %375, %377 : vector<16x1xf32>
    %379 = tpu.reciprocal %378 {approx = true} : vector<16x1xf32> -> vector<16x1xf32>
    %c1_191 = arith.constant 1 : index
    %c3_192 = arith.constant 3 : index
    %c0_193 = arith.constant 0 : index
    %c0_194 = arith.constant 0 : index
    %380 = vector.load %arg4[%c1_191, %c3_192, %c0_193, %c0_194] : memref<2x4x4x8xf32, #tpu.memory_space<vmem>>, vector<1x1x4x8xf32>
    %381 = vector.shape_cast %380 : vector<1x1x4x8xf32> to vector<4x8xf32>
    %cst_195 = arith.constant dense<0.000000e+00> : vector<16x8xf32>
    %382 = tpu.matmul %370, %381, %cst_195 {dimension_numbers = #tpu.dot_dimension_numbers<[1], [0], [0], [1], [0, 0, 1, 1], [], []>} : vector<16x4xf32>, vector<4x8xf32>, vector<16x8xf32> -> vector<16x8xf32>
    %cst_196 = arith.constant dense<0.000000e+00> : vector<16x8xf32>
    %383 = tpu.matmul %373, %356, %cst_196 {dimension_numbers = #tpu.dot_dimension_numbers<[1], [0], [0], [1], [0, 0, 1, 1], [], []>} : vector<16x16xf32>, vector<16x8xf32>, vector<16x8xf32> -> vector<16x8xf32>
    %384 = arith.addf %382, %383 : vector<16x8xf32>
    %385 = vector.broadcast %379 : vector<16x1xf32> to vector<16x8xf32>
    %386 = arith.mulf %384, %385 : vector<16x8xf32>
    %387 = tpu.concatenate %287, %320, %353, %386 in 1 : vector<16x8xf32>, vector<16x8xf32>, vector<16x8xf32>, vector<16x8xf32> -> vector<16x32xf32>
    %c1_197 = arith.constant 1 : index
    %c0_198 = arith.constant 0 : index
    %c0_199 = arith.constant 0 : index
    %388 = vector.load %arg9[%c1_197, %c0_198, %c0_199] : memref<2x32x32xf32, #tpu.memory_space<vmem>>, vector<1x32x32xf32>
    %389 = vector.shape_cast %388 : vector<1x32x32xf32> to vector<32x32xf32>
    %cst_200 = arith.constant dense<0.000000e+00> : vector<16x32xf32>
    %390 = tpu.matmul %387, %389, %cst_200 {dimension_numbers = #tpu.dot_dimension_numbers<[1], [0], [0], [1], [0, 0, 1, 1], [], []>} : vector<16x32xf32>, vector<32x32xf32>, vector<16x32xf32> -> vector<16x32xf32>
    %c1_201 = arith.constant 1 : index
    %c0_202 = arith.constant 0 : index
    %c0_203 = arith.constant 0 : index
    %391 = vector.load %arg10[%c1_201, %c0_202, %c0_203] : memref<2x1x32xf32, #tpu.memory_space<vmem>>, vector<1x1x32xf32>
    %392 = vector.shape_cast %391 : vector<1x1x32xf32> to vector<1x32xf32>
    %393 = vector.broadcast %392 : vector<1x32xf32> to vector<16x32xf32>
    %394 = arith.addf %390, %393 : vector<16x32xf32>
    %395 = arith.addf %394, %247 : vector<16x32xf32>
    %c1_204 = arith.constant 1 : index
    %c0_205 = arith.constant 0 : index
    %c0_206 = arith.constant 0 : index
    %396 = vector.load %arg11[%c1_204, %c0_205, %c0_206] : memref<2x1x32xf32, #tpu.memory_space<vmem>>, vector<1x1x32xf32>
    %397 = vector.shape_cast %396 : vector<1x1x32xf32> to vector<1x32xf32>
    %c1_207 = arith.constant 1 : index
    %c0_208 = arith.constant 0 : index
    %c0_209 = arith.constant 0 : index
    %398 = vector.load %arg12[%c1_207, %c0_208, %c0_209] : memref<2x1x32xf32, #tpu.memory_space<vmem>>, vector<1x1x32xf32>
    %399 = vector.shape_cast %398 : vector<1x1x32xf32> to vector<1x32xf32>
    %cst_210 = arith.constant dense<0.000000e+00> : vector<16xf32>
    %400 = vector.multi_reduction <add>, %395, %cst_210 [1] : vector<16x32xf32> to vector<16xf32>
    %401 = vector.shape_cast %400 : vector<16xf32> to vector<16x1xf32>
    %cst_211 = arith.constant 3.200000e+01 : f32
    %402 = vector.broadcast %cst_211 : f32 to vector<16x1xf32>
    %403 = arith.divf %401, %402 : vector<16x1xf32>
    %404 = vector.broadcast %403 : vector<16x1xf32> to vector<16x32xf32>
    %405 = arith.subf %395, %404 : vector<16x32xf32>
    %406 = arith.mulf %405, %405 : vector<16x32xf32>
    %cst_212 = arith.constant dense<0.000000e+00> : vector<16xf32>
    %407 = vector.multi_reduction <add>, %406, %cst_212 [1] : vector<16x32xf32> to vector<16xf32>
    %408 = vector.shape_cast %407 : vector<16xf32> to vector<16x1xf32>
    %cst_213 = arith.constant 3.200000e+01 : f32
    %409 = vector.broadcast %cst_213 : f32 to vector<16x1xf32>
    %410 = arith.divf %408, %409 : vector<16x1xf32>
    %cst_214 = arith.constant 9.99999996E-13 : f32
    %411 = vector.broadcast %cst_214 : f32 to vector<16x1xf32>
    %412 = arith.addf %410, %411 : vector<16x1xf32>
    %413 = math.rsqrt %412 : vector<16x1xf32>
    %414 = vector.broadcast %413 : vector<16x1xf32> to vector<16x32xf32>
    %415 = arith.mulf %405, %414 : vector<16x32xf32>
    %416 = vector.broadcast %397 : vector<1x32xf32> to vector<16x32xf32>
    %417 = arith.mulf %415, %416 : vector<16x32xf32>
    %418 = vector.broadcast %399 : vector<1x32xf32> to vector<16x32xf32>
    %419 = arith.addf %417, %418 : vector<16x32xf32>
    %c1_215 = arith.constant 1 : index
    %c0_216 = arith.constant 0 : index
    %c0_217 = arith.constant 0 : index
    %420 = vector.load %arg13[%c1_215, %c0_216, %c0_217] : memref<2x32x64xf32, #tpu.memory_space<vmem>>, vector<1x32x64xf32>
    %421 = vector.shape_cast %420 : vector<1x32x64xf32> to vector<32x64xf32>
    %cst_218 = arith.constant dense<0.000000e+00> : vector<16x64xf32>
    %422 = tpu.matmul %419, %421, %cst_218 {dimension_numbers = #tpu.dot_dimension_numbers<[1], [0], [0], [1], [0, 0, 1, 1], [], []>} : vector<16x32xf32>, vector<32x64xf32>, vector<16x64xf32> -> vector<16x64xf32>
    %c1_219 = arith.constant 1 : index
    %c0_220 = arith.constant 0 : index
    %c0_221 = arith.constant 0 : index
    %423 = vector.load %arg14[%c1_219, %c0_220, %c0_221] : memref<2x1x64xf32, #tpu.memory_space<vmem>>, vector<1x1x64xf32>
    %424 = vector.shape_cast %423 : vector<1x1x64xf32> to vector<1x64xf32>
    %425 = vector.broadcast %424 : vector<1x64xf32> to vector<16x64xf32>
    %426 = arith.addf %422, %425 : vector<16x64xf32>
    %427 = arith.mulf %426, %426 : vector<16x64xf32>
    %428 = arith.mulf %426, %427 : vector<16x64xf32>
    %cst_222 = arith.constant 4.471500e-02 : f32
    %429 = vector.broadcast %cst_222 : f32 to vector<16x64xf32>
    %430 = arith.mulf %429, %428 : vector<16x64xf32>
    %431 = arith.addf %426, %430 : vector<16x64xf32>
    %cst_223 = arith.constant 0.797884583 : f32
    %432 = vector.broadcast %cst_223 : f32 to vector<16x64xf32>
    %433 = arith.mulf %432, %431 : vector<16x64xf32>
    %434 = math.tanh %433 : vector<16x64xf32>
    %cst_224 = arith.constant 1.000000e+00 : f32
    %435 = vector.broadcast %cst_224 : f32 to vector<16x64xf32>
    %436 = arith.addf %435, %434 : vector<16x64xf32>
    %cst_225 = arith.constant 5.000000e-01 : f32
    %437 = vector.broadcast %cst_225 : f32 to vector<16x64xf32>
    %438 = arith.mulf %437, %436 : vector<16x64xf32>
    %439 = arith.mulf %426, %438 : vector<16x64xf32>
    %c1_226 = arith.constant 1 : index
    %c0_227 = arith.constant 0 : index
    %c0_228 = arith.constant 0 : index
    %440 = vector.load %arg15[%c1_226, %c0_227, %c0_228] : memref<2x64x32xf32, #tpu.memory_space<vmem>>, vector<1x64x32xf32>
    %441 = vector.shape_cast %440 : vector<1x64x32xf32> to vector<64x32xf32>
    %cst_229 = arith.constant dense<0.000000e+00> : vector<16x32xf32>
    %442 = tpu.matmul %439, %441, %cst_229 {dimension_numbers = #tpu.dot_dimension_numbers<[1], [0], [0], [1], [0, 0, 1, 1], [], []>} : vector<16x64xf32>, vector<64x32xf32>, vector<16x32xf32> -> vector<16x32xf32>
    %c1_230 = arith.constant 1 : index
    %c0_231 = arith.constant 0 : index
    %c0_232 = arith.constant 0 : index
    %443 = vector.load %arg16[%c1_230, %c0_231, %c0_232] : memref<2x1x32xf32, #tpu.memory_space<vmem>>, vector<1x1x32xf32>
    %444 = vector.shape_cast %443 : vector<1x1x32xf32> to vector<1x32xf32>
    %445 = vector.broadcast %444 : vector<1x32xf32> to vector<16x32xf32>
    %446 = arith.addf %442, %445 : vector<16x32xf32>
    %447 = arith.addf %446, %419 : vector<16x32xf32>
    %c1_233 = arith.constant 1 : index
    %c0_234 = arith.constant 0 : index
    %c0_235 = arith.constant 0 : index
    %448 = vector.load %arg17[%c1_233, %c0_234, %c0_235] : memref<2x1x32xf32, #tpu.memory_space<vmem>>, vector<1x1x32xf32>
    %449 = vector.shape_cast %448 : vector<1x1x32xf32> to vector<1x32xf32>
    %c1_236 = arith.constant 1 : index
    %c0_237 = arith.constant 0 : index
    %c0_238 = arith.constant 0 : index
    %450 = vector.load %arg18[%c1_236, %c0_237, %c0_238] : memref<2x1x32xf32, #tpu.memory_space<vmem>>, vector<1x1x32xf32>
    %451 = vector.shape_cast %450 : vector<1x1x32xf32> to vector<1x32xf32>
    %cst_239 = arith.constant dense<0.000000e+00> : vector<16xf32>
    %452 = vector.multi_reduction <add>, %447, %cst_239 [1] : vector<16x32xf32> to vector<16xf32>
    %453 = vector.shape_cast %452 : vector<16xf32> to vector<16x1xf32>
    %cst_240 = arith.constant 3.200000e+01 : f32
    %454 = vector.broadcast %cst_240 : f32 to vector<16x1xf32>
    %455 = arith.divf %453, %454 : vector<16x1xf32>
    %456 = vector.broadcast %455 : vector<16x1xf32> to vector<16x32xf32>
    %457 = arith.subf %447, %456 : vector<16x32xf32>
    %458 = arith.mulf %457, %457 : vector<16x32xf32>
    %cst_241 = arith.constant dense<0.000000e+00> : vector<16xf32>
    %459 = vector.multi_reduction <add>, %458, %cst_241 [1] : vector<16x32xf32> to vector<16xf32>
    %460 = vector.shape_cast %459 : vector<16xf32> to vector<16x1xf32>
    %cst_242 = arith.constant 3.200000e+01 : f32
    %461 = vector.broadcast %cst_242 : f32 to vector<16x1xf32>
    %462 = arith.divf %460, %461 : vector<16x1xf32>
    %cst_243 = arith.constant 9.99999996E-13 : f32
    %463 = vector.broadcast %cst_243 : f32 to vector<16x1xf32>
    %464 = arith.addf %462, %463 : vector<16x1xf32>
    %465 = math.rsqrt %464 : vector<16x1xf32>
    %466 = vector.broadcast %465 : vector<16x1xf32> to vector<16x32xf32>
    %467 = arith.mulf %457, %466 : vector<16x32xf32>
    %468 = vector.broadcast %449 : vector<1x32xf32> to vector<16x32xf32>
    %469 = arith.mulf %467, %468 : vector<16x32xf32>
    %470 = vector.broadcast %451 : vector<1x32xf32> to vector<16x32xf32>
    %471 = arith.addf %469, %470 : vector<16x32xf32>
    %472 = vector.extract_strided_slice %471 {offsets = [0, 0], sizes = [1, 32], strides = [1, 1]} : vector<16x32xf32> to vector<1x32xf32>
    %473 = vector.extract_strided_slice %471 {offsets = [8, 0], sizes = [1, 32], strides = [1, 1]} : vector<16x32xf32> to vector<1x32xf32>
    %474 = tpu.concatenate %472, %473 in 0 : vector<1x32xf32>, vector<1x32xf32> -> vector<2x32xf32>
    %c0_244 = arith.constant 0 : index
    %c0_245 = arith.constant 0 : index
    %475 = vector.load %arg19[%c0_244, %c0_245] : memref<32x128xf32, #tpu.memory_space<vmem>>, vector<32x128xf32>
    %cst_246 = arith.constant dense<0.000000e+00> : vector<2x128xf32>
    %476 = tpu.matmul %474, %475, %cst_246 {dimension_numbers = #tpu.dot_dimension_numbers<[1], [0], [0], [1], [0, 0, 1, 1], [], []>} : vector<2x32xf32>, vector<32x128xf32>, vector<2x128xf32> -> vector<2x128xf32>
    %c0_247 = arith.constant 0 : index
    %c0_248 = arith.constant 0 : index
    %477 = vector.load %arg20[%c0_247, %c0_248] : memref<1x128xf32, #tpu.memory_space<vmem>>, vector<1x128xf32>
    %478 = vector.broadcast %477 : vector<1x128xf32> to vector<2x128xf32>
    %479 = arith.addf %476, %478 : vector<2x128xf32>
    %c0_249 = arith.constant 0 : index
    %c0_250 = arith.constant 0 : index
    %480 = vector.load %arg21[%c0_249, %c0_250] : memref<2x128xf32, #tpu.memory_space<vmem>>, vector<2x128xf32>
    tpu.vector_store %arg21[%c0_249, %c0_250], %479 {strides = array<i32>} : memref<2x128xf32, #tpu.memory_space<vmem>>, vector<2x128xf32>,
    %cst_251 = arith.constant dense<0xFF800000> : vector<2xf32>
    %481 = vector.multi_reduction <maximumf>, %479, %cst_251 [1] : vector<2x128xf32> to vector<2xf32>
    %482 = vector.shape_cast %481 : vector<2xf32> to vector<2x1xf32>
    %483 = vector.broadcast %482 : vector<2x1xf32> to vector<2x128xf32>
    %484 = arith.subf %479, %483 : vector<2x128xf32>
    %485 = math.exp %484 : vector<2x128xf32>
    %cst_252 = arith.constant dense<0.000000e+00> : vector<2xf32>
    %486 = vector.multi_reduction <add>, %485, %cst_252 [1] : vector<2x128xf32> to vector<2xf32>
    %487 = vector.shape_cast %486 : vector<2xf32> to vector<2x1xf32>
    %488 = vector.broadcast %487 : vector<2x1xf32> to vector<2x128xf32>
    %489 = arith.divf %485, %488 : vector<2x128xf32>
    %c0_253 = arith.constant 0 : index
    %c0_254 = arith.constant 0 : index
    %490 = vector.load %arg22[%c0_253, %c0_254] : memref<2x128xf32, #tpu.memory_space<vmem>>, vector<2x128xf32>
    tpu.vector_store %arg22[%c0_253, %c0_254], %489 {strides = array<i32>} : memref<2x128xf32, #tpu.memory_space<vmem>>, vector<2x128xf32>,
    return
  }
  func.func @transform_0(%arg0: i32) -> (i32, i32) {
    %c0_i32 = arith.constant 0 : i32
    %c0_i32_0 = arith.constant 0 : i32
    %c0_i32_1 = arith.constant 0 : i32
    return %c0_i32, %c0_i32_0 : i32, i32
  }
  func.func @transform_1(%arg0: i32) -> (i32, i32) {
    %c0_i32 = arith.constant 0 : i32
    %c0_i32_0 = arith.constant 0 : i32
    %c0_i32_1 = arith.constant 0 : i32
    return %c0_i32, %c0_i32_0 : i32, i32
  }
  func.func @transform_2(%arg0: i32) -> (i32, i32, i32, i32) {
    %c0_i32 = arith.constant 0 : i32
    %c0_i32_0 = arith.constant 0 : i32
    %c0_i32_1 = arith.constant 0 : i32
    %c0_i32_2 = arith.constant 0 : i32
    %c0_i32_3 = arith.constant 0 : i32
    return %c0_i32, %c0_i32_0, %c0_i32_1, %c0_i32_2 : i32, i32, i32, i32
  }
  func.func @transform_3(%arg0: i32) -> (i32, i32, i32, i32) {
    %c0_i32 = arith.constant 0 : i32
    %c0_i32_0 = arith.constant 0 : i32
    %c0_i32_1 = arith.constant 0 : i32
    %c0_i32_2 = arith.constant 0 : i32
    %c0_i32_3 = arith.constant 0 : i32
    return %c0_i32, %c0_i32_0, %c0_i32_1, %c0_i32_2 : i32, i32, i32, i32
  }
  func.func @transform_4(%arg0: i32) -> (i32, i32) {
    %c0_i32 = arith.constant 0 : i32
    %c0_i32_0 = arith.constant 0 : i32
    %c0_i32_1 = arith.constant 0 : i32
    return %c0_i32, %c0_i32_0 : i32, i32
  }
  func.func @transform_5(%arg0: i32) -> (i32, i32) {
    %c0_i32 = arith.constant 0 : i32
    %c0_i32_0 = arith.constant 0 : i32
    %c0_i32_1 = arith.constant 0 : i32
    return %c0_i32, %c0_i32_0 : i32, i32
  }
  func.func @transform_6(%arg0: i32) -> (i32, i32, i32) {
    %c0_i32 = arith.constant 0 : i32
    %c0_i32_0 = arith.constant 0 : i32
    %c0_i32_1 = arith.constant 0 : i32
    %c0_i32_2 = arith.constant 0 : i32
    return %c0_i32, %c0_i32_0, %c0_i32_1 : i32, i32, i32
  }
  func.func @transform_7(%arg0: i32) -> (i32, i32, i32) {
    %c0_i32 = arith.constant 0 : i32
    %c0_i32_0 = arith.constant 0 : i32
    %c0_i32_1 = arith.constant 0 : i32
    %c0_i32_2 = arith.constant 0 : i32
    return %c0_i32, %c0_i32_0, %c0_i32_1 : i32, i32, i32
  }
  func.func @transform_8(%arg0: i32) -> (i32, i32, i32) {
    %c0_i32 = arith.constant 0 : i32
    %c0_i32_0 = arith.constant 0 : i32
    %c0_i32_1 = arith.constant 0 : i32
    %c0_i32_2 = arith.constant 0 : i32
    return %c0_i32, %c0_i32_0, %c0_i32_1 : i32, i32, i32
  }
  func.func @transform_9(%arg0: i32) -> (i32, i32, i32) {
    %c0_i32 = arith.constant 0 : i32
    %c0_i32_0 = arith.constant 0 : i32
    %c0_i32_1 = arith.constant 0 : i32
    %c0_i32_2 = arith.constant 0 : i32
    return %c0_i32, %c0_i32_0, %c0_i32_1 : i32, i32, i32
  }
  func.func @transform_10(%arg0: i32) -> (i32, i32, i32) {
    %c0_i32 = arith.constant 0 : i32
    %c0_i32_0 = arith.constant 0 : i32
    %c0_i32_1 = arith.constant 0 : i32
    %c0_i32_2 = arith.constant 0 : i32
    return %c0_i32, %c0_i32_0, %c0_i32_1 : i32, i32, i32
  }
  func.func @transform_11(%arg0: i32) -> (i32, i32, i32) {
    %c0_i32 = arith.constant 0 : i32
    %c0_i32_0 = arith.constant 0 : i32
    %c0_i32_1 = arith.constant 0 : i32
    %c0_i32_2 = arith.constant 0 : i32
    return %c0_i32, %c0_i32_0, %c0_i32_1 : i32, i32, i32
  }
  func.func @transform_12(%arg0: i32) -> (i32, i32, i32) {
    %c0_i32 = arith.constant 0 : i32
    %c0_i32_0 = arith.constant 0 : i32
    %c0_i32_1 = arith.constant 0 : i32
    %c0_i32_2 = arith.constant 0 : i32
    return %c0_i32, %c0_i32_0, %c0_i32_1 : i32, i32, i32
  }
  func.func @transform_13(%arg0: i32) -> (i32, i32, i32) {
    %c0_i32 = arith.constant 0 : i32
    %c0_i32_0 = arith.constant 0 : i32
    %c0_i32_1 = arith.constant 0 : i32
    %c0_i32_2 = arith.constant 0 : i32
    return %c0_i32, %c0_i32_0, %c0_i32_1 : i32, i32, i32
  }
  func.func @transform_14(%arg0: i32) -> (i32, i32, i32) {
    %c0_i32 = arith.constant 0 : i32
    %c0_i32_0 = arith.constant 0 : i32
    %c0_i32_1 = arith.constant 0 : i32
    %c0_i32_2 = arith.constant 0 : i32
    return %c0_i32, %c0_i32_0, %c0_i32_1 : i32, i32, i32
  }
  func.func @transform_15(%arg0: i32) -> (i32, i32, i32) {
    %c0_i32 = arith.constant 0 : i32
    %c0_i32_0 = arith.constant 0 : i32
    %c0_i32_1 = arith.constant 0 : i32
    %c0_i32_2 = arith.constant 0 : i32
    return %c0_i32, %c0_i32_0, %c0_i32_1 : i32, i32, i32
  }
  func.func @transform_16(%arg0: i32) -> (i32, i32, i32) {
    %c0_i32 = arith.constant 0 : i32
    %c0_i32_0 = arith.constant 0 : i32
    %c0_i32_1 = arith.constant 0 : i32
    %c0_i32_2 = arith.constant 0 : i32
    return %c0_i32, %c0_i32_0, %c0_i32_1 : i32, i32, i32
  }
  func.func @transform_17(%arg0: i32) -> (i32, i32, i32) {
    %c0_i32 = arith.constant 0 : i32
    %c0_i32_0 = arith.constant 0 : i32
    %c0_i32_1 = arith.constant 0 : i32
    %c0_i32_2 = arith.constant 0 : i32
    return %c0_i32, %c0_i32_0, %c0_i32_1 : i32, i32, i32
  }
  func.func @transform_18(%arg0: i32) -> (i32, i32) {
    %c0_i32 = arith.constant 0 : i32
    %c0_i32_0 = arith.constant 0 : i32
    %c0_i32_1 = arith.constant 0 : i32
    return %c0_i32, %c0_i32_0 : i32, i32
  }
  func.func @transform_19(%arg0: i32) -> (i32, i32) {
    %c0_i32 = arith.constant 0 : i32
    %c0_i32_0 = arith.constant 0 : i32
    %c0_i32_1 = arith.constant 0 : i32
    return %c0_i32, %c0_i32_0 : i32, i32
  }
  func.func @transform_20(%arg0: i32) -> (i32, i32) {
    %c0_i32 = arith.constant 0 : i32
    %c0_i32_0 = arith.constant 0 : i32
    %c0_i32_1 = arith.constant 0 : i32
    return %c0_i32, %c0_i32_0 : i32, i32
  }
  func.func @transform_21(%arg0: i32) -> (i32, i32) {
    %c0_i32 = arith.constant 0 : i32
    %c0_i32_0 = arith.constant 0 : i32
    %c0_i32_1 = arith.constant 0 : i32
    return %c0_i32, %c0_i32_0 : i32, i32
  }
}

</mosaic_0001>

<bundles_post_ra>
// kernel: _forward_core.1
= control target key start
LH: loop header
LB: loop body
LE: loop exit
PB: predicated region body
PF: predicated region fallthrough
CT: control target
= control target key end

     0   :  { %s6370_s0 = inlined_call_operand.vmem [shape: f32[16,32], index: 0, kind: input, shape index: {}]   ;;  %s6371_s1 = inlined_call_operand.vmem [shape: f32[16,16], index: 1, kind: input, shape index: {}]   ;;  %s6372_s2 = inlined_call_operand.vmem [shape: f32[2,4,8,4], index: 2, kind: input, shape index: {}]   ;;  %s6373_s3 = inlined_call_operand.vmem [shape: f32[2,4,4,8], index: 3, kind: input, shape index: {}]   ;;  %s6374_s4 = inlined_call_operand.vmem [shape: f32[1,32], index: 4, kind: input, shape index: {}]   ;;  %s6375_s5 = inlined_call_operand.vmem [shape: f32[1,32], index: 5, kind: input, shape index: {}]   ;;  %s6376_s6 = inlined_call_operand.vmem [shape: f32[2,32,96], index: 6, kind: input, shape index: {}]   ;;  %s6377_s7 = inlined_call_operand.vmem [shape: f32[2,1,96], index: 7, kind: input, shape index: {}]   ;;  %s6378_s8 = inlined_call_operand.vmem [shape: f32[2,32,32], index: 8, kind: input, shape index: {}]   ;;  %s6379_s9 = inlined_call_operand.vmem [shape: f32[2,1,32], index: 9, kind: input, shape index: {}]   ;;  %s6380_s10 = inlined_call_operand.vmem [shape: f32[2,1,32], index: 10, kind: input, shape index: {}]   ;;  %s6381_s11 = inlined_call_operand.vmem [shape: f32[2,1,32], index: 11, kind: input, shape index: {}]   ;;  %s6382_s12 = inlined_call_operand.vmem [shape: f32[2,32,64], index: 12, kind: input, shape index: {}]   ;;  %s6383_s13 = inlined_call_operand.vmem [shape: f32[2,1,64], index: 13, kind: input, shape index: {}]   ;;  %s6384_s14 = inlined_call_operand.vmem [shape: f32[2,64,32], index: 14, kind: input, shape index: {}]   ;;  %s6385_s15 = inlined_call_operand.vmem [shape: f32[2,1,32], index: 15, kind: input, shape index: {}]   ;;  %s6386_s16 = inlined_call_operand.vmem [shape: f32[2,1,32], index: 16, kind: input, shape index: {}]   ;;  %s6387_s17 = inlined_call_operand.vmem [shape: f32[2,1,32], index: 17, kind: input, shape index: {}]   ;;  %s6388_s18 = inlined_call_operand.vmem [shape: f32[32,128], index: 18, kind: input, shape index: {}]   ;;  %s6389_s19 = inlined_call_operand.vmem [shape: f32[1,128], index: 19, kind: input, shape index: {}]   ;;  %s6390_s20 = inlined_call_operand.hbm [shape: f32[2,128], index: 20, kind: output, shape index: {0}]   ;;  %s6391_s21 = inlined_call_operand.hbm [shape: f32[2,128], index: 21, kind: output, shape index: {1}]  }
   0x1   :  { %6410 = sst [smem:[#allocation8_spill]] %s6370_s0 }
   0x2   :  { %6411 = sst [smem:[#allocation9_spill]] %s6371_s1 }
   0x3   :  { %6412 = sst [smem:[#allocation10_spill]] %s6372_s2 }
   0x4   :  { %6413 = sst [smem:[#allocation11_spill]] %s6373_s3 }
   0x5   :  { %6414 = sst [smem:[#allocation12_spill]] %s6374_s4 }
   0x6   :  { %6415 = sst [smem:[#allocation13_spill]] %s6375_s5 }
   0x7   :  { %27 = vsyncpa [#allocation3], 0  ;;  %s6416_s26 = sld [smem:[#allocation8_spill]]  ;;  %vm75_vm0 = vcmask 261120  }
   0xd   :  { %v71_v0 = vld [vmem:[%s6416_s26] sm:$0xff]  ;;  %v72_v1 = vld [vmem:[%s6416_s26 + $0x8] sm:$0xff] }
   0xe   :  { %28 = vsyncpa [#allocation5], 0  ;;  %v76_v2 = vsel %vm75_vm0, %v71_v0, 0.0  ;;  %v79_v3 = vsel %vm75_vm0, %v72_v1, 0.0  ;;  %v119_v14 = vld [vmem:[%s6376_s6] sm:$0xff]  ;;  %v120_v15 = vld [vmem:[%s6376_s6 + $0x8] sm:$0xff] }
   0xf   :  { %77 = vadd.xlane.f32.xlu0 %v76_v2  ;;  %v121_v16 = vld [vmem:[%s6376_s6 + $0x10] sm:$0xff]  ;;  %v5012_v17 = vpack.c.bf16 %v120_v15, %v119_v14  ;;  %v122_v18 = vld [vmem:[%s6376_s6 + $0x18] sm:$0xff]  ;;  %s6417_s2 = sld [smem:[#allocation12_spill]]  ;;  %s6418_s27 = sld [smem:[#allocation13_spill]]  ;;  %v4368_v37 = vld [vmem:[%s6377_s7] ss:$0 sm:$0xff] }
  0x10   :  { %v5016_v19 = vpack.c.bf16 %v122_v18, %v121_v16  ;;  %s6419_s29 = sld [smem:[#allocation10_spill]]  ;;  %vm212_vm1 = vcmask 64512   ;;  %s6407_s30 = smov 88   ;;  %vm377_vm3 = vcmask 31744   ;;  %vm384_vm4 = vcmask 130048  }
  0x11   :  { %5013 = vmatprep.subr.bf16.mxu0 %v5012_v17  ;;  %s5472_s5 = smov 96   ;;  %s5473_s22 = smov 120   ;;  %vm5666_vm2 = vmpackc.low %vm212_vm1, %vm212_vm1  ;;  %vm515_vm5 = vcmask 1043456   ;;  %vm1779_vm6 = vcmask 195584   ;;  %vm2045_vm7 = vcmask 523264   ;;  %vm5486_vm8 = vmmov 0  }
  0x12   :  { %5015 = vmatpush3.bf16.msra.mxu0 %v5012_v17  ;;  %s6422_s25 = sld [smem:[#allocation9_spill]]  ;;  %s5474_s3 = smov 64   ;;  %vm4238_vm9 = vcmask 1040384   ;;  %vm4325_vm10 = vcmask 1041408  }
  0x13   :  { %80 = vadd.xlane.f32.xlu0 %v79_v3  ;;  %5017 = vmatprep.subr.bf16.mxu0 %v5016_v19  ;;  %s6402_s28 = smov 112   ;;  %s6401_s0 = smov 56  }
  0x14   :  { %s6404_s4 = smov 80   ;;  %s6423_s26 = sld [smem:[#allocation11_spill]] }
  0x15   :  { %v4366_v27 = vld [vmem:[%s6417_s2] ss:$0 sm:$0xff]  ;;  %s6397_s1 = smov 48   ;;  %s6398_s24 = smov 104  }
  0x16   :  { %5019 = vmatpush3.bf16.msra.mxu0 %v5016_v19  ;;  %v4367_v29 = vld [vmem:[%s6418_s27] ss:$0 sm:$0xff]  ;;  %v4382_v49 = vld [vmem:[%s6419_s29 + $0x8] sm:$0xff]  ;;  %s6400_s23 = smov 72   ;;  %s6396_s2 = smov 40  }
  0x17   :  { %v211_v36 = vld [vmem:[%s6419_s29] sm:$0xff]  ;;  %s6405_s27 = smov 16  }
  0x18   :  { %4716 = vmatprep.subr.mxu0 %v211_v36  ;;  %v5695_v59 = vld [vmem:[%s6422_s25 + $0x8] sm:$0xff]  ;;  %v5700_v60 = vld [vmem:[%s6422_s25] sm:$0xff] }
  0x9c   :  { %v78_v4 = vpop.xlane.xlu0 %77 }
  0x9d   :  { %v83_v5 = vmul.f32 0.03125, %v78_v4 }
  0x9f   :  { %v85_v6 = vsub.f32 %v71_v0, %v83_v5 }
  0xa0   :  { %v81_v7 = vpop.xlane.xlu0 %80 }
  0xa1   :  { %v84_v8 = vmul.f32 0.03125, %v81_v7  ;;  %v87_v9 = vmul.f32 %v85_v6, %v85_v6 }
  0xa3   :  { %v86_v10 = vsub.f32 %v72_v1, %v84_v8  ;;  %v89_v11 = vsel %vm75_vm0, %v87_v9, 0.0 }
  0xa4   :  { %90 = vadd.xlane.f32.xlu1 %v89_v11 }
  0xa5   :  { %v88_v12 = vmul.f32 %v86_v10, %v86_v10 }
  0xa7   :  { %v92_v13 = vsel %vm75_vm0, %v88_v12, 0.0 }
  0xa8   :  { %93 = vadd.xlane.f32.xlu1 %v92_v13  ;;  %v4395_v13 = vld [vmem:[%s6419_s29 + $0x10] sm:$0xff] }
 0x131   :  { %v91_v20 = vpop.xlane.xlu1 %90 }
 0x132   :  { %v95_v21 = vmul.f32 0.03125, %v91_v20 }
 0x134   :  { %v97_v22 = vadd.f32 1e-12, %v95_v21 }
 0x135   :  { %v94_v23 = vpop.xlane.xlu1 %93 }
 0x136   :  { %5293 = vrsqrt.f32 %v97_v22  ;;  %v96_v24 = vmul.f32 0.03125, %v94_v23 }
 0x138   :  { %v98_v25 = vadd.f32 1e-12, %v96_v24 }
 0x13a   :  { %5295 = vrsqrt.f32 %v98_v25 }
 0x140   :  { %v5294_v26 = vpop.eup %5293 }
 0x141   :  { %v101_v28 = vmul.f32 %v5294_v26, %v85_v6 }
 0x143   :  { %v109_v30 = vmul.f32 %v4366_v27, %v101_v28 }
 0x144   :  { %v5296_v31 = vpop.eup %5295 }
 0x145   :  { %v102_v32 = vmul.f32 %v5296_v31, %v86_v10  ;;  %v5628_v33 = vadd.f32 %v4367_v29, %v109_v30 }
 0x147   :  { %v110_v34 = vmul.f32 %v4366_v27, %v102_v32  ;;  %4713 = vmatprep.mubr.msk.f32.mxu0 %vm75_vm0, %v5628_v33 }
 0x149   :  { %v5632_v35 = vadd.f32 %v4367_v29, %v110_v34 }
 0x14b   :  { %4714 = vmatmul.mubr.msk.f32.vlgmr.msra.gmra.mrb[0].mxu0 %vm75_vm0, %v5632_v35 }
 0x14c   :  { %4717 = vmatpush3.msra.mxu0 %v211_v36 }
 0x21e   :  { %v4715_v38 = vpop.f32.mrb[0].mxu0 }
 0x21f   :  { %v5642_v39 = vadd.f32 %v4715_v38, %v4368_v37  ;;  %v202_v40 = vpop.f32.mrb[1].mxu0  ;;  %v421_v38 = vld [vmem:[%s6423_s26] sm:$0xf] }
 0x220   :  { %v5644_v41 = vadd.f32 %v4368_v37, %v202_v40 }
 0x222   :  { %4718 = vmatprep.mubr.msk.f32.mxu0 %vm212_vm1, %v5644_v41  ;;  %4725 = vmatprep.mubr.msk.f32.mxu1 %vm212_vm1, %v5644_v41  ;;  %v5652_v42 = vpack.i.bf16 %v5642_v39, %v5644_v41 }
 0x223   :  { %4719 = vmatmul.mubr.msk.f32.vlgmr.msra.gmra.mrb[2].mxu0 %vm212_vm1, %v5642_v39 }
 0x224   :  { %5219 = vrot.lane.b32.xlu1 %v5652_v42, %s6407_s30  ;;  %5214 = vrot.lane.b32.xlu0 %v5652_v42, %s5472_s5  ;;  %s6408_s30 = smov 24  }
 0x228   :  { %598 = vrot.lane.b32.xlu1 %v5644_v41, %s5473_s22 }
 0x22c   :  { %600 = vrot.lane.b32.xlu1 %v5642_v39, %s5473_s22 }
 0x296   :  { %v5215_v43 = vpop.permute.xlu0 %5214  ;;  %v5220_v48 = vpop.permute.xlu1 %5219 }
 0x297   :  { %v5217_v44 = vunpack.i.h.bf16 %v5215_v43  ;;  %v5216_v45 = vunpack.i.l.bf16 %v5215_v43  ;;  %v5222_v50 = vunpack.i.h.bf16 %v5220_v48  ;;  %v5221_v51 = vunpack.i.l.bf16 %v5220_v48 }
 0x299   :  { %v5020_v47 = vpack.c.bf16 %v5217_v44, %v5216_v45  ;;  %v5030_v53 = vpack.c.bf16 %v5222_v50, %v5221_v51 }
 0x29a   :  { %v599_v52 = vpop.permute.xlu1 %598 }
 0x29b   :  { %5022 = vmatprep.subr.msk.bf16.mxu1 %vm5666_vm2, %v5020_v47 }
 0x29c   :  { %5025 = vmatpush3.bf16.xpose.msk.msra.mxu1 %vm5666_vm2, %v5020_v47 }
 0x29d   :  { %4740 = vmatprep.subr.mxu1 %v4382_v49 }
 0x29e   :  { %v601_v54 = vpop.permute.xlu1 %600 }
 0x2a3   :  { %4726 = vmatmul.mubr.msk.f32.vlgmr.msra.gmra.mrb[0].mxu1 %vm212_vm1, %v5642_v39 }
 0x2a4   :  { %4741 = vmatpush3.msra.mxu1 %v4382_v49  ;;  %4742 = vmatprep.mubr.msk.f32.mxu1 %vm212_vm1, %v599_v52 }
 0x2a5   :  { %5032 = vmatprep.subr.msk.bf16.mxu1 %vm5666_vm2, %v5030_v53 }
 0x2a7   :  { %4743 = vmatmul.mubr.msk.f32.vlgmr.msra.gmra.mrb[2].mxu1 %vm212_vm1, %v601_v54 }
 0x2a8   :  { %4749 = vmatprep.mubr.msk.f32.mxu1 %vm212_vm1, %v599_v52 }
 0x2ab   :  { %5035 = vmatpush3.bf16.xpose.msk.msra.mxu1 %vm5666_vm2, %v5030_v53 }
 0x2ac   :  { %4764 = vmatprep.subr.mxu1 %v4395_v13 }
 0x2b2   :  { %4750 = vmatmul.mubr.msk.f32.vlgmr.msra.gmra.mrb[4].mxu1 %vm212_vm1, %v601_v54 }
 0x2b3   :  { %4765 = vmatpush3.msra.mxu1 %v4395_v13 }
 0x2f6   :  { %v5687_v55 = vpop.f32.mrb[2].mxu0 }
 0x2f7   :  { %v285_v56 = vpop.f32.mrb[3].mxu0  ;;  %v381_v57 = vsel %vm377_vm3, %v5687_v55, -inf }
 0x2f8   :  { %382 = vmax.xlane.f32.xlu0 %v381_v57  ;;  %v378_v58 = vsel %vm377_vm3, %v285_v56, -inf }
 0x2fc   :  { %379 = vmax.xlane.f32.xlu0 %v378_v58 }
 0x376   :  { %v4727_v61 = vpop.f32.mrb[0].mxu1 }
 0x377   :  { %v374_v62 = vadd.f32 %v4727_v61, %v5695_v59  ;;  %v368_v63 = vpop.f32.mrb[1].mxu1 }
 0x378   :  { %v369_v0 = vadd.f32 %v368_v63, %v5700_v60  ;;  %v4389_v63 = vld [vmem:[%s6423_s26 + $0x4] sm:$0xf] }
 0x379   :  { %v388_v1 = vsel %vm384_vm4, %v374_v62, -inf }
 0x37a   :  { %v5705_v2 = vpop.f32.mrb[2].mxu1  ;;  %389 = vmax.xlane.f32.xlu0 %v388_v1  ;;  %v385_v3 = vsel %vm384_vm4, %v369_v0, -inf }
 0x37b   :  { %v5708_v4 = vpop.f32.mrb[3].mxu1  ;;  %386 = vmax.xlane.f32.xlu1 %v385_v3  ;;  %v767_v5 = vsel %vm377_vm3, %v5705_v2, -inf }
 0x37c   :  { %v764_v6 = vsel %vm377_vm3, %v5708_v4, -inf }
 0x37e   :  { %768 = vmax.xlane.f32.xlu0 %v767_v5 }
 0x382   :  { %765 = vmax.xlane.f32.xlu0 %v764_v6 }
 0x385   :  { %v4751_v7 = vpop.f32.mrb[4].mxu1  ;;  %v383_v14 = vpop.xlane.xlu0 %382 }
 0x386   :  { %v5715_v8 = vadd.f32 %v4751_v7, %v5695_v59  ;;  %v755_v9 = vpop.f32.mrb[5].mxu1 }
 0x387   :  { %v756_v10 = vadd.f32 %v755_v9, %v5700_v60 }
 0x388   :  { %v773_v11 = vsel %vm384_vm4, %v5715_v8, -inf }
 0x389   :  { %774 = vmax.xlane.f32.xlu1 %v773_v11  ;;  %v770_v12 = vsel %vm384_vm4, %v756_v10, -inf  ;;  %v380_v15 = vpop.xlane.xlu0 %379 }
 0x38d   :  { %771 = vmax.xlane.f32.xlu1 %v770_v12 }
 0x398   :  { %5224 = vrot.lane.b32.xlu0 %v5652_v42, %s5474_s3 }
 0x39c   :  { %985 = vrot.lane.b32.xlu0 %v5642_v39, %s6402_s28 }
 0x39e   :  { %5229 = vrot.lane.b32.xlu1 %v5652_v42, %s6401_s0 }
 0x3a2   :  { %5234 = vrot.lane.b32.xlu1 %v5652_v42, %s6404_s4 }
 0x3a6   :  { %983 = vrot.lane.b32.xlu1 %v5644_v41, %s6402_s28  ;;  %s6427_s28 = smov 56  }
 0x407   :  { %v390_v16 = vpop.xlane.xlu0 %389 }
 0x408   :  { %v392_v17 = vmax.f32 %v383_v14, %v390_v16  ;;  %v387_v18 = vpop.xlane.xlu1 %386 }
 0x409   :  { %v391_v19 = vmax.f32 %v380_v15, %v387_v18 }
 0x40a   :  { %v400_v20 = vsub.f32 %v374_v62, %v392_v17  ;;  %v394_v28 = vsub.f32 %v5687_v55, %v392_v17 }
 0x40b   :  { %v393_v21 = vsub.f32 %v285_v56, %v391_v19  ;;  %v399_v22 = vsub.f32 %v369_v0, %v391_v19  ;;  %v769_v23 = vpop.xlane.xlu0 %768 }
 0x40c   :  { %v403_v25 = vmul.f32 1.442695, %v400_v20  ;;  %v397_v32 = vmul.f32 1.442695, %v394_v28 }
 0x40d   :  { %v401_v24 = vmul.f32 1.442695, %v399_v22  ;;  %v395_v26 = vmul.f32 1.442695, %v393_v21 }
 0x40f   :  { %v766_v27 = vpop.xlane.xlu0 %765  ;;  %5297 = vpow2.f32 %v401_v24 }
 0x410   :  { %5299 = vpow2.f32 %v403_v25 }
 0x411   :  { %5301 = vpow2.f32 %v395_v26 }
 0x412   :  { %5303 = vpow2.f32 %v397_v32 }
 0x413   :  { %v5225_v29 = vpop.permute.xlu0 %5224 }
 0x414   :  { %v5227_v30 = vunpack.i.h.bf16 %v5225_v29  ;;  %v5226_v31 = vunpack.i.l.bf16 %v5225_v29 }
 0x416   :  { %v775_v34 = vpop.xlane.xlu1 %774  ;;  %v5026_v36 = vpack.c.bf16 %v5227_v30, %v5226_v31  ;;  %v4402_v30 = vld [vmem:[%s6423_s26 + $0x8] sm:$0xf] }
 0x417   :  { %v777_v37 = vmax.f32 %v769_v23, %v775_v34  ;;  %v986_v3 = vpop.permute.xlu0 %985  ;;  %v4408_v23 = vld [vmem:[%s6419_s29 + $0x18] sm:$0xff] }
 0x418   :  { %5027 = vmatprep.subr.bf16.mxu0 %v5026_v36 }
 0x419   :  { %5029 = vmatpush3.bf16.msra.mxu0 %v5026_v36  ;;  %v5739_v43 = vpop.eup %5297  ;;  %v785_v44 = vsub.f32 %v5715_v8, %v777_v37  ;;  %v779_v61 = vsub.f32 %v5705_v2, %v777_v37 }
 0x41a   :  { %v772_v40 = vpop.xlane.xlu1 %771  ;;  %4735 = vmatprep.subr.msk.mxu0 %vm515_vm5, %v421_v38  ;;  %v5742_v47 = vpop.eup %5299  ;;  %4732 = vmatprep.mubr.msk.f32.mxu0 %vm384_vm4, %v5739_v43 }
 0x41b   :  { %v776_v45 = vmax.f32 %v766_v27, %v772_v40  ;;  %v5746_v48 = vpop.eup %5301  ;;  %v788_v52 = vmul.f32 1.442695, %v785_v44  ;;  %v782_v1 = vmul.f32 1.442695, %v779_v61 }
 0x41c   :  { %4733 = vmatmul.mubr.msk.f32.vlgmr.msra.gmra.mrb[4].mxu0 %vm384_vm4, %v5742_v47  ;;  %v5755_v62 = vpop.eup %5303 }
 0x41d   :  { %v778_v49 = vsub.f32 %v5708_v4, %v776_v45  ;;  %v784_v50 = vsub.f32 %v756_v10, %v776_v45  ;;  %4737 = vmatprep.mubr.msk.f32.mxu0 %vm377_vm3, %v5746_v48  ;;  %4736 = vmatpush3.msk.msra.mxu0 %vm515_vm5, %v421_v38 }
 0x41e   :  { %v5230_v51 = vpop.permute.xlu1 %5229 }
 0x41f   :  { %v786_v53 = vmul.f32 1.442695, %v784_v50  ;;  %v5232_v54 = vunpack.i.h.bf16 %v5230_v51  ;;  %v5231_v55 = vunpack.i.l.bf16 %v5230_v51  ;;  %v780_v56 = vmul.f32 1.442695, %v778_v49 }
 0x421   :  { %v5036_v57 = vpack.c.bf16 %v5232_v54, %v5231_v55  ;;  %5305 = vpow2.f32 %v786_v53 }
 0x422   :  { %v5235_v58 = vpop.permute.xlu1 %5234  ;;  %5307 = vpow2.f32 %v788_v52 }
 0x423   :  { %5037 = vmatprep.subr.bf16.mxu0 %v5036_v57  ;;  %5309 = vpow2.f32 %v780_v56  ;;  %v5237_v2 = vunpack.i.h.bf16 %v5235_v58  ;;  %v5236_v4 = vunpack.i.l.bf16 %v5235_v58 }
 0x424   :  { %4738 = vmatmul.mubr.msk.f32.vlgmr.msra.gmra.mrb[4].mxu0 %vm377_vm3, %v5755_v62  ;;  %5311 = vpow2.f32 %v782_v1 }
 0x425   :  { %5039 = vmatpush3.bf16.msra.mxu0 %v5036_v57  ;;  %v5040_v8 = vpack.c.bf16 %v5237_v2, %v5236_v4 }
 0x426   :  { %v984_v0 = vpop.permute.xlu1 %983  ;;  %4759 = vmatprep.subr.msk.mxu0 %vm515_vm5, %v4389_v63 }
 0x427   :  { %4766 = vmatprep.mubr.msk.f32.mxu1 %vm212_vm1, %v984_v0 }
 0x428   :  { %4767 = vmatmul.mubr.msk.f32.vlgmr.msra.gmra.mrb[6].mxu1 %vm212_vm1, %v986_v3 }
 0x42b   :  { %v5765_v5 = vpop.eup %5305 }
 0x42c   :  { %v5767_v6 = vpop.eup %5307  ;;  %4756 = vmatprep.mubr.msk.f32.mxu0 %vm384_vm4, %v5765_v5 }
 0x42d   :  { %v5771_v7 = vpop.eup %5309  ;;  %4757 = vmatmul.mubr.msk.f32.vlgmr.msra.gmra.mrb[6].mxu0 %vm384_vm4, %v5767_v6 }
 0x42e   :  { %4760 = vmatpush3.msk.msra.mxu0 %vm515_vm5, %v4389_v63  ;;  %4761 = vmatprep.mubr.msk.f32.mxu0 %vm377_vm3, %v5771_v7  ;;  %v5780_v9 = vpop.eup %5311 }
 0x42f   :  { %5042 = vmatprep.subr.msk.bf16.mxu0 %vm5666_vm2, %v5040_v8 }
 0x435   :  { %4762 = vmatmul.mubr.msk.f32.vlgmr.msra.gmra.mrb[6].mxu0 %vm377_vm3, %v5780_v9 }
 0x436   :  { %5045 = vmatpush3.bf16.xpose.msk.msra.mxu0 %vm5666_vm2, %v5040_v8  ;;  %4773 = vmatprep.mubr.msk.f32.mxu0 %vm212_vm1, %v984_v0 }
 0x437   :  { %4788 = vmatprep.subr.mxu0 %v4408_v23 }
 0x43d   :  { %4774 = vmatmul.mubr.msk.f32.vlgmr.msra.gmra.mrb[8].mxu0 %vm212_vm1, %v986_v3 }
 0x43e   :  { %4789 = vmatpush3.msra.mxu0 %v4408_v23 }
 0x4f7   :  { %v5788_v10 = vpop.f32.mrb[4].mxu0 }
 0x4f8   :  { %v5790_v11 = vpop.f32.mrb[5].mxu0 }
 0x4fb   :  { %v4768_v12 = vpop.f32.mrb[6].mxu1 }
 0x4fc   :  { %v1057_v13 = vpop.f32.mrb[7].mxu1  ;;  %v1152_v14 = vsel %vm377_vm3, %v4768_v12, -inf }
 0x4fd   :  { %1153 = vmax.xlane.f32.xlu0 %v1152_v14  ;;  %v1149_v15 = vsel %vm377_vm3, %v1057_v13, -inf }
 0x4fe   :  { %1150 = vmax.xlane.f32.xlu1 %v1149_v15 }
 0x508   :  { %v5794_v16 = vpop.f32.mrb[6].mxu0 }
 0x509   :  { %v5796_v17 = vpop.f32.mrb[7].mxu0 }
 0x50f   :  { %5239 = vrot.lane.b32.xlu1 %v5652_v42, %s6397_s1 }
 0x510   :  { %v4775_v18 = vpop.f32.mrb[8].mxu0 }
 0x511   :  { %v1140_v19 = vpop.f32.mrb[9].mxu0  ;;  %v1146_v21 = vadd.f32 %v4775_v18, %v5695_v59 }
 0x512   :  { %v1141_v20 = vadd.f32 %v1140_v19, %v5700_v60 }
 0x513   :  { %1368 = vrot.lane.b32.xlu1 %v5644_v41, %s6398_s24  ;;  %v1158_v24 = vsel %vm384_vm4, %v1146_v21, -inf }
 0x514   :  { %v1155_v22 = vsel %vm384_vm4, %v1141_v20, -inf }
 0x515   :  { %1156 = vmax.xlane.f32.xlu0 %v1155_v22  ;;  %v799_v22 = vsel %vm384_vm4, %v5767_v6, 0.0 }
 0x517   :  { %1370 = vrot.lane.b32.xlu1 %v5642_v39, %s6398_s24  ;;  %s6425_s24 = smov 80  }
 0x519   :  { %1159 = vmax.xlane.f32.xlu0 %v1158_v24 }
 0x52f   :  { %5244 = vrot.lane.b32.xlu0 %v5652_v42, %s6400_s23 }
 0x58a   :  { %v1154_v31 = vpop.xlane.xlu0 %1153 }
 0x58b   :  { %v1151_v41 = vpop.xlane.xlu1 %1150 }
 0x58f   :  { %v5240_v25 = vpop.permute.xlu1 %5239 }
 0x590   :  { %v5242_v26 = vunpack.i.h.bf16 %v5240_v25  ;;  %v5241_v27 = vunpack.i.l.bf16 %v5240_v25 }
 0x592   :  { %v5046_v28 = vpack.c.bf16 %v5242_v26, %v5241_v27 }
 0x593   :  { %v1369_v29 = vpop.permute.xlu1 %1368 }
 0x594   :  { %5047 = vmatprep.subr.bf16.mxu1 %v5046_v28  ;;  %4790 = vmatprep.mubr.msk.f32.mxu0 %vm212_vm1, %v1369_v29 }
 0x595   :  { %5049 = vmatpush3.bf16.msra.mxu1 %v5046_v28 }
 0x596   :  { %4783 = vmatprep.subr.msk.mxu1 %vm515_vm5, %v4402_v30 }
 0x597   :  { %v1371_v39 = vpop.permute.xlu1 %1370 }
 0x598   :  { %4791 = vmatmul.mubr.msk.f32.vlgmr.msra.gmra.mrb[10].mxu0 %vm212_vm1, %v1371_v39 }
 0x5a2   :  { %v1157_v32 = vpop.xlane.xlu0 %1156 }
 0x5a3   :  { %v1161_v34 = vmax.f32 %v1151_v41, %v1157_v32 }
 0x5a5   :  { %v1169_v36 = vsub.f32 %v1141_v20, %v1161_v34  ;;  %v1163_v38 = vsub.f32 %v1057_v13, %v1161_v34 }
 0x5a6   :  { %v1160_v37 = vpop.xlane.xlu0 %1159 }
 0x5a7   :  { %v1171_v40 = vmul.f32 1.442695, %v1169_v36  ;;  %v1162_v44 = vmax.f32 %v1154_v31, %v1160_v37  ;;  %v1165_v49 = vmul.f32 1.442695, %v1163_v38 }
 0x5a9   :  { %v1170_v45 = vsub.f32 %v1146_v21, %v1162_v44  ;;  %5313 = vpow2.f32 %v1171_v40  ;;  %v1164_v51 = vsub.f32 %v4768_v12, %v1162_v44  ;;  %v790_v21 = vsel %vm377_vm3, %v5771_v7, 0.0 }
 0x5aa   :  { %v5245_v53 = vpop.permute.xlu0 %5244 }
 0x5ab   :  { %v1173_v50 = vmul.f32 1.442695, %v1170_v45  ;;  %v1167_v52 = vmul.f32 1.442695, %v1164_v51  ;;  %v5247_v55 = vunpack.i.h.bf16 %v5245_v53  ;;  %v5246_v56 = vunpack.i.l.bf16 %v5245_v53 }
 0x5ad   :  { %5315 = vpow2.f32 %v1173_v50  ;;  %v5050_v61 = vpack.c.bf16 %v5247_v55, %v5246_v56 }
 0x5ae   :  { %5317 = vpow2.f32 %v1165_v49 }
 0x5af   :  { %5319 = vpow2.f32 %v1167_v52 }
 0x5b3   :  { %v5314_v54 = vpop.eup %5313 }
 0x5b4   :  { %4780 = vmatprep.mubr.msk.f32.mxu1 %vm384_vm4, %v5314_v54  ;;  %v1181_v23 = vsel %vm384_vm4, %v5314_v54, 0.0 }
 0x5b7   :  { %v5316_v57 = vpop.eup %5315 }
 0x5b8   :  { %v5318_v58 = vpop.eup %5317  ;;  %4781 = vmatmul.mubr.msk.f32.vlgmr.msra.gmra.mrb[8].mxu1 %vm384_vm4, %v5316_v57  ;;  %v1184_v7 = vsel %vm384_vm4, %v5316_v57, 0.0 }
 0x5b9   :  { %4784 = vmatpush3.msk.msra.mxu1 %vm515_vm5, %v4402_v30  ;;  %4785 = vmatprep.mubr.msk.f32.mxu1 %vm377_vm3, %v5318_v58  ;;  %v5320_v63 = vpop.eup %5319  ;;  %v1175_v19 = vsel %vm377_vm3, %v5318_v58, 0.0 }
 0x5ba   :  { %5052 = vmatprep.subr.msk.bf16.mxu1 %vm5666_vm2, %v5050_v61 }
 0x5c0   :  { %4786 = vmatmul.mubr.msk.f32.vlgmr.msra.gmra.mrb[8].mxu1 %vm377_vm3, %v5320_v63 }
 0x5c1   :  { %5055 = vmatpush3.bf16.xpose.msk.msra.mxu1 %vm5666_vm2, %v5050_v61  ;;  %4797 = vmatprep.mubr.msk.f32.mxu1 %vm212_vm1, %v1369_v29 }
 0x5c8   :  { %4798 = vmatmul.mubr.msk.f32.vlgmr.msra.gmra.mrb[10].mxu1 %vm212_vm1, %v1371_v39 }
 0x66b   :  { %v4792_v0 = vpop.f32.mrb[10].mxu0 }
 0x66c   :  { %v1442_v1 = vpop.f32.mrb[11].mxu0  ;;  %v1537_v3 = vsel %vm377_vm3, %v4792_v0, -inf }
 0x66d   :  { %1538 = vmax.xlane.f32.xlu0 %v1537_v3  ;;  %v1534_v2 = vsel %vm377_vm3, %v1442_v1, -inf }
 0x66e   :  { %1535 = vmax.xlane.f32.xlu1 %v1534_v2 }
 0x67f   :  { %5249 = vrot.lane.b32.xlu1 %v5652_v42, %s6396_s2  ;;  %v408_v42 = vsel %vm377_vm3, %v5755_v62, 0.0  ;;  %v1178_v62 = vsel %vm377_vm3, %v5320_v63, 0.0  ;;  %s5482_s2 = smov 8  }
 0x693   :  { %v5834_v4 = vpop.f32.mrb[8].mxu1 }
 0x694   :  { %v5836_v8 = vpop.f32.mrb[9].mxu1 }
 0x69b   :  { %v4799_v12 = vpop.f32.mrb[10].mxu1 }
 0x69c   :  { %v1525_v13 = vpop.f32.mrb[11].mxu1  ;;  %v1531_v15 = vadd.f32 %v4799_v12, %v5695_v59  ;;  %v796_v59 = vsel %vm384_vm4, %v5765_v5, 0.0 }
 0x69d   :  { %v1526_v14 = vadd.f32 %v1525_v13, %v5700_v60  ;;  %v793_v60 = vsel %vm377_vm3, %v5780_v9, 0.0  ;;  %v4415_v9 = vld [vmem:[%s6423_s26 + $0xc] sm:$0xf] }
 0x69e   :  { %v1543_v20 = vsel %vm384_vm4, %v1531_v15, -inf }
 0x69f   :  { %v1540_v18 = vsel %vm384_vm4, %v1526_v14, -inf }
 0x6a0   :  { %1541 = vmax.xlane.f32.xlu0 %v1540_v18 }
 0x6a3   :  { %1176 = vadd.xlane.f32.xlu1 %v1175_v19  ;;  %v411_v19 = vsel %vm384_vm4, %v5739_v43, 0.0  ;;  %v1782_v43 = vld [vmem:[%s6378_s8] sm:$0xff] }
 0x6a4   :  { %1544 = vmax.xlane.f32.xlu0 %v1543_v20 }
 0x6a7   :  { %409 = vadd.xlane.f32.xlu1 %v408_v42  ;;  %v414_v42 = vsel %vm384_vm4, %v5742_v47, 0.0  ;;  %v1783_v47 = vld [vmem:[%s6378_s8 + $0x8] sm:$0xff] }
 0x6a8   :  { %791 = vadd.xlane.f32.xlu0 %v790_v21 }
 0x6ac   :  { %797 = vadd.xlane.f32.xlu0 %v796_v59 }
 0x6b0   :  { %794 = vadd.xlane.f32.xlu0 %v793_v60  ;;  %v5060_v60 = vpack.c.bf16 %v1783_v47, %v1782_v43  ;;  %v1923_v43 = vld [vmem:[%s6382_s12 + $0x18] sm:$0xff] }
 0x6b2   :  { %5061 = vmatprep.subr.bf16.mxu1 %v5060_v60 }
 0x6b3   :  { %5063 = vmatpush3.bf16.msra.mxu1 %v5060_v60 }
 0x6b4   :  { %800 = vadd.xlane.f32.xlu0 %v799_v22  ;;  %v1785_v22 = vld [vmem:[%s6378_s8 + $0x18] sm:$0xff] }
 0x6b8   :  { %1182 = vadd.xlane.f32.xlu0 %v1181_v23 }
 0x6bc   :  { %1179 = vadd.xlane.f32.xlu0 %v1178_v62 }
 0x6c0   :  { %1185 = vadd.xlane.f32.xlu0 %v1184_v7 }
 0x6fa   :  { %v1539_v6 = vpop.xlane.xlu0 %1538 }
 0x6fb   :  { %v1536_v24 = vpop.xlane.xlu1 %1535 }
 0x6ff   :  { %v5250_v5 = vpop.permute.xlu1 %5249 }
 0x700   :  { %v5252_v41 = vunpack.i.h.bf16 %v5250_v5  ;;  %v5251_v25 = vunpack.i.l.bf16 %v5250_v5 }
 0x702   :  { %v5056_v26 = vpack.c.bf16 %v5252_v41, %v5251_v25 }
 0x704   :  { %5057 = vmatprep.subr.bf16.mxu0 %v5056_v26 }
 0x705   :  { %5059 = vmatpush3.bf16.msra.mxu0 %v5056_v26 }
 0x706   :  { %4807 = vmatprep.subr.msk.mxu0 %vm515_vm5, %v4415_v9 }
 0x72d   :  { %v1542_v27 = vpop.xlane.xlu0 %1541 }
 0x72e   :  { %v1546_v28 = vmax.f32 %v1536_v24, %v1542_v27 }
 0x730   :  { %v1554_v29 = vsub.f32 %v1526_v14, %v1546_v28  ;;  %v1548_v39 = vsub.f32 %v1442_v1, %v1546_v28  ;;  %v1177_v57 = vpop.xlane.xlu1 %1176 }
 0x731   :  { %v1545_v30 = vpop.xlane.xlu0 %1544 }
 0x732   :  { %v1556_v31 = vmul.f32 1.442695, %v1554_v29  ;;  %v1547_v32 = vmax.f32 %v1539_v6, %v1545_v30  ;;  %v1550_v38 = vmul.f32 1.442695, %v1548_v39 }
 0x734   :  { %v1549_v34 = vsub.f32 %v4792_v0, %v1547_v32  ;;  %v1555_v36 = vsub.f32 %v1531_v15, %v1547_v32  ;;  %5321 = vpow2.f32 %v1556_v31  ;;  %v410_v31 = vpop.xlane.xlu1 %409 }
 0x735   :  { %v792_v37 = vpop.xlane.xlu0 %791 }
 0x736   :  { %v1552_v40 = vmul.f32 1.442695, %v1549_v34  ;;  %v1558_v44 = vmul.f32 1.442695, %v1555_v36 }
 0x738   :  { %5323 = vpow2.f32 %v1552_v40 }
 0x739   :  { %5325 = vpow2.f32 %v1558_v44  ;;  %v798_v45 = vpop.xlane.xlu0 %797 }
 0x73a   :  { %5327 = vpow2.f32 %v1550_v38  ;;  %v802_v49 = vadd.f32 %v798_v45, %v792_v37 }
 0x73c   :  { %5329 = vrcp.f32 %v802_v49 }
 0x73d   :  { %v795_v50 = vpop.xlane.xlu0 %794 }
 0x73e   :  { %v5322_v51 = vpop.eup %5321 }
 0x73f   :  { %4804 = vmatprep.mubr.msk.f32.mxu0 %vm384_vm4, %v5322_v51  ;;  %v1566_v2 = vsel %vm384_vm4, %v5322_v51, 0.0 }
 0x741   :  { %v801_v52 = vpop.xlane.xlu0 %800 }
 0x742   :  { %v5324_v53 = vpop.eup %5323 }
 0x743   :  { %v5326_v54 = vpop.eup %5325  ;;  %v1563_v55 = vsel %vm377_vm3, %v5324_v53, 0.0 }
 0x744   :  { %v5328_v56 = vpop.eup %5327  ;;  %4805 = vmatmul.mubr.msk.f32.vlgmr.msra.gmra.mrb[12].mxu0 %vm384_vm4, %v5326_v54  ;;  %1564 = vadd.xlane.f32.xlu0 %v1563_v55  ;;  %v1569_v14 = vsel %vm384_vm4, %v5326_v54, 0.0 }
 0x745   :  { %4808 = vmatpush3.msk.msra.mxu0 %vm515_vm5, %v4415_v9  ;;  %4809 = vmatprep.mubr.msk.f32.mxu0 %vm377_vm3, %v5328_v56  ;;  %v1183_v58 = vpop.xlane.xlu0 %1182  ;;  %v1560_v0 = vsel %vm377_vm3, %v5328_v56, 0.0 }
 0x746   :  { %v5330_v61 = vpop.eup %5329  ;;  %v1187_v63 = vadd.f32 %v1183_v58, %v1177_v57 }
 0x747   :  { %v979_v1 = vmul.f32 %v5330_v61, %v5796_v17  ;;  %v405_v17 = vsel %vm377_vm3, %v5746_v48, 0.0  ;;  %v803_v48 = vadd.f32 %v801_v52, %v795_v50 }
 0x748   :  { %5331 = vrcp.f32 %v1187_v63  ;;  %1561 = vadd.xlane.f32.xlu0 %v1560_v0 }
 0x749   :  { %1753 = vrot.lane.b32.xlu1 %v979_v1, %s5482_s2  ;;  %v1180_v3 = vpop.xlane.xlu0 %1179 }
 0x74c   :  { %4810 = vmatmul.mubr.msk.f32.vlgmr.msra.gmra.mrb[12].mxu0 %vm377_vm3, %v5324_v53  ;;  %1567 = vadd.xlane.f32.xlu0 %v1566_v2 }
 0x74d   :  { %v1186_v12 = vpop.xlane.xlu0 %1185 }
 0x74e   :  { %v1188_v13 = vadd.f32 %v1186_v12, %v1180_v3 }
 0x750   :  { %5333 = vrcp.f32 %v1188_v13  ;;  %1570 = vadd.xlane.f32.xlu0 %v1569_v14 }
 0x751   :  { %5335 = vrcp.f32 %v803_v48  ;;  %v1921_v48 = vld [vmem:[%s6382_s12 + $0x8] sm:$0xff] }
 0x752   :  { %v5332_v15 = vpop.eup %5331 }
 0x753   :  { %v1364_v18 = vmul.f32 %v5332_v15, %v5836_v8 }
 0x754   :  { %406 = vadd.xlane.f32.xlu0 %v405_v17 }
 0x755   :  { %1761 = vrot.lane.b32.xlu1 %v1364_v18, %s6405_s27 }
 0x758   :  { %412 = vadd.xlane.f32.xlu0 %v411_v19 }
 0x75a   :  { %v5334_v20 = vpop.eup %5333 }
 0x75b   :  { %v1365_v21 = vmul.f32 %v5334_v20, %v5834_v4  ;;  %v5336_v8 = vpop.eup %5335  ;;  %v1784_v4 = vld [vmem:[%s6378_s8 + $0x10] sm:$0xff] }
 0x75c   :  { %415 = vadd.xlane.f32.xlu0 %v414_v42  ;;  %v980_v59 = vmul.f32 %v5336_v8, %v5794_v16  ;;  %v5064_v16 = vpack.c.bf16 %v1785_v22, %v1784_v4 }
 0x75d   :  { %1763 = vrot.lane.b32.xlu1 %v1365_v21, %s6405_s27 }
 0x75e   :  { %5065 = vmatprep.subr.bf16.mxu1 %v5064_v16 }
 0x75f   :  { %5067 = vmatpush3.bf16.msra.mxu1 %v5064_v16 }
 0x772   :  { %1755 = vrot.lane.b32.xlu0 %v980_v59, %s5482_s2  ;;  %v1922_v59 = vld [vmem:[%s6382_s12 + $0x10] sm:$0xff] }
 0x773   :  { %v5072_v47 = vpack.c.bf16 %v1923_v43, %v1922_v59 }
 0x7bb   :  { %v1754_v36 = vpop.permute.xlu1 %1753 }
 0x7c7   :  { %v1762_v40 = vpop.permute.xlu1 %1761 }
 0x7cf   :  { %v1764_v49 = vpop.permute.xlu1 %1763 }
 0x7d1   :  { %v1565_v23 = vpop.xlane.xlu0 %1564 }
 0x7d5   :  { %v1562_v62 = vpop.xlane.xlu0 %1561 }
 0x7d9   :  { %v1568_v7 = vpop.xlane.xlu0 %1567 }
 0x7da   :  { %v1572_v41 = vadd.f32 %v1568_v7, %v1562_v62 }
 0x7dd   :  { %v1571_v24 = vpop.xlane.xlu0 %1570 }
 0x7de   :  { %v1573_v5 = vadd.f32 %v1571_v24, %v1565_v23  ;;  %v4424_v24 = vld [vmem:[%s6380_s10] ss:$0 sm:$0xff] }
 0x7e0   :  { %5337 = vrcp.f32 %v1573_v5 }
 0x7e1   :  { %5339 = vrcp.f32 %v1572_v41  ;;  %v407_v29 = vpop.xlane.xlu0 %406  ;;  %v4425_v41 = vld [vmem:[%s6381_s11] ss:$0 sm:$0xff] }
 0x7e5   :  { %v413_v30 = vpop.xlane.xlu0 %412 }
 0x7e6   :  { %v417_v32 = vadd.f32 %v413_v30, %v407_v29  ;;  %v2030_v29 = vld [vmem:[%s6384_s14] sm:$0xff]  ;;  %v2031_v30 = vld [vmem:[%s6384_s14 + $0x8] sm:$0xff] }
 0x7e8   :  { %5341 = vrcp.f32 %v417_v32  ;;  %v2033_v32 = vld [vmem:[%s6384_s14 + $0x18] sm:$0xff] }
 0x7e9   :  { %v416_v39 = vpop.xlane.xlu0 %415 }
 0x7ea   :  { %v5338_v25 = vpop.eup %5337  ;;  %v418_v34 = vadd.f32 %v416_v39, %v410_v31  ;;  %v5076_v39 = vpack.c.bf16 %v2031_v30, %v2030_v29  ;;  %v2032_v31 = vld [vmem:[%s6384_s14 + $0x10] sm:$0xff] }
 0x7eb   :  { %v5340_v9 = vpop.eup %5339 }
 0x7ec   :  { %5343 = vrcp.f32 %v418_v34  ;;  %5077 = vmatprep.subr.bf16.mxu1 %v5076_v39  ;;  %v5080_v34 = vpack.c.bf16 %v2033_v32, %v2032_v31  ;;  %v4432_v32 = vld [vmem:[%s6386_s16] ss:$0 sm:$0xff] }
 0x7ed   :  { %v1756_v50 = vpop.permute.xlu0 %1755 }
 0x7f2   :  { %v5342_v37 = vpop.eup %5341 }
 0x7f3   :  { %v594_v44 = vmul.f32 %v5342_v37, %v5790_v11  ;;  %v2035_v37 = vld [vmem:[%s6384_s14 + $0x28] sm:$0xff] }
 0x7f5   :  { %v1775_v51 = vsel %vm212_vm1, %v594_v44, %v1754_v36  ;;  %v2034_v36 = vld [vmem:[%s6384_s14 + $0x20] sm:$0xff]  ;;  %v2037_v44 = vld [vmem:[%s6384_s14 + $0x38] sm:$0xff] }
 0x7f6   :  { %v5344_v38 = vpop.eup %5343  ;;  %v1777_v54 = vsel %vm384_vm4, %v1775_v51, %v1762_v40  ;;  %v2036_v40 = vld [vmem:[%s6384_s14 + $0x30] sm:$0xff] }
 0x7f7   :  { %v595_v45 = vmul.f32 %v5344_v38, %v5788_v10  ;;  %v4421_v10 = vld [vmem:[%s6379_s9] ss:$0 sm:$0xff]  ;;  %v5084_v38 = vpack.c.bf16 %v2035_v37, %v2034_v36 }
 0x7f9   :  { %v1776_v52 = vsel %vm212_vm1, %v595_v45, %v1756_v50  ;;  %v5088_v45 = vpack.c.bf16 %v2037_v44, %v2036_v40 }
 0x7fa   :  { %v1778_v56 = vsel %vm384_vm4, %v1776_v52, %v1764_v49  ;;  %v4426_v49 = vld [vmem:[%s6383_s13] ss:$0 sm:$0xff] }
 0x81f   :  { %v4811_v26 = vpop.f32.mrb[12].mxu0 }
 0x820   :  { %v1750_v6 = vmul.f32 %v5338_v25, %v4811_v26  ;;  %v1740_v27 = vpop.f32.mrb[13].mxu0 }
 0x821   :  { %v1749_v28 = vmul.f32 %v5340_v9, %v1740_v27 }
 0x822   :  { %1771 = vrot.lane.b32.xlu1 %v1750_v6, %s6408_s30 }
 0x823   :  { %1769 = vrot.lane.b32.xlu0 %v1749_v28, %s6408_s30  ;;  %s6426_s30 = smov 112  }
 0x894   :  { %v1772_v53 = vpop.permute.xlu1 %1771 }
 0x895   :  { %v1770_v55 = vpop.permute.xlu0 %1769  ;;  %v1781_v58 = vsel %vm1779_vm6, %v1778_v56, %v1772_v53 }
 0x896   :  { %v1780_v57 = vsel %vm1779_vm6, %v1777_v54, %v1770_v55 }
 0x897   :  { %4820 = vmatprep.mubr.msk.f32.mxu1 %vm75_vm0, %v1780_v57 }
 0x898   :  { %4821 = vmatmul.mubr.msk.f32.vlgmr.msra.gmra.mrb[12].mxu1 %vm75_vm0, %v1781_v58 }
 0x899   :  { %5079 = vmatpush3.bf16.msra.mxu1 %v5076_v39 }
 0x89a   :  { %5081 = vmatprep.subr.bf16.mxu1 %v5080_v34 }
 0x89d   :  { %5083 = vmatpush3.bf16.msra.mxu1 %v5080_v34 }
 0x89e   :  { %5085 = vmatprep.subr.bf16.mxu1 %v5084_v38 }
 0x8a1   :  { %5087 = vmatpush3.bf16.msra.mxu1 %v5084_v38  ;;  %v4433_v38 = vld [vmem:[%s6387_s17] ss:$0 sm:$0xff] }
 0x8a2   :  { %5089 = vmatprep.subr.bf16.mxu1 %v5088_v45 }
 0x8a5   :  { %5091 = vmatpush3.bf16.msra.mxu1 %v5088_v45 }
 0x96b   :  { %v4822_v11 = vpop.f32.mrb[12].mxu1 }
 0x96c   :  { %v1871_v61 = vadd.f32 %v4822_v11, %v4421_v10  ;;  %v1865_v63 = vpop.f32.mrb[13].mxu1 }
 0x96d   :  { %v1866_v0 = vadd.f32 %v4421_v10, %v1865_v63 }
 0x96e   :  { %v1875_v1 = vadd.f32 %v1871_v61, %v5632_v35 }
 0x96f   :  { %v1874_v3 = vadd.f32 %v1866_v0, %v5628_v33  ;;  %v1920_v33 = vld [vmem:[%s6382_s12] sm:$0xff] }
 0x970   :  { %v1881_v2 = vsel %vm75_vm0, %v1875_v1, 0.0  ;;  %v5068_v8 = vpack.c.bf16 %v1921_v48, %v1920_v33 }
 0x971   :  { %1882 = vadd.xlane.f32.xlu1 %v1881_v2  ;;  %v1878_v12 = vsel %vm75_vm0, %v1874_v3, 0.0 }
 0x972   :  { %1879 = vadd.xlane.f32.xlu0 %v1878_v12  ;;  %5069 = vmatprep.subr.bf16.mxu0 %v5068_v8 }
 0x973   :  { %5071 = vmatpush3.bf16.msra.mxu0 %v5068_v8 }
 0x974   :  { %5073 = vmatprep.subr.bf16.mxu0 %v5072_v47 }
 0x977   :  { %5075 = vmatpush3.bf16.msra.mxu0 %v5072_v47 }
 0x9fe   :  { %v1883_v13 = vpop.xlane.xlu1 %1882 }
 0x9ff   :  { %v1885_v14 = vmul.f32 0.03125, %v1883_v13  ;;  %v1880_v15 = vpop.xlane.xlu0 %1879 }
 0xa00   :  { %v1884_v17 = vmul.f32 0.03125, %v1880_v15 }
 0xa01   :  { %v1887_v18 = vsub.f32 %v1875_v1, %v1885_v14 }
 0xa02   :  { %v1886_v19 = vsub.f32 %v1874_v3, %v1884_v17 }
 0xa03   :  { %v1889_v21 = vmul.f32 %v1887_v18, %v1887_v18 }
 0xa04   :  { %v1888_v20 = vmul.f32 %v1886_v19, %v1886_v19 }
 0xa05   :  { %v1893_v35 = vsel %vm75_vm0, %v1889_v21, 0.0 }
 0xa06   :  { %v1890_v42 = vsel %vm75_vm0, %v1888_v20, 0.0 }
 0xa07   :  { %1891 = vadd.xlane.f32.xlu0 %v1890_v42 }
 0xa0b   :  { %1894 = vadd.xlane.f32.xlu0 %v1893_v35 }
 0xa94   :  { %v1892_v4 = vpop.xlane.xlu0 %1891 }
 0xa95   :  { %v1896_v60 = vmul.f32 0.03125, %v1892_v4 }
 0xa97   :  { %v1898_v22 = vadd.f32 1e-12, %v1896_v60 }
 0xa98   :  { %v1895_v16 = vpop.xlane.xlu0 %1894 }
 0xa99   :  { %5345 = vrsqrt.f32 %v1898_v22  ;;  %v1897_v23 = vmul.f32 0.03125, %v1895_v16 }
 0xa9b   :  { %v1899_v62 = vadd.f32 1e-12, %v1897_v23 }
 0xa9d   :  { %5347 = vrsqrt.f32 %v1899_v62 }
 0xaa3   :  { %v5346_v7 = vpop.eup %5345 }
 0xaa4   :  { %v1902_v5 = vmul.f32 %v5346_v7, %v1886_v19 }
 0xaa6   :  { %v1910_v25 = vmul.f32 %v4424_v24, %v1902_v5  ;;  %v4435_v5 = vld [vmem:[%s6376_s6 + $0x28] sm:$0xff] }
 0xaa7   :  { %v5348_v26 = vpop.eup %5347 }
 0xaa8   :  { %v1903_v9 = vmul.f32 %v5348_v26, %v1887_v18  ;;  %v1918_v6 = vadd.f32 %v4425_v41, %v1910_v25  ;;  %v4429_v18 = vld [vmem:[%s6385_s15] ss:$0 sm:$0xff]  ;;  %v4436_v25 = vld [vmem:[%s6376_s6 + $0x30] sm:$0xff]  ;;  %v4437_v26 = vld [vmem:[%s6376_s6 + $0x38] sm:$0xff] }
 0xaaa   :  { %v1911_v27 = vmul.f32 %v4424_v24, %v1903_v9  ;;  %4831 = vmatprep.mubr.msk.f32.mxu0 %vm75_vm0, %v1918_v6  ;;  %v4434_v24 = vld [vmem:[%s6376_s6 + $0x20] sm:$0xff]  ;;  %v5096_v9 = vpack.c.bf16 %v4437_v26, %v4436_v25  ;;  %s6431_s6 = smov 40  }
 0xaac   :  { %v1919_v28 = vadd.f32 %v4425_v41, %v1911_v27  ;;  %v5092_v41 = vpack.c.bf16 %v4435_v5, %v4434_v24 }
 0xaae   :  { %4832 = vmatmul.mubr.msk.f32.vlgmr.msra.gmra.mrb[14].mxu0 %vm75_vm0, %v1919_v28  ;;  %5093 = vmatprep.subr.bf16.mxu0 %v5092_v41 }
 0xaaf   :  { %5095 = vmatpush3.bf16.msra.mxu0 %v5092_v41 }
 0xab0   :  { %5097 = vmatprep.subr.bf16.mxu0 %v5096_v9 }
 0xab3   :  { %5099 = vmatpush3.bf16.msra.mxu0 %v5096_v9 }
 0xb81   :  { %v4833_v50 = vpop.f32.mrb[14].mxu0 }
 0xb82   :  { %v2009_v51 = vadd.f32 %v4833_v50, %v4426_v49  ;;  %v2003_v52 = vpop.f32.mrb[15].mxu0  ;;  %v4442_v50 = vld [vmem:[%s6419_s29 + $0x20] sm:$0xff] }
 0xb83   :  { %v2004_v53 = vadd.f32 %v4426_v49, %v2003_v52  ;;  %4864 = vmatprep.subr.mxu0 %v4442_v50 }
 0xb84   :  { %v2013_v54 = vmul.f32 %v2009_v51, %v2009_v51 }
 0xb85   :  { %v2012_v55 = vmul.f32 %v2004_v53, %v2004_v53 }
 0xb86   :  { %v2015_v56 = vmul.f32 %v2013_v54, %v2009_v51 }
 0xb87   :  { %v2014_v57 = vmul.f32 %v2012_v55, %v2004_v53 }
 0xb88   :  { %v2017_v58 = vmul.f32 0.044715, %v2015_v56 }
 0xb89   :  { %v2016_v10 = vmul.f32 0.044715, %v2014_v57 }
 0xb8a   :  { %v2019_v11 = vadd.f32 %v2017_v58, %v2009_v51 }
 0xb8b   :  { %v2018_v61 = vadd.f32 %v2016_v10, %v2004_v53 }
 0xb8c   :  { %v2021_v63 = vmul.f32 0.7978846, %v2019_v11 }
 0xb8d   :  { %v2020_v0 = vmul.f32 0.7978846, %v2018_v61 }
 0xb8e   :  { %5349 = vtanh.f32 %v2021_v63  ;;  %v4455_v63 = vld [vmem:[%s6419_s29 + $0x28] sm:$0xff] }
 0xb8f   :  { %5351 = vtanh.f32 %v2020_v0 }
 0xb98   :  { %v5350_v1 = vpop.eup %5349 }
 0xb99   :  { %v5352_v3 = vpop.eup %5351  ;;  %v2025_v2 = vadd.f32 1.0, %v5350_v1 }
 0xb9a   :  { %v2024_v12 = vadd.f32 1.0, %v5352_v3 }
 0xb9b   :  { %v2027_v13 = vmul.f32 0.5, %v2025_v2 }
 0xb9c   :  { %v2026_v14 = vmul.f32 0.5, %v2024_v12 }
 0xb9d   :  { %v2029_v17 = vmul.f32 %v2027_v13, %v2009_v51  ;;  %v4439_v51 = vld [vmem:[%s6377_s7 + $0x1] ss:$0 sm:$0xff] }
 0xb9e   :  { %v2028_v15 = vmul.f32 %v2026_v14, %v2004_v53 }
 0xba0   :  { %4850 = vmatprep.mubr.msk.f32.mxu1 %vm2045_vm7, %v2028_v15 }
 0xba1   :  { %4851 = vmatmul.mubr.msk.f32.vlgmr.msra.gmra.mrb[14].mxu1 %vm2045_vm7, %v2029_v17 }
 0xc74   :  { %v4852_v19 = vpop.f32.mrb[14].mxu1 }
 0xc75   :  { %v2124_v20 = vadd.f32 %v4852_v19, %v4429_v18  ;;  %v2118_v42 = vpop.f32.mrb[15].mxu1 }
 0xc76   :  { %v2119_v21 = vadd.f32 %v4429_v18, %v2118_v42 }
 0xc77   :  { %v2128_v35 = vadd.f32 %v2124_v20, %v1919_v28  ;;  %v6045_v20 = vld [vmem:[%s6422_s25] sm:$0xff] }
 0xc78   :  { %v2127_v33 = vadd.f32 %v2119_v21, %v1918_v6  ;;  %v6051_v21 = vld [vmem:[%s6422_s25 + $0x8] sm:$0xff]  ;;  %s6424_s25 = smov 88  }
 0xc79   :  { %v2134_v48 = vsel %vm75_vm0, %v2128_v35, 0.0 }
 0xc7a   :  { %2135 = vadd.xlane.f32.xlu0 %v2134_v48  ;;  %v2131_v8 = vsel %vm75_vm0, %v2127_v33, 0.0 }
 0xc7b   :  { %2132 = vadd.xlane.f32.xlu1 %v2131_v8 }
 0xd07   :  { %v2136_v59 = vpop.xlane.xlu0 %2135 }
 0xd08   :  { %v2138_v43 = vmul.f32 0.03125, %v2136_v59  ;;  %v2133_v47 = vpop.xlane.xlu1 %2132 }
 0xd09   :  { %v2137_v4 = vmul.f32 0.03125, %v2133_v47 }
 0xd0a   :  { %v2140_v60 = vsub.f32 %v2128_v35, %v2138_v43 }
 0xd0b   :  { %v2139_v22 = vsub.f32 %v2127_v33, %v2137_v4  ;;  %v4449_v4 = vld [vmem:[%s6423_s26 + $0x10] sm:$0xf] }
 0xd0c   :  { %v2142_v16 = vmul.f32 %v2140_v60, %v2140_v60 }
 0xd0d   :  { %v2141_v23 = vmul.f32 %v2139_v22, %v2139_v22 }
 0xd0e   :  { %v2146_v62 = vsel %vm75_vm0, %v2142_v16, 0.0 }
 0xd0f   :  { %2147 = vadd.xlane.f32.xlu0 %v2146_v62  ;;  %v2143_v7 = vsel %vm75_vm0, %v2141_v23, 0.0 }
 0xd10   :  { %2144 = vadd.xlane.f32.xlu1 %v2143_v7 }
 0xd9c   :  { %v2148_v6 = vpop.xlane.xlu0 %2147 }
 0xd9d   :  { %v2150_v27 = vmul.f32 0.03125, %v2148_v6  ;;  %v2145_v28 = vpop.xlane.xlu1 %2144 }
 0xd9e   :  { %v2149_v29 = vmul.f32 0.03125, %v2145_v28 }
 0xd9f   :  { %v2152_v30 = vadd.f32 1e-12, %v2150_v27 }
 0xda0   :  { %v2151_v39 = vadd.f32 1e-12, %v2149_v29 }
 0xda1   :  { %5353 = vrsqrt.f32 %v2152_v30 }
 0xda2   :  { %5355 = vrsqrt.f32 %v2151_v39 }
 0xdab   :  { %v5354_v31 = vpop.eup %5353 }
 0xdac   :  { %v5356_v34 = vpop.eup %5355  ;;  %v2156_v36 = vmul.f32 %v5354_v31, %v2140_v60 }
 0xdad   :  { %v2155_v37 = vmul.f32 %v5356_v34, %v2139_v22 }
 0xdae   :  { %v2164_v40 = vmul.f32 %v4432_v32, %v2156_v36 }
 0xdaf   :  { %v2163_v44 = vmul.f32 %v4432_v32, %v2155_v37 }
 0xdb0   :  { %v5992_v49 = vadd.f32 %v4433_v38, %v2164_v40 }
 0xdb1   :  { %v5990_v45 = vadd.f32 %v4433_v38, %v2163_v44 }
 0xdb3   :  { %4861 = vmatprep.mubr.msk.f32.mxu0 %vm75_vm0, %v5990_v45 }
 0xdb4   :  { %4862 = vmatmul.mubr.msk.f32.vlgmr.msra.gmra.mrb[16].mxu0 %vm75_vm0, %v5992_v49 }
 0xdb5   :  { %4865 = vmatpush3.msra.mxu0 %v4442_v50 }
 0xe87   :  { %v4863_v52 = vpop.f32.mrb[16].mxu0 }
 0xe88   :  { %v6004_v53 = vadd.f32 %v4863_v52, %v4439_v51  ;;  %v2258_v54 = vpop.f32.mrb[17].mxu0 }
 0xe89   :  { %v6006_v55 = vadd.f32 %v4439_v51, %v2258_v54 }
 0xe8b   :  { %4866 = vmatprep.mubr.msk.f32.mxu0 %vm212_vm1, %v6006_v55  ;;  %v6012_v56 = vpack.i.bf16 %v6004_v53, %v6006_v55 }
 0xe8c   :  { %4867 = vmatmul.mubr.msk.f32.vlgmr.msra.gmra.mrb[18].mxu0 %vm212_vm1, %v6004_v53 }
 0xe8d   :  { %5254 = vrot.lane.b32.xlu1 %v6012_v56, %s5472_s5  ;;  %4873 = vmatprep.mubr.msk.f32.mxu0 %vm212_vm1, %v6006_v55  ;;  %s6428_s5 = smov 72  }
 0xe91   :  { %5259 = vrot.lane.b32.xlu1 %v6012_v56, %s5474_s3 }
 0xe95   :  { %2652 = vrot.lane.b32.xlu1 %v6006_v55, %s5473_s22 }
 0xe99   :  { %2654 = vrot.lane.b32.xlu1 %v6004_v53, %s5473_s22  ;;  %s6429_s22 = smov 104  }
 0xeff   :  { %v5255_v57 = vpop.permute.xlu1 %5254 }
 0xf00   :  { %v5257_v58 = vunpack.i.h.bf16 %v5255_v57  ;;  %v5256_v10 = vunpack.i.l.bf16 %v5255_v57  ;;  %v4468_v57 = vld [vmem:[%s6419_s29 + $0x30] sm:$0xff] }
 0xf02   :  { %v5100_v11 = vpack.c.bf16 %v5257_v58, %v5256_v10 }
 0xf03   :  { %v5260_v61 = vpop.permute.xlu1 %5259 }
 0xf04   :  { %v5262_v0 = vunpack.i.h.bf16 %v5260_v61  ;;  %v5261_v1 = vunpack.i.l.bf16 %v5260_v61  ;;  %5102 = vmatprep.subr.msk.bf16.mxu0 %vm5666_vm2, %v5100_v11 }
 0xf05   :  { %5105 = vmatpush3.bf16.xpose.msk.msra.mxu0 %vm5666_vm2, %v5100_v11 }
 0xf06   :  { %v5106_v3 = vpack.c.bf16 %v5262_v0, %v5261_v1  ;;  %4888 = vmatprep.subr.mxu0 %v4455_v63 }
 0xf07   :  { %v6033_v2 = vpop.permute.xlu1 %2652 }
 0xf08   :  { %5107 = vmatprep.subr.bf16.mxu1 %v5106_v3 }
 0xf09   :  { %5109 = vmatpush3.bf16.msra.mxu1 %v5106_v3 }
 0xf0a   :  { %4883 = vmatprep.subr.msk.mxu1 %vm515_vm5, %v4449_v4 }
 0xf0b   :  { %v2655_v12 = vpop.permute.xlu1 %2654 }
 0xf0c   :  { %4874 = vmatmul.mubr.msk.f32.vlgmr.msra.gmra.mrb[20].mxu0 %vm212_vm1, %v6004_v53 }
 0xf0d   :  { %4890 = vmatprep.mubr.msk.f32.mxu0 %vm212_vm1, %v6033_v2  ;;  %4889 = vmatpush3.msra.mxu0 %v4455_v63 }
 0xf10   :  { %4891 = vmatmul.mubr.msk.f32.vlgmr.msra.gmra.mrb[22].mxu0 %vm212_vm1, %v2655_v12 }
 0xf5f   :  { %v4868_v13 = vpop.f32.mrb[18].mxu0 }
 0xf60   :  { %v2341_v14 = vpop.f32.mrb[19].mxu0  ;;  %v2436_v15 = vsel %vm377_vm3, %v4868_v13, -inf }
 0xf61   :  { %2437 = vmax.xlane.f32.xlu0 %v2436_v15  ;;  %v2433_v17 = vsel %vm377_vm3, %v2341_v14, -inf }
 0xf65   :  { %2434 = vmax.xlane.f32.xlu0 %v2433_v17 }
 0xfdf   :  { %v4875_v18 = vpop.f32.mrb[20].mxu0 }
 0xfe0   :  { %v2424_v19 = vpop.f32.mrb[21].mxu0  ;;  %v2430_v35 = vadd.f32 %v6051_v21, %v4875_v18 }
 0xfe1   :  { %v2425_v42 = vadd.f32 %v6045_v20, %v2424_v19 }
 0xfe2   :  { %v2442_v43 = vsel %vm384_vm4, %v2430_v35, -inf }
 0xfe3   :  { %v6054_v33 = vpop.f32.mrb[22].mxu0  ;;  %v2439_v48 = vsel %vm384_vm4, %v2425_v42, -inf }
 0xfe4   :  { %v6057_v8 = vpop.f32.mrb[23].mxu0  ;;  %2440 = vmax.xlane.f32.xlu0 %v2439_v48  ;;  %v2821_v59 = vsel %vm377_vm3, %v6054_v33, -inf }
 0xfe5   :  { %2822 = vmax.xlane.f32.xlu1 %v2821_v59  ;;  %v2818_v47 = vsel %vm377_vm3, %v6057_v8, -inf  ;;  %v4462_v59 = vld [vmem:[%s6423_s26 + $0x14] sm:$0xf] }
 0xfe8   :  { %2443 = vmax.xlane.f32.xlu0 %v2442_v43 }
 0xfe9   :  { %2819 = vmax.xlane.f32.xlu1 %v2818_v47 }
 0xfee   :  { %v2438_v60 = vpop.xlane.xlu0 %2437 }
 0xff2   :  { %v2435_v22 = vpop.xlane.xlu0 %2434 }
 0xffe   :  { %5264 = vrot.lane.b32.xlu0 %v6012_v56, %s6424_s25  ;;  %s6430_s25 = smov 48  }
0x1071   :  { %v2441_v16 = vpop.xlane.xlu0 %2440 }
0x1072   :  { %v2445_v23 = vmax.f32 %v2435_v22, %v2441_v16  ;;  %v2823_v58 = vpop.xlane.xlu1 %2822 }
0x1074   :  { %v2453_v62 = vsub.f32 %v2425_v42, %v2445_v23  ;;  %v2447_v24 = vsub.f32 %v2341_v14, %v2445_v23 }
0x1075   :  { %v2444_v7 = vpop.xlane.xlu0 %2443 }
0x1076   :  { %v2455_v5 = vmul.f32 1.442695, %v2453_v62  ;;  %v2446_v41 = vmax.f32 %v2438_v60, %v2444_v7  ;;  %v2449_v26 = vmul.f32 1.442695, %v2447_v24  ;;  %v2820_v10 = vpop.xlane.xlu1 %2819 }
0x1078   :  { %v2454_v25 = vsub.f32 %v2430_v35, %v2446_v41  ;;  %5357 = vpow2.f32 %v2455_v5  ;;  %v2448_v6 = vsub.f32 %v4868_v13, %v2446_v41 }
0x1079   :  { %v5265_v28 = vpop.permute.xlu0 %5264 }
0x107a   :  { %v2457_v9 = vmul.f32 1.442695, %v2454_v25  ;;  %v2451_v27 = vmul.f32 1.442695, %v2448_v6  ;;  %v5267_v30 = vunpack.i.h.bf16 %v5265_v28  ;;  %v5266_v39 = vunpack.i.l.bf16 %v5265_v28 }
0x107c   :  { %5359 = vpow2.f32 %v2457_v9  ;;  %v5110_v34 = vpack.c.bf16 %v5267_v30, %v5266_v39  ;;  %v4481_v39 = vld [vmem:[%s6419_s29 + $0x38] sm:$0xff] }
0x107d   :  { %5361 = vpow2.f32 %v2449_v26 }
0x107e   :  { %5363 = vpow2.f32 %v2451_v27 }
0x1082   :  { %v6070_v29 = vpop.eup %5357 }
0x1083   :  { %4880 = vmatprep.mubr.msk.f32.mxu1 %vm384_vm4, %v6070_v29 }
0x1086   :  { %v6074_v31 = vpop.eup %5359 }
0x1087   :  { %v6076_v32 = vpop.eup %5361  ;;  %4881 = vmatmul.mubr.msk.f32.vlgmr.msra.gmra.mrb[16].mxu1 %vm384_vm4, %v6074_v31 }
0x1088   :  { %4884 = vmatpush3.msk.msra.mxu1 %vm515_vm5, %v4449_v4  ;;  %4885 = vmatprep.mubr.msk.f32.mxu1 %vm377_vm3, %v6076_v32  ;;  %v6085_v36 = vpop.eup %5363 }
0x1089   :  { %5112 = vmatprep.subr.msk.bf16.mxu1 %vm5666_vm2, %v5110_v34 }
0x108f   :  { %4886 = vmatmul.mubr.msk.f32.vlgmr.msra.gmra.mrb[16].mxu1 %vm377_vm3, %v6085_v36 }
0x1090   :  { %5115 = vmatpush3.bf16.xpose.msk.msra.mxu1 %vm5666_vm2, %v5110_v34  ;;  %4897 = vmatprep.mubr.msk.f32.mxu1 %vm212_vm1, %v6033_v2 }
0x1091   :  { %4912 = vmatprep.subr.mxu1 %v4468_v57 }
0x1097   :  { %4898 = vmatmul.mubr.msk.f32.vlgmr.msra.gmra.mrb[18].mxu1 %vm212_vm1, %v2655_v12 }
0x1098   :  { %4913 = vmatpush3.msra.mxu1 %v4468_v57 }
0x1162   :  { %v6094_v37 = vpop.f32.mrb[16].mxu1 }
0x1163   :  { %v6096_v38 = vpop.f32.mrb[17].mxu1 }
0x116a   :  { %v4899_v40 = vpop.f32.mrb[18].mxu1 }
0x116b   :  { %v2815_v44 = vadd.f32 %v6051_v21, %v4899_v40  ;;  %v2809_v50 = vpop.f32.mrb[19].mxu1 }
0x116c   :  { %v2810_v51 = vadd.f32 %v6045_v20, %v2809_v50 }
0x116d   :  { %v2827_v52 = vsel %vm384_vm4, %v2815_v44, -inf }
0x116e   :  { %2828 = vmax.xlane.f32.xlu1 %v2827_v52  ;;  %v2824_v54 = vsel %vm384_vm4, %v2810_v51, -inf }
0x116f   :  { %2825 = vmax.xlane.f32.xlu0 %v2824_v54 }
0x117f   :  { %5274 = vrot.lane.b32.xlu1 %v6012_v56, %s6425_s24 }
0x1183   :  { %3037 = vrot.lane.b32.xlu1 %v6006_v55, %s6426_s30 }
0x1185   :  { %5269 = vrot.lane.b32.xlu0 %v6012_v56, %s6427_s28 }
0x1189   :  { %3039 = vrot.lane.b32.xlu0 %v6004_v53, %s6426_s30 }
0x11fb   :  { %v2829_v11 = vpop.xlane.xlu1 %2828 }
0x11fc   :  { %v2831_v61 = vmax.f32 %v2823_v58, %v2829_v11  ;;  %v2826_v63 = vpop.xlane.xlu0 %2825 }
0x11fd   :  { %v2830_v0 = vmax.f32 %v2820_v10, %v2826_v63 }
0x11fe   :  { %v2839_v1 = vsub.f32 %v2815_v44, %v2831_v61 }
0x11ff   :  { %v2832_v3 = vsub.f32 %v6057_v8, %v2830_v0  ;;  %v2838_v2 = vsub.f32 %v2810_v51, %v2830_v0  ;;  %v5275_v12 = vpop.permute.xlu1 %5274  ;;  %v2833_v8 = vsub.f32 %v6054_v33, %v2831_v61 }
0x1200   :  { %v5270_v13 = vpop.permute.xlu0 %5269  ;;  %v2842_v18 = vmul.f32 1.442695, %v2839_v1  ;;  %v5277_v47 = vunpack.i.h.bf16 %v5275_v12  ;;  %v5276_v4 = vunpack.i.l.bf16 %v5275_v12  ;;  %v4475_v12 = vld [vmem:[%s6423_s26 + $0x18] sm:$0xf] }
0x1201   :  { %v2840_v14 = vmul.f32 1.442695, %v2838_v2  ;;  %v5272_v15 = vunpack.i.h.bf16 %v5270_v13  ;;  %v5271_v17 = vunpack.i.l.bf16 %v5270_v13  ;;  %v2834_v19 = vmul.f32 1.442695, %v2832_v3 }
0x1202   :  { %v2836_v43 = vmul.f32 1.442695, %v2833_v8  ;;  %v5120_v23 = vpack.c.bf16 %v5277_v47, %v5276_v4 }
0x1203   :  { %v5116_v42 = vpack.c.bf16 %v5272_v15, %v5271_v17  ;;  %v3038_v35 = vpop.permute.xlu1 %3037  ;;  %5365 = vpow2.f32 %v2840_v14 }
0x1204   :  { %4914 = vmatprep.mubr.msk.f32.mxu1 %vm212_vm1, %v3038_v35  ;;  %v3040_v48 = vpop.permute.xlu0 %3039  ;;  %5367 = vpow2.f32 %v2842_v18 }
0x1205   :  { %5117 = vmatprep.subr.bf16.mxu0 %v5116_v42  ;;  %4915 = vmatmul.mubr.msk.f32.vlgmr.msra.gmra.mrb[20].mxu1 %vm212_vm1, %v3040_v48  ;;  %5369 = vpow2.f32 %v2834_v19 }
0x1206   :  { %5119 = vmatpush3.bf16.msra.mxu0 %v5116_v42  ;;  %5371 = vpow2.f32 %v2836_v43 }
0x1207   :  { %4907 = vmatprep.subr.msk.mxu0 %vm515_vm5, %v4462_v59 }
0x120d   :  { %v6121_v60 = vpop.eup %5365 }
0x120e   :  { %v6123_v22 = vpop.eup %5367  ;;  %4904 = vmatprep.mubr.msk.f32.mxu0 %vm384_vm4, %v6121_v60 }
0x120f   :  { %v6127_v16 = vpop.eup %5369  ;;  %4905 = vmatmul.mubr.msk.f32.vlgmr.msra.gmra.mrb[24].mxu0 %vm384_vm4, %v6123_v22 }
0x1210   :  { %4908 = vmatpush3.msk.msra.mxu0 %vm515_vm5, %v4462_v59  ;;  %4909 = vmatprep.mubr.msk.f32.mxu0 %vm377_vm3, %v6127_v16  ;;  %v6136_v33 = vpop.eup %5371 }
0x1211   :  { %5122 = vmatprep.subr.msk.bf16.mxu0 %vm5666_vm2, %v5120_v23 }
0x1217   :  { %4910 = vmatmul.mubr.msk.f32.vlgmr.msra.gmra.mrb[24].mxu0 %vm377_vm3, %v6136_v33 }
0x1218   :  { %5125 = vmatpush3.bf16.xpose.msk.msra.mxu0 %vm5666_vm2, %v5120_v23  ;;  %4921 = vmatprep.mubr.msk.f32.mxu0 %vm212_vm1, %v3038_v35 }
0x1219   :  { %4936 = vmatprep.subr.mxu0 %v4481_v39 }
0x121f   :  { %4922 = vmatmul.mubr.msk.f32.vlgmr.msra.gmra.mrb[26].mxu0 %vm212_vm1, %v3040_v48 }
0x1220   :  { %4937 = vmatpush3.msra.mxu0 %v4481_v39 }
0x12d8   :  { %v4916_v62 = vpop.f32.mrb[20].mxu1 }
0x12d9   :  { %v3111_v7 = vpop.f32.mrb[21].mxu1  ;;  %v3206_v24 = vsel %vm377_vm3, %v4916_v62, -inf }
0x12da   :  { %3207 = vmax.xlane.f32.xlu0 %v3206_v24  ;;  %v3203_v5 = vsel %vm377_vm3, %v3111_v7, -inf }
0x12db   :  { %3204 = vmax.xlane.f32.xlu1 %v3203_v5 }
0x12ea   :  { %v6146_v41 = vpop.f32.mrb[24].mxu0 }
0x12eb   :  { %v6148_v25 = vpop.f32.mrb[25].mxu0 }
0x12f2   :  { %v4923_v26 = vpop.f32.mrb[26].mxu0 }
0x12f3   :  { %v3200_v9 = vadd.f32 %v6051_v21, %v4923_v26  ;;  %v3194_v6 = vpop.f32.mrb[27].mxu0 }
0x12f4   :  { %v3195_v27 = vadd.f32 %v6045_v20, %v3194_v6  ;;  %v2850_v6 = vsel %vm384_vm4, %v6121_v60, 0.0 }
0x12f5   :  { %v3212_v28 = vsel %vm384_vm4, %v3200_v9, -inf }
0x12f6   :  { %3213 = vmax.xlane.f32.xlu1 %v3212_v28  ;;  %v3209_v30 = vsel %vm384_vm4, %v3195_v27, -inf }
0x12f7   :  { %3210 = vmax.xlane.f32.xlu0 %v3209_v30 }
0x1307   :  { %5284 = vrot.lane.b32.xlu1 %v6012_v56, %s6428_s5 }
0x130b   :  { %3422 = vrot.lane.b32.xlu1 %v6006_v55, %s6429_s22 }
0x130d   :  { %5279 = vrot.lane.b32.xlu0 %v6012_v56, %s6430_s25 }
0x1311   :  { %3424 = vrot.lane.b32.xlu0 %v6004_v53, %s6429_s22 }
0x1367   :  { %v3208_v40 = vpop.xlane.xlu0 %3207 }
0x1368   :  { %v3205_v34 = vpop.xlane.xlu1 %3204 }
0x1383   :  { %v3214_v44 = vpop.xlane.xlu1 %3213 }
0x1384   :  { %v3216_v50 = vmax.f32 %v3208_v40, %v3214_v44  ;;  %v3211_v51 = vpop.xlane.xlu0 %3210 }
0x1385   :  { %v3215_v52 = vmax.f32 %v3205_v34, %v3211_v51 }
0x1386   :  { %v3224_v54 = vsub.f32 %v3200_v9, %v3216_v50  ;;  %v3218_v13 = vsub.f32 %v4916_v62, %v3216_v50  ;;  %v2844_v9 = vsel %vm377_vm3, %v6127_v16, 0.0 }
0x1387   :  { %v3217_v55 = vsub.f32 %v3111_v7, %v3215_v52  ;;  %v3223_v57 = vsub.f32 %v3195_v27, %v3215_v52  ;;  %v5285_v58 = vpop.permute.xlu1 %5284 }
0x1388   :  { %v5280_v10 = vpop.permute.xlu0 %5279  ;;  %v3227_v0 = vmul.f32 1.442695, %v3224_v54  ;;  %v3221_v14 = vmul.f32 1.442695, %v3218_v13  ;;  %v5287_v15 = vunpack.i.h.bf16 %v5285_v58  ;;  %v5286_v17 = vunpack.i.l.bf16 %v5285_v58 }
0x1389   :  { %v3225_v11 = vmul.f32 1.442695, %v3223_v57  ;;  %v5282_v61 = vunpack.i.h.bf16 %v5280_v10  ;;  %v5281_v63 = vunpack.i.l.bf16 %v5280_v10  ;;  %v3219_v1 = vmul.f32 1.442695, %v3217_v55 }
0x138a   :  { %v5130_v35 = vpack.c.bf16 %v5287_v15, %v5286_v17 }
0x138b   :  { %v5126_v3 = vpack.c.bf16 %v5282_v61, %v5281_v63  ;;  %v3423_v2 = vpop.permute.xlu1 %3422  ;;  %5373 = vpow2.f32 %v3225_v11 }
0x138c   :  { %4938 = vmatprep.mubr.msk.f32.mxu0 %vm212_vm1, %v3423_v2  ;;  %v3425_v53 = vpop.permute.xlu0 %3424  ;;  %5375 = vpow2.f32 %v3227_v0 }
0x138d   :  { %5127 = vmatprep.subr.bf16.mxu1 %v5126_v3  ;;  %4939 = vmatmul.mubr.msk.f32.vlgmr.msra.gmra.mrb[28].mxu0 %vm212_vm1, %v3425_v53  ;;  %5377 = vpow2.f32 %v3219_v1 }
0x138e   :  { %5129 = vmatpush3.bf16.msra.mxu1 %v5126_v3  ;;  %5379 = vpow2.f32 %v3221_v14  ;;  %v4488_v3 = vld [vmem:[%s6423_s26 + $0x1c] sm:$0xf]  ;;  %s6432_s26 = smov 16  }
0x138f   :  { %4931 = vmatprep.subr.msk.mxu1 %vm515_vm5, %v4475_v12 }
0x1395   :  { %v5374_v18 = vpop.eup %5373 }
0x1396   :  { %v5376_v19 = vpop.eup %5375  ;;  %4928 = vmatprep.mubr.msk.f32.mxu1 %vm384_vm4, %v5374_v18  ;;  %v3235_v16 = vsel %vm384_vm4, %v5374_v18, 0.0 }
0x1397   :  { %v5378_v42 = vpop.eup %5377  ;;  %4929 = vmatmul.mubr.msk.f32.vlgmr.msra.gmra.mrb[22].mxu1 %vm384_vm4, %v5376_v19  ;;  %v3238_v60 = vsel %vm384_vm4, %v5376_v19, 0.0 }
0x1398   :  { %4932 = vmatpush3.msk.msra.mxu1 %vm515_vm5, %v4475_v12  ;;  %4933 = vmatprep.mubr.msk.f32.mxu1 %vm377_vm3, %v5378_v42  ;;  %v5380_v48 = vpop.eup %5379  ;;  %v3229_v27 = vsel %vm377_vm3, %v5378_v42, 0.0 }
0x1399   :  { %5132 = vmatprep.subr.msk.bf16.mxu1 %vm5666_vm2, %v5130_v35  ;;  %v3232_v28 = vsel %vm377_vm3, %v5380_v48, 0.0 }
0x139f   :  { %4934 = vmatmul.mubr.msk.f32.vlgmr.msra.gmra.mrb[22].mxu1 %vm377_vm3, %v5380_v48 }
0x13a0   :  { %5135 = vmatpush3.bf16.xpose.msk.msra.mxu1 %vm5666_vm2, %v5130_v35  ;;  %4945 = vmatprep.mubr.msk.f32.mxu1 %vm212_vm1, %v3423_v2 }
0x13a7   :  { %4946 = vmatmul.mubr.msk.f32.vlgmr.msra.gmra.mrb[24].mxu1 %vm212_vm1, %v3425_v53 }
0x1460   :  { %v4940_v59 = vpop.f32.mrb[28].mxu0 }
0x1461   :  { %v3496_v8 = vpop.f32.mrb[29].mxu0  ;;  %v3591_v43 = vsel %vm377_vm3, %v4940_v59, -inf }
0x1462   :  { %3592 = vmax.xlane.f32.xlu0 %v3591_v43  ;;  %v3588_v47 = vsel %vm377_vm3, %v3496_v8, -inf }
0x1463   :  { %3589 = vmax.xlane.f32.xlu1 %v3588_v47 }
0x1472   :  { %v6184_v4 = vpop.f32.mrb[22].mxu1 }
0x1473   :  { %v6186_v23 = vpop.f32.mrb[23].mxu1 }
0x147a   :  { %v4947_v62 = vpop.f32.mrb[24].mxu1 }
0x147b   :  { %v3585_v46 = vadd.f32 %v6051_v21, %v4947_v62  ;;  %v3579_v7 = vpop.f32.mrb[25].mxu1  ;;  %v2847_v21 = vsel %vm377_vm3, %v6136_v33, 0.0  ;;  %v2462_v33 = vsel %vm377_vm3, %v6085_v36, 0.0  ;;  %v2468_v62 = vsel %vm384_vm4, %v6074_v31, 0.0 }
0x147c   :  { %v3580_v24 = vadd.f32 %v6045_v20, %v3579_v7  ;;  %v2853_v20 = vsel %vm384_vm4, %v6123_v22, 0.0 }
0x147d   :  { %v3597_v5 = vsel %vm384_vm4, %v3585_v46, -inf }
0x147e   :  { %3598 = vmax.xlane.f32.xlu1 %v3597_v5  ;;  %v3594_v26 = vsel %vm384_vm4, %v3580_v24, -inf }
0x147f   :  { %3595 = vmax.xlane.f32.xlu0 %v3594_v26 }
0x1482   :  { %2845 = vadd.xlane.f32.xlu1 %v2844_v9 }
0x1486   :  { %2851 = vadd.xlane.f32.xlu1 %v2850_v6 }
0x148a   :  { %2848 = vadd.xlane.f32.xlu1 %v2847_v21  ;;  %v4494_v21 = vld [vmem:[%s6378_s8 + $0x20] sm:$0xff] }
0x148e   :  { %2854 = vadd.xlane.f32.xlu1 %v2853_v20  ;;  %v4496_v20 = vld [vmem:[%s6378_s8 + $0x30] sm:$0xff] }
0x1492   :  { %3230 = vadd.xlane.f32.xlu1 %v3229_v27  ;;  %v4497_v27 = vld [vmem:[%s6378_s8 + $0x38] sm:$0xff] }
0x1495   :  { %5289 = vrot.lane.b32.xlu0 %v6012_v56, %s6431_s6 }
0x1496   :  { %3236 = vadd.xlane.f32.xlu1 %v3235_v16 }
0x149a   :  { %3239 = vadd.xlane.f32.xlu1 %v3238_v60 }
0x14b4   :  { %3233 = vadd.xlane.f32.xlu0 %v3232_v28 }
0x14b8   :  { %2463 = vadd.xlane.f32.xlu0 %v2462_v33 }
0x14ef   :  { %v3593_v30 = vpop.xlane.xlu0 %3592 }
0x14f0   :  { %v3590_v22 = vpop.xlane.xlu1 %3589 }
0x150b   :  { %v3599_v39 = vpop.xlane.xlu1 %3598 }
0x150c   :  { %v3601_v34 = vmax.f32 %v3593_v30, %v3599_v39  ;;  %v3596_v40 = vpop.xlane.xlu0 %3595 }
0x150d   :  { %v3600_v44 = vmax.f32 %v3590_v22, %v3596_v40 }
0x150e   :  { %v3603_v56 = vsub.f32 %v4940_v59, %v3601_v34  ;;  %v3609_v50 = vsub.f32 %v3585_v46, %v3601_v34 }
0x150f   :  { %v3602_v51 = vsub.f32 %v3496_v8, %v3600_v44  ;;  %v3608_v52 = vsub.f32 %v3580_v24, %v3600_v44  ;;  %v2846_v54 = vpop.xlane.xlu1 %2845  ;;  %v2465_v8 = vsel %vm384_vm4, %v6070_v29, 0.0 }
0x1510   :  { %v3606_v55 = vmul.f32 1.442695, %v3603_v56  ;;  %v3612_v57 = vmul.f32 1.442695, %v3609_v50  ;;  %v5290_v58 = vpop.permute.xlu0 %5289 }
0x1511   :  { %v3604_v10 = vmul.f32 1.442695, %v3602_v51  ;;  %v3610_v11 = vmul.f32 1.442695, %v3608_v52  ;;  %v5292_v61 = vunpack.i.h.bf16 %v5290_v58  ;;  %v5291_v63 = vunpack.i.l.bf16 %v5290_v58 }
0x1512   :  { %5381 = vpow2.f32 %v3606_v55 }
0x1513   :  { %5383 = vpow2.f32 %v3612_v57  ;;  %v5136_v36 = vpack.c.bf16 %v5292_v61, %v5291_v63  ;;  %v2852_v0 = vpop.xlane.xlu1 %2851 }
0x1514   :  { %5385 = vpow2.f32 %v3604_v10  ;;  %v2856_v1 = vadd.f32 %v2852_v0, %v2846_v54 }
0x1515   :  { %5387 = vpow2.f32 %v3610_v11  ;;  %5137 = vmatprep.subr.bf16.mxu0 %v5136_v36 }
0x1516   :  { %5389 = vrcp.f32 %v2856_v1  ;;  %5139 = vmatpush3.bf16.msra.mxu0 %v5136_v36 }
0x1517   :  { %4955 = vmatprep.subr.msk.mxu0 %vm515_vm5, %v4488_v3  ;;  %v2849_v19 = vpop.xlane.xlu1 %2848 }
0x151b   :  { %v2855_v35 = vpop.xlane.xlu1 %2854 }
0x151c   :  { %v5382_v2 = vpop.eup %5381  ;;  %v2857_v43 = vadd.f32 %v2855_v35, %v2849_v19 }
0x151d   :  { %v5384_v53 = vpop.eup %5383  ;;  %v3617_v12 = vsel %vm377_vm3, %v5382_v2, 0.0 }
0x151e   :  { %v5386_v13 = vpop.eup %5385  ;;  %3618 = vadd.xlane.f32.xlu1 %v3617_v12  ;;  %v3623_v48 = vsel %vm384_vm4, %v5384_v53, 0.0  ;;  %5391 = vrcp.f32 %v2857_v43 }
0x151f   :  { %v5388_v14 = vpop.eup %5387  ;;  %v3614_v18 = vsel %vm377_vm3, %v5386_v13, 0.0  ;;  %v3231_v59 = vpop.xlane.xlu1 %3230 }
0x1520   :  { %v5390_v15 = vpop.eup %5389  ;;  %4952 = vmatprep.mubr.msk.f32.mxu0 %vm384_vm4, %v5388_v14  ;;  %v3620_v42 = vsel %vm384_vm4, %v5388_v14, 0.0 }
0x1521   :  { %4953 = vmatmul.mubr.msk.f32.vlgmr.msra.gmra.mrb[30].mxu0 %vm384_vm4, %v5384_v53  ;;  %v3033_v17 = vmul.f32 %v5390_v15, %v6148_v25  ;;  %v2459_v25 = vsel %vm377_vm3, %v6076_v32, 0.0 }
0x1522   :  { %4956 = vmatpush3.msk.msra.mxu0 %vm515_vm5, %v4488_v3  ;;  %4957 = vmatprep.mubr.msk.f32.mxu0 %vm377_vm3, %v5386_v13 }
0x1523   :  { %3615 = vadd.xlane.f32.xlu1 %v3614_v18  ;;  %3807 = vrot.lane.b32.xlu0 %v3033_v17, %s5482_s2  ;;  %v3237_v47 = vpop.xlane.xlu1 %3236 }
0x1524   :  { %v3241_v46 = vadd.f32 %v3237_v47, %v3231_v59 }
0x1526   :  { %5393 = vrcp.f32 %v3241_v46 }
0x1527   :  { %3621 = vadd.xlane.f32.xlu1 %v3620_v42  ;;  %v3240_v7 = vpop.xlane.xlu1 %3239 }
0x1528   :  { %v5392_v26 = vpop.eup %5391 }
0x1529   :  { %4958 = vmatmul.mubr.msk.f32.vlgmr.msra.gmra.mrb[30].mxu0 %vm377_vm3, %v5382_v2  ;;  %v3034_v32 = vmul.f32 %v5392_v26, %v6146_v41  ;;  %v4495_v41 = vld [vmem:[%s6378_s8 + $0x28] sm:$0xff]  ;;  %s6433_s8 = smov 24  }
0x152b   :  { %3624 = vadd.xlane.f32.xlu1 %v3623_v48 }
0x152f   :  { %2460 = vadd.xlane.f32.xlu1 %v2459_v25 }
0x1530   :  { %v5394_v9 = vpop.eup %5393 }
0x1531   :  { %v3418_v29 = vmul.f32 %v5394_v9, %v6186_v23  ;;  %v5140_v23 = vpack.c.bf16 %v4495_v41, %v4494_v21  ;;  %v4507_v9 = vld [vmem:[%s6382_s12 + $0x28] sm:$0xff] }
0x1533   :  { %2466 = vadd.xlane.f32.xlu1 %v2465_v8  ;;  %5141 = vmatprep.subr.bf16.mxu1 %v5140_v23 }
0x1534   :  { %5143 = vmatpush3.bf16.msra.mxu1 %v5140_v23 }
0x1537   :  { %2469 = vadd.xlane.f32.xlu1 %v2468_v62 }
0x1541   :  { %v3234_v24 = vpop.xlane.xlu0 %3233 }
0x1542   :  { %v3242_v5 = vadd.f32 %v3240_v7, %v3234_v24 }
0x1544   :  { %5395 = vrcp.f32 %v3242_v5 }
0x1545   :  { %v2464_v55 = vpop.xlane.xlu0 %2463 }
0x1548   :  { %3809 = vrot.lane.b32.xlu1 %v3034_v32, %s5482_s2 }
0x154c   :  { %3815 = vrot.lane.b32.xlu1 %v3418_v29, %s6432_s26 }
0x154e   :  { %v5396_v6 = vpop.eup %5395 }
0x154f   :  { %v3419_v31 = vmul.f32 %v5396_v6, %v6184_v4  ;;  %v5144_v4 = vpack.c.bf16 %v4497_v27, %v4496_v20  ;;  %v4508_v6 = vld [vmem:[%s6382_s12 + $0x30] sm:$0xff] }
0x1551   :  { %3817 = vrot.lane.b32.xlu1 %v3419_v31, %s6432_s26  ;;  %5145 = vmatprep.subr.bf16.mxu1 %v5144_v4  ;;  %v4509_v31 = vld [vmem:[%s6382_s12 + $0x38] sm:$0xff] }
0x1552   :  { %5147 = vmatpush3.bf16.msra.mxu1 %v5144_v4  ;;  %v5152_v21 = vpack.c.bf16 %v4509_v31, %v4508_v6 }
0x1595   :  { %v3808_v3 = vpop.permute.xlu0 %3807 }
0x15ab   :  { %v3619_v16 = vpop.xlane.xlu1 %3618 }
0x15b0   :  { %v3616_v60 = vpop.xlane.xlu1 %3615 }
0x15b4   :  { %v3622_v28 = vpop.xlane.xlu1 %3621 }
0x15b5   :  { %v3626_v30 = vadd.f32 %v3622_v28, %v3616_v60  ;;  %v4504_v28 = vld [vmem:[%s6380_s10 + $0x1] ss:$0 sm:$0xff] }
0x15b8   :  { %v3625_v33 = vpop.xlane.xlu1 %3624 }
0x15b9   :  { %v3627_v22 = vadd.f32 %v3625_v33, %v3619_v16 }
0x15bb   :  { %5397 = vrcp.f32 %v3627_v22  ;;  %v4505_v22 = vld [vmem:[%s6381_s11 + $0x1] ss:$0 sm:$0xff] }
0x15bc   :  { %5399 = vrcp.f32 %v3626_v30  ;;  %v2461_v51 = vpop.xlane.xlu1 %2460 }
0x15c0   :  { %v2467_v52 = vpop.xlane.xlu1 %2466 }
0x15c1   :  { %v2471_v57 = vadd.f32 %v2467_v52, %v2461_v51  ;;  %v4515_v51 = vld [vmem:[%s6384_s14 + $0x48] sm:$0xff] }
0x15c3   :  { %5401 = vrcp.f32 %v2471_v57 }
0x15c4   :  { %v2470_v54 = vpop.xlane.xlu1 %2469 }
0x15c5   :  { %v5398_v39 = vpop.eup %5397  ;;  %v2472_v58 = vadd.f32 %v2470_v54, %v2464_v55  ;;  %v4516_v54 = vld [vmem:[%s6384_s14 + $0x50] sm:$0xff]  ;;  %v4517_v55 = vld [vmem:[%s6384_s14 + $0x58] sm:$0xff] }
0x15c6   :  { %v5400_v40 = vpop.eup %5399  ;;  %v5160_v57 = vpack.c.bf16 %v4517_v55, %v4516_v54 }
0x15c7   :  { %5403 = vrcp.f32 %v2472_v58  ;;  %v4518_v58 = vld [vmem:[%s6384_s14 + $0x60] sm:$0xff] }
0x15c8   :  { %v3810_v10 = vpop.permute.xlu1 %3809 }
0x15cc   :  { %v3816_v11 = vpop.permute.xlu1 %3815 }
0x15cd   :  { %v5402_v61 = vpop.eup %5401 }
0x15ce   :  { %v2648_v36 = vmul.f32 %v5402_v61, %v6096_v38  ;;  %v4520_v61 = vld [vmem:[%s6384_s14 + $0x70] sm:$0xff] }
0x15d0   :  { %v3818_v1 = vpop.permute.xlu1 %3817  ;;  %v3829_v2 = vsel %vm212_vm1, %v2648_v36, %v3808_v3 }
0x15d1   :  { %v5404_v63 = vpop.eup %5403  ;;  %v3831_v13 = vsel %vm384_vm4, %v3829_v2, %v3816_v11 }
0x15d2   :  { %v2649_v0 = vmul.f32 %v5404_v63, %v6094_v37  ;;  %v4499_v37 = vld [vmem:[%s6379_s9 + $0x1] ss:$0 sm:$0xff]  ;;  %v4521_v63 = vld [vmem:[%s6384_s14 + $0x78] sm:$0xff] }
0x15d3   :  { %v5168_v36 = vpack.c.bf16 %v4521_v63, %v4520_v61  ;;  %v4529_v61 = vld [vmem:[%s6387_s17 + $0x1] ss:$0 sm:$0xff] }
0x15d4   :  { %v3830_v53 = vsel %vm212_vm1, %v2649_v0, %v3810_v10  ;;  %v4519_v10 = vld [vmem:[%s6384_s14 + $0x68] sm:$0xff]  ;;  %v4511_v0 = vld [vmem:[%s6383_s13 + $0x1] ss:$0 sm:$0xff] }
0x15d5   :  { %v3832_v15 = vsel %vm384_vm4, %v3830_v53, %v3818_v1  ;;  %v5164_v11 = vpack.c.bf16 %v4519_v10, %v4518_v58 }
0x15fc   :  { %v4959_v34 = vpop.f32.mrb[30].mxu0 }
0x15fd   :  { %v3804_v44 = vmul.f32 %v5398_v39, %v4959_v34  ;;  %v3794_v56 = vpop.f32.mrb[31].mxu0 }
0x15fe   :  { %v3803_v50 = vmul.f32 %v5400_v40, %v3794_v56 }
0x15ff   :  { %3825 = vrot.lane.b32.xlu1 %v3804_v44, %s6433_s8 }
0x1600   :  { %3823 = vrot.lane.b32.xlu0 %v3803_v50, %s6433_s8  ;;  %v4514_v50 = vld [vmem:[%s6384_s14 + $0x40] sm:$0xff] }
0x1601   :  { %v5156_v52 = vpack.c.bf16 %v4515_v51, %v4514_v50 }
0x1603   :  { %5157 = vmatprep.subr.bf16.mxu1 %v5156_v52 }
0x1671   :  { %v3826_v12 = vpop.permute.xlu1 %3825 }
0x1672   :  { %v3824_v14 = vpop.permute.xlu0 %3823  ;;  %v3834_v18 = vsel %vm1779_vm6, %v3832_v15, %v3826_v12 }
0x1673   :  { %v3833_v17 = vsel %vm1779_vm6, %v3831_v13, %v3824_v14 }
0x1674   :  { %4968 = vmatprep.mubr.msk.f32.mxu1 %vm75_vm0, %v3833_v17 }
0x1675   :  { %4969 = vmatmul.mubr.msk.f32.vlgmr.msra.gmra.mrb[26].mxu1 %vm75_vm0, %v3834_v18 }
0x1676   :  { %5159 = vmatpush3.bf16.msra.mxu1 %v5156_v52 }
0x1677   :  { %5161 = vmatprep.subr.bf16.mxu1 %v5160_v57 }
0x167a   :  { %5163 = vmatpush3.bf16.msra.mxu1 %v5160_v57  ;;  %v4528_v57 = vld [vmem:[%s6386_s16 + $0x1] ss:$0 sm:$0xff]  ;;  %s5488_s16 = smov [#allocation2]  }
0x167b   :  { %5165 = vmatprep.subr.bf16.mxu1 %v5164_v11  ;;  %s4344_s17 = sshll.u32 %s5488_s16, 4  ;;  %s4345_s17 = int_to_ptr.vmem [resolvable:$true] %s4344_s17 }
0x167c   :  { %s5423_s3 = scalar_lea.vmem %s4345_s17, 32  ;;  %p5428_p1 = scmp.lt.s32.totalorder %s4345_s17, %s4345_s17 }
0x167d   :  { %p5424_p0 = scmp.ne.s32.totalorder %s4345_s17, %s5423_s3  ;;  %p5429_p2 = scmp.lt.s32.totalorder %s5423_s3, %s5423_s3 }
0x167e   :  { %5167 = vmatpush3.bf16.msra.mxu1 %v5164_v11 }
0x167f   :  { %5169 = vmatprep.subr.bf16.mxu1 %v5168_v36  ;;  %p5430_p3 = por %p5429_p2, %p5428_p1 }
0x1681   :  { %p5431_p4 = pnand %p5430_p3, %p5424_p0 }
0x1682   :  { %5171 = vmatpush3.bf16.msra.mxu1 %v5168_v36 }
0x1748   :  { %v4970_v38 = vpop.f32.mrb[26].mxu1 }
0x1749   :  { %v3926_v19 = vadd.f32 %v4970_v38, %v4499_v37  ;;  %v3920_v42 = vpop.f32.mrb[27].mxu1 }
0x174a   :  { %v3921_v35 = vadd.f32 %v4499_v37, %v3920_v42 }
0x174b   :  { %v3930_v48 = vadd.f32 %v3926_v19, %v5992_v49 }
0x174c   :  { %v3929_v25 = vadd.f32 %v3921_v35, %v5990_v45  ;;  %v4506_v45 = vld [vmem:[%s6382_s12 + $0x20] sm:$0xff] }
0x174d   :  { %v3938_v59 = vsel %vm75_vm0, %v3930_v48, 0.0  ;;  %v5148_v29 = vpack.c.bf16 %v4507_v9, %v4506_v45 }
0x174e   :  { %3939 = vadd.xlane.f32.xlu1 %v3938_v59  ;;  %v3935_v8 = vsel %vm75_vm0, %v3929_v25, 0.0 }
0x174f   :  { %3936 = vadd.xlane.f32.xlu0 %v3935_v8  ;;  %5149 = vmatprep.subr.bf16.mxu0 %v5148_v29 }
0x1750   :  { %5151 = vmatpush3.bf16.msra.mxu0 %v5148_v29 }
0x1751   :  { %5153 = vmatprep.subr.bf16.mxu0 %v5152_v21 }
0x1754   :  { %5155 = vmatpush3.bf16.msra.mxu0 %v5152_v21 }
0x17db   :  { %v3940_v43 = vpop.xlane.xlu1 %3939 }
0x17dc   :  { %v3942_v47 = vmul.f32 0.03125, %v3940_v43  ;;  %v3937_v62 = vpop.xlane.xlu0 %3936 }
0x17dd   :  { %v3941_v46 = vmul.f32 0.03125, %v3937_v62 }
0x17de   :  { %v3944_v7 = vsub.f32 %v3930_v48, %v3942_v47 }
0x17df   :  { %v3943_v24 = vsub.f32 %v3929_v25, %v3941_v46  ;;  %v4523_v46 = vld [vmem:[%s6385_s15 + $0x1] ss:$0 sm:$0xff] }
0x17e0   :  { %v3946_v32 = vmul.f32 %v3944_v7, %v3944_v7 }
0x17e1   :  { %v3945_v5 = vmul.f32 %v3943_v24, %v3943_v24 }
0x17e2   :  { %v3950_v49 = vsel %vm75_vm0, %v3946_v32, 0.0 }
0x17e3   :  { %v3947_v26 = vsel %vm75_vm0, %v3945_v5, 0.0 }
0x17e4   :  { %3948 = vadd.xlane.f32.xlu0 %v3947_v26 }
0x17e8   :  { %3951 = vadd.xlane.f32.xlu0 %v3950_v49 }
0x1871   :  { %v3949_v41 = vpop.xlane.xlu0 %3948 }
0x1872   :  { %v3953_v20 = vmul.f32 0.03125, %v3949_v41 }
0x1874   :  { %v3955_v23 = vadd.f32 1e-12, %v3953_v20 }
0x1875   :  { %v3952_v27 = vpop.xlane.xlu0 %3951 }
0x1876   :  { %5405 = vrsqrt.f32 %v3955_v23  ;;  %v3954_v4 = vmul.f32 0.03125, %v3952_v27 }
0x1878   :  { %v3956_v16 = vadd.f32 1e-12, %v3954_v4 }
0x187a   :  { %5407 = vrsqrt.f32 %v3956_v16 }
0x1880   :  { %v5406_v60 = vpop.eup %5405 }
0x1881   :  { %v3959_v33 = vmul.f32 %v5406_v60, %v3943_v24  ;;  %v4240_v60 = vld [vmem:[%s6388_s18] sm:$0xff] }
0x1883   :  { %v3967_v30 = vmul.f32 %v4504_v28, %v3959_v33 }
0x1884   :  { %v5408_v39 = vpop.eup %5407 }
0x1885   :  { %v3960_v34 = vmul.f32 %v5408_v39, %v3944_v7  ;;  %v3975_v40 = vadd.f32 %v4505_v22, %v3967_v30  ;;  %v4242_v30 = vld [vmem:[%s6388_s18 + $0x10] sm:$0xff]  ;;  %v4243_v39 = vld [vmem:[%s6388_s18 + $0x18] sm:$0xff] }
0x1887   :  { %v3968_v44 = vmul.f32 %v4504_v28, %v3960_v34  ;;  %4979 = vmatprep.mubr.msk.f32.mxu0 %vm75_vm0, %v3975_v40  ;;  %v4241_v28 = vld [vmem:[%s6388_s18 + $0x8] sm:$0xff]  ;;  %v5176_v34 = vpack.c.bf16 %v4243_v39, %v4242_v30 }
0x1888   :  { %v5173_v33 = vpack.c.bf16 %v4241_v28, %v4240_v60 }
0x1889   :  { %v3976_v56 = vadd.f32 %v4505_v22, %v3968_v44  ;;  %v5485_v22 = vmov 0.0|0.0  }
0x188a   :  { %5172 = vmatprep.subr.bf16.mxu0 %v5485_v22 }
0x188b   :  { %4980 = vmatmul.mubr.msk.f32.vlgmr.msra.gmra.mrb[32].mxu0 %vm75_vm0, %v3976_v56 }
0x188c   :  { %5174 = vmatpush3.bf16.msra.mxu0 %v5173_v33 }
0x188d   :  { %5175 = vmatprep.subr.bf16.mxu0 %v5485_v22 }
0x1890   :  { %5177 = vmatpush3.bf16.msra.mxu0 %v5176_v34 }
0x195e   :  { %v4981_v1 = vpop.f32.mrb[32].mxu0 }
0x195f   :  { %v4068_v3 = vadd.f32 %v4981_v1, %v4511_v0  ;;  %v4062_v2 = vpop.f32.mrb[33].mxu0 }
0x1960   :  { %v4063_v53 = vadd.f32 %v4511_v0, %v4062_v2 }
0x1961   :  { %v4072_v12 = vmul.f32 %v4068_v3, %v4068_v3 }
0x1962   :  { %v4071_v13 = vmul.f32 %v4063_v53, %v4063_v53 }
0x1963   :  { %v4074_v14 = vmul.f32 %v4072_v12, %v4068_v3 }
0x1964   :  { %v4073_v15 = vmul.f32 %v4071_v13, %v4063_v53 }
0x1965   :  { %v4076_v17 = vmul.f32 0.044715, %v4074_v14 }
0x1966   :  { %v4075_v18 = vmul.f32 0.044715, %v4073_v15 }
0x1967   :  { %v4078_v37 = vadd.f32 %v4076_v17, %v4068_v3 }
0x1968   :  { %v4077_v38 = vadd.f32 %v4075_v18, %v4063_v53 }
0x1969   :  { %v4080_v19 = vmul.f32 0.7978846, %v4078_v37 }
0x196a   :  { %v4079_v42 = vmul.f32 0.7978846, %v4077_v38 }
0x196b   :  { %5409 = vtanh.f32 %v4080_v19 }
0x196c   :  { %5411 = vtanh.f32 %v4079_v42 }
0x1975   :  { %v5410_v35 = vpop.eup %5409 }
0x1976   :  { %v5412_v48 = vpop.eup %5411  ;;  %v4084_v25 = vadd.f32 1.0, %v5410_v35 }
0x1977   :  { %v4083_v59 = vadd.f32 1.0, %v5412_v48 }
0x1978   :  { %v4086_v8 = vmul.f32 0.5, %v4084_v25 }
0x1979   :  { %v4085_v43 = vmul.f32 0.5, %v4083_v59 }
0x197a   :  { %v4088_v62 = vmul.f32 %v4086_v8, %v4068_v3 }
0x197b   :  { %v4087_v47 = vmul.f32 %v4085_v43, %v4063_v53  ;;  %v4530_v53 = vld [vmem:[%s6389_s19] ss:$0 sm:$0xff] }
0x197d   :  { %4998 = vmatprep.mubr.msk.f32.mxu1 %vm2045_vm7, %v4087_v47 }
0x197e   :  { %4999 = vmatmul.mubr.msk.f32.vlgmr.msra.gmra.mrb[28].mxu1 %vm2045_vm7, %v4088_v62 }
0x1a51   :  { %v5000_v7 = vpop.f32.mrb[28].mxu1 }
0x1a52   :  { %v4184_v24 = vadd.f32 %v5000_v7, %v4523_v46  ;;  %v4178_v5 = vpop.f32.mrb[29].mxu1 }
0x1a53   :  { %v4179_v26 = vadd.f32 %v4523_v46, %v4178_v5 }
0x1a54   :  { %v4188_v32 = vadd.f32 %v4184_v24, %v3976_v56 }
0x1a55   :  { %v4187_v49 = vadd.f32 %v4179_v26, %v3975_v40  ;;  %v5487_v40 = vmov 0.0  }
0x1a56   :  { %v4196_v45 = vsel %vm75_vm0, %v4188_v32, 0.0  ;;  %5009 = vmatprep.mubr.msk.f32.mxu0 %vm5486_vm8, %v5487_v40 }
0x1a57   :  { %4197 = vadd.xlane.f32.xlu0 %v4196_v45  ;;  %v4193_v9 = vsel %vm75_vm0, %v4187_v49, 0.0 }
0x1a58   :  { %4194 = vadd.xlane.f32.xlu1 %v4193_v9 }
0x1ae4   :  { %v4198_v29 = vpop.xlane.xlu0 %4197 }
0x1ae5   :  { %v4200_v6 = vmul.f32 0.03125, %v4198_v29  ;;  %v4195_v31 = vpop.xlane.xlu1 %4194 }
0x1ae6   :  { %v4199_v21 = vmul.f32 0.03125, %v4195_v31 }
0x1ae7   :  { %v4202_v41 = vsub.f32 %v4188_v32, %v4200_v6 }
0x1ae8   :  { %v4201_v20 = vsub.f32 %v4187_v49, %v4199_v21 }
0x1ae9   :  { %v4204_v23 = vmul.f32 %v4202_v41, %v4202_v41 }
0x1aea   :  { %v4203_v27 = vmul.f32 %v4201_v20, %v4201_v20 }
0x1aeb   :  { %v4208_v4 = vsel %vm75_vm0, %v4204_v23, 0.0 }
0x1aec   :  { %4209 = vadd.xlane.f32.xlu0 %v4208_v4  ;;  %v4205_v16 = vsel %vm75_vm0, %v4203_v27, 0.0 }
0x1aed   :  { %4206 = vadd.xlane.f32.xlu1 %v4205_v16 }
0x1b79   :  { %v4210_v44 = vpop.xlane.xlu0 %4209 }
0x1b7a   :  { %v4212_v56 = vmul.f32 0.03125, %v4210_v44  ;;  %v4207_v50 = vpop.xlane.xlu1 %4206 }
0x1b7b   :  { %v4211_v51 = vmul.f32 0.03125, %v4207_v50 }
0x1b7c   :  { %v4214_v52 = vadd.f32 1e-12, %v4212_v56 }
0x1b7d   :  { %v4213_v54 = vadd.f32 1e-12, %v4211_v51 }
0x1b7e   :  { %5413 = vrsqrt.f32 %v4214_v52 }
0x1b7f   :  { %5415 = vrsqrt.f32 %v4213_v54 }
0x1b88   :  { %v5414_v55 = vpop.eup %5413 }
0x1b89   :  { %v5416_v58 = vpop.eup %5415  ;;  %v4218_v10 = vmul.f32 %v5414_v55, %v4202_v41 }
0x1b8a   :  { %v4217_v11 = vmul.f32 %v5416_v58, %v4201_v20 }
0x1b8b   :  { %v4226_v63 = vmul.f32 %v4528_v57, %v4218_v10 }
0x1b8c   :  { %v4225_v36 = vmul.f32 %v4528_v57, %v4217_v11 }
0x1b8d   :  { %v4234_v0 = vadd.f32 %v4529_v61, %v4226_v63 }
0x1b8e   :  { %v4233_v1 = vadd.f32 %v4529_v61, %v4225_v36 }
0x1b8f   :  { %v4236_v3 = vrot.slane %v4234_v0, 7 }
0x1b91   :  { %v4239_v2 = vsel %vm4238_vm9, %v4233_v1, %v4236_v3 }
0x1b92   :  { %5010 = vmatmul.mubr.msk.f32.vlgmr.msra.gmra.mrb[34].mxu0 %vm75_vm0, %v4239_v2 }
0x1c65   :  { %v4320_v12 = vpop.f32.mrb[34].mxu0 }
0x1c66   :  { %v4321_v13 = vadd.f32 %v4530_v53, %v4320_v12  ;;  %v5011_v14 = vpop.f32.mrb[35].mxu0 }
0x1c68   :  { %4324 = vst [vmem:[#allocation2] sm:$0x3] %v4321_v13  ;;  %v4326_v15 = vsel %vm4325_vm10, %v4321_v13, -inf }
0x1c69   :  { %4327 = vmax.xlane.f32.xlu0 %v4326_v15 }
0x1cf6   :  { %v4328_v17 = vpop.xlane.xlu0 %4327 }
0x1cf7   :  { %v4329_v18 = vsub.f32 %v4321_v13, %v4328_v17 }
0x1cf9   :  { %v4330_v37 = vmul.f32 1.442695, %v4329_v18 }
0x1cfb   :  { %5417 = vpow2.f32 %v4330_v37 }
0x1d05   :  { %v5418_v38 = vpop.eup %5417 }
0x1d06   :  { %v4332_v19 = vsel %vm4325_vm10, %v5418_v38, 0.0 }
0x1d07   :  { %4333 = vadd.xlane.f32.xlu1 %v4332_v19 }
0x1d08   :  { %5434 = shalt.err (!%p5431_p4)
}
0x1d09   :  { %s5435_s9 = scalar_lea.hbm %s6390_s20, 32 }
0x1d0a   :  { %p5436_p5 = scmp.ne.s32.totalorder %s6390_s20, %s5435_s9  ;;  %p5439_p6 = scmp.lt.u32.totalorder %s5435_s9, %s6390_s20 }
0x1d0c   :  { %p5441_p7 = pnand %p5439_p6, %p5436_p5 }
0x1d0e   :  { %5444 = shalt.err (!%p5441_p7)
}
0x1d0f   :  { %4347 = dma.vmem_to_hbm [thread:$0]  %s4345_s17, 32, %s6390_s20, [#allocation3]  }
0x1d10   :  { %s5489_s26 = smov [#allocation4]  }
0x1d11   :  { %s4354_s13 = sshll.u32 %s5489_s26, 4  ;;  %s4355_s13 = int_to_ptr.vmem [resolvable:$true] %s4354_s13 }
0x1d12   :  { %s5445_s14 = scalar_lea.vmem %s4355_s13, 32  ;;  %p5450_p9 = scmp.lt.s32.totalorder %s4355_s13, %s4355_s13 }
0x1d13   :  { %p5446_p8 = scmp.ne.s32.totalorder %s4355_s13, %s5445_s14  ;;  %p5451_p10 = scmp.lt.s32.totalorder %s5445_s14, %s5445_s14 }
0x1d15   :  { %p5452_p11 = por %p5451_p10, %p5450_p9 }
0x1d17   :  { %p5453_p12 = pnand %p5452_p11, %p5446_p8 }
0x1d94   :  { %v4334_v42 = vpop.xlane.xlu1 %4333 }
0x1d95   :  { %5419 = vrcp.f32 %v4334_v42 }
0x1d9f   :  { %v5420_v35 = vpop.eup %5419 }
0x1da0   :  { %v4336_v48 = vmul.f32 %v5420_v35, %v5418_v38 }
0x1da2   :  { %4337 = vst [vmem:[#allocation4] sm:$0x3] %v4336_v48 }
0x1da3   :  { %5456 = shalt.err (!%p5453_p12)
}
0x1da4   :  { %s5457_s27 = scalar_lea.hbm %s6391_s21, 32 }
0x1da5   :  { %p5458_p13 = scmp.ne.s32.totalorder %s6391_s21, %s5457_s27  ;;  %p5461_p0 = scmp.lt.u32.totalorder %s5457_s27, %s6391_s21 }
0x1da7   :  { %p5463_p1 = pnand %p5461_p0, %p5458_p13 }
0x1da9   :  { %5466 = shalt.err (!%p5463_p1)
}
0x1daa   :  { %4357 = dma.vmem_to_hbm [thread:$0]  %s4355_s13, 32, %s6391_s21, [#allocation5]  }
0x1dab   :  { %5467 = dma.done.wait [#allocation3], 32  }
0x1dac   :  { %5468 = vsyncadd [#allocation3], 4294967264 }
0x1dad   :  { %5469 = dma.done.wait [#allocation5], 32  }
0x1dae   :  { %5470 = vsyncadd [#allocation5], 4294967264 }
0x1daf   :  { %4364 = vsyncpa [#allocation3], 1 }
0x1db0   :  { %4365 = vsyncpa [#allocation5], 1 }

</bundles_post_ra>
